<compile_context>
chip_gen: v5e
topology: v5e:2x2
jax: 0.10.0
libtpu: 0.0.40
codegen_flags: <defaults>
</compile_context>

<pallas_src>
import jax
import jax.numpy as jnp
from jax import lax
from jax.experimental import pallas as pl
from jax.experimental.pallas import tpu as pltpu


def _round_up(v, m):
    return (v + m - 1) // m * m


def _cdiv(a, b):
    return (a + b - 1) // b


def _pick_tile(dim, target, align):
    """Tile for `dim`: the full dim if it fits one block (always a legal block
    shape), else the smallest `align`-multiple that covers dim in
    cdiv(round_up(dim), target) balanced blocks (never collapses to `align`)."""
    padded = _round_up(dim, align)
    target = _round_up(max(target, align), align)
    if padded <= target:
        return dim
    nblocks = _cdiv(padded, target)
    return _round_up(_cdiv(dim, nblocks), align)


def _apply_activation(out, activation):
    if activation == "relu":
        return jnp.maximum(out, 0.0)
    if activation == "lrelu":  # nn.LeakyReLU(0.2) in the PyTorch module
        return jnp.where(out >= 0.0, out, 0.2 * out)
    if activation == "tanh":
        return jnp.tanh(out)
    return out  # 'none'


def _make_acc_kernel(activation, tk, k_rem):
    """3-D grid (i, j, k) kernel with f32 VMEM accumulator over the K axis."""

    def kernel(x_ref, w_ref, b_ref, o_ref, acc_ref):
        k = pl.program_id(2)
        nk = pl.num_programs(2)

        @pl.when(k == 0)
        def _():
            acc_ref[...] = jnp.zeros_like(acc_ref)

        x = x_ref[...]
        w = w_ref[...]
        if k_rem:  # K ragged w.r.t. tk: zero the out-of-bounds tail of the last k tile.
            limit = jnp.where(k == nk - 1, k_rem, tk)
            x = jnp.where(lax.broadcasted_iota(jnp.int32, x.shape, 1) < limit, x, 0)
            w = jnp.where(lax.broadcasted_iota(jnp.int32, w.shape, 0) < limit, w, 0)

        acc_ref[...] += jnp.dot(x, w, preferred_element_type=jnp.float32)

        @pl.when(k == nk - 1)
        def _():
            out = acc_ref[...] + b_ref[...].astype(jnp.float32)
            o_ref[...] = _apply_activation(out, activation).astype(o_ref.dtype)

    return kernel


def _make_single_k_kernel(activation):
    """2-D grid kernel (whole K in one tile): no scratch, fused epilogue."""

    def kernel(x_ref, w_ref, b_ref, o_ref):
        out = jnp.dot(x_ref[...], w_ref[...], preferred_element_type=jnp.float32)
        out = out + b_ref[...].astype(jnp.float32)
        o_ref[...] = _apply_activation(out, activation).astype(o_ref.dtype)

    return kernel


def _xla_linear_block(x, weight, bias, activation):
    out = jnp.dot(
        x, weight.T, preferred_element_type=jnp.float32, precision=lax.Precision.HIGHEST
    ) + bias.astype(jnp.float32)
    return _apply_activation(out, activation).astype(x.dtype)


def linear_block(
    x,
    weight,
    bias,
    norm="none",
    activation="relu",
    *,
    compute_dtype=None,
    force_pallas=False,
    tm_target=512,
    tn_target=1024,
    tk_target=512,
):
    """Pallas equivalent of LinearBlock.forward (norm='none').

    x:      (B, in_dim)
    weight: (out_dim, in_dim)   -- PyTorch nn.Linear convention
    bias:   (out_dim,)
    """
    assert norm == "none", "only norm='none' is implemented"
    # TODO(synk): norm='bn' (BatchNorm1d) and norm='in' (InstanceNorm1d) are not implemented.
    assert activation in ("relu", "lrelu", "tanh", "none")

    M, K = x.shape
    N, K2 = weight.shape
    assert K == K2 and bias.shape == (N,)

    # Tiny problems: per-step / launch overhead dwarfs the work -> fused XLA path.
    if not force_pallas and (M * N * K) < (128 * 128 * 128):
        return _xla_linear_block(x, weight, bias, activation)

    out_dtype = x.dtype
    cdtype = jnp.dtype(compute_dtype) if compute_dtype is not None else jnp.dtype(x.dtype)

    # One-time layout plumbing: (out,in) -> (in,out) so the RHS tile is (tk,tn)
    # in the MXU's natural orientation.  Done once; removes per-k-step XLU work.
    wt = jnp.transpose(weight)
    xq = x if cdtype == jnp.dtype(x.dtype) else x.astype(cdtype)
    wt = wt if cdtype == jnp.dtype(wt.dtype) else wt.astype(cdtype)
    b2 = bias.reshape(1, N)

    sub = 16 if (jnp.dtype(cdtype).itemsize == 2 or jnp.dtype(out_dtype).itemsize == 2) else 8
    tm = _pick_tile(M, tm_target, sub)
    tn = _pick_tile(N, tn_target, 128)
    tk = _pick_tile(K, tk_target, 128)

    # Give both v7x TensorCores work: ensure >= 2 blocks across the parallel axes.
    if _cdiv(M, tm) * _cdiv(N, tn) < 2:
        if M >= 2 * sub:
            tm = _round_up(_cdiv(M, 2), sub)
        elif N >= 256:
            tn = _round_up(_cdiv(N, 2), 128)

    nm, nn, nk = _cdiv(M, tm), _cdiv(N, tn), _cdiv(K, tk)
    k_rem = K % tk if nk > 1 else 0

    in_b = jnp.dtype(cdtype).itemsize
    out_b = jnp.dtype(out_dtype).itemsize
    est = (
        2 * (tm * tk * in_b + tk * tn * in_b + tn * jnp.dtype(bias.dtype).itemsize)
        + 2 * tm * tn * out_b
        + (tm * tn * 4 if nk > 1 else 0)
    )
    vmem_limit = int(min(48 << 20, max(32 << 20, est * 5 // 4 + (2 << 20))))

    if nk == 1:
        grid = (nm, nn)
        kernel = _make_single_k_kernel(activation)
        in_specs = [
            pl.BlockSpec((tm, tk), lambda i, j: (i, 0)),   # x tile
            pl.BlockSpec((tk, tn), lambda i, j: (0, j)),   # weight tile (pre-transposed)
            pl.BlockSpec((1, tn), lambda i, j: (0, j)),    # bias tile
        ]
        out_specs = pl.BlockSpec((tm, tn), lambda i, j: (i, j))
        scratch = []
        dims = ("parallel", "parallel")
    else:
        grid = (nm, nn, nk)
        kernel = _make_acc_kernel(activation, tk, k_rem)
        in_specs = [
            pl.BlockSpec((tm, tk), lambda i, j, k: (i, k)),   # x tile
            pl.BlockSpec((tk, tn), lambda i, j, k: (k, j)),   # weight tile (pre-transposed)
            pl.BlockSpec((1, tn), lambda i, j, k: (0, j)),    # bias tile (epilogue only)
        ]
        out_specs = pl.BlockSpec((tm, tn), lambda i, j, k: (i, j))
        scratch = [pltpu.VMEM((tm, tn), jnp.float32)]
        dims = ("parallel", "parallel", "arbitrary")

    return pl.pallas_call(
        kernel,
        out_shape=jax.ShapeDtypeStruct((M, N), out_dtype),
        grid_spec=pltpu.PrefetchScalarGridSpec(
            num_scalar_prefetch=0,
            grid=grid,
            in_specs=in_specs,
            out_specs=out_specs,
            scratch_shapes=scratch,
        ),
        compiler_params=pltpu.CompilerParams(
            dimension_semantics=dims,
            vmem_limit_bytes=vmem_limit,
        ),
    )(xq, wt, b2)


def _reference(x, weight, bias, activation="relu"):
    out = jnp.dot(
        x, weight.T, preferred_element_type=jnp.float32, precision=lax.Precision.HIGHEST
    ) + bias.astype(jnp.float32)
    return _apply_activation(out, activation).astype(x.dtype)


if __name__ == "__main__":
    key = jax.random.PRNGKey(0)
    k1, k2, k3, k4, k5, k6, k7, k8, k9 = jax.random.split(key, 9)

    # Case 1: multi-k grid, ragged M/N handled by cdiv grid (no pad copies),
    # pre-transposed weight tiles, relu epilogue.
    M, K, N = 384, 1024, 640
    x = jax.random.normal(k1, (M, K), dtype=jnp.float32)
    w = jax.random.normal(k2, (N, K), dtype=jnp.float32) * (1.0 / jnp.sqrt(K))
    b = jax.random.normal(k3, (N,), dtype=jnp.float32) * 0.01

    out = jax.block_until_ready(linear_block(x, w, b))
    ref = _reference(x, w, b)
    assert out.shape == (M, N)
    assert jnp.allclose(out, ref, atol=1e-3, rtol=1e-3), "mismatch vs reference (case 1)"

    # Case 1b: optional bf16 compute path (f32 accumulation).
    out_bf = jax.block_until_ready(linear_block(x, w, b, compute_dtype=jnp.bfloat16))
    assert jnp.allclose(out_bf, ref, atol=5e-2, rtol=5e-2), "mismatch vs reference (bf16 compute)"

    # Case 2: ragged K (exercises the in-kernel last-k-tile masking) + tanh.
    M2, K2_, N2 = 256, 1200, 384
    x2 = jax.random.normal(k4, (M2, K2_), dtype=jnp.float32)
    w2 = jax.random.normal(k5, (N2, K2_), dtype=jnp.float32) * (1.0 / jnp.sqrt(K2_))
    b2 = jax.random.normal(k6, (N2,), dtype=jnp.float32) * 0.01

    out2 = jax.block_until_ready(linear_block(x2, w2, b2, activation="tanh"))
    ref2 = _reference(x2, w2, b2, activation="tanh")
    assert out2.shape == (M2, N2)
    assert jnp.allclose(out2, ref2, atol=1e-3, rtol=1e-3), "mismatch vs reference (case 2)"

    # Case 3: tiny MLP-head shape; force the Pallas path (single-k, scratch-free
    # kernel, full-dim blocks) and sweep all activations.
    Bs, in_dim, out_dim = 8, 32, 16
    xs = jax.random.normal(k7, (Bs, in_dim), dtype=jnp.float32)
    ws = jax.random.normal(k8, (out_dim, in_dim), dtype=jnp.float32) * (1.0 / jnp.sqrt(in_dim))
    bs = jax.random.normal(k9, (out_dim,), dtype=jnp.float32) * 0.01

    for act in ("relu", "lrelu", "tanh", "none"):
        o = jax.block_until_ready(linear_block(xs, ws, bs, activation=act, force_pallas=True))
        r = _reference(xs, ws, bs, activation=act)
        assert o.shape == (Bs, out_dim)
        assert jnp.allclose(o, r, atol=1e-3, rtol=1e-3), f"mismatch vs reference (tiny, {act})"

    # Also exercise the small-shape XLA fallback dispatch.
    outf = jax.block_until_ready(linear_block(xs, ws, bs))
    assert jnp.allclose(outf, _reference(xs, ws, bs), atol=1e-3, rtol=1e-3), "mismatch (fallback)"

    print("KERNEL_OK")
</pallas_src>

<mosaic_0001>
module attributes {stable_mosaic.version = 11 : i64} {
  func.func @kernel(%arg0: i32, %arg1: i32, %arg2: i32, %arg3: memref<192x512xf32, #tpu.memory_space<vmem>>, %arg4: memref<512x640xf32, #tpu.memory_space<vmem>>, %arg5: memref<1x640xf32, #tpu.memory_space<vmem>>, %arg6: memref<192x640xf32, #tpu.memory_space<vmem>>, %arg7: memref<192x640xf32, #tpu.memory_space<vmem>>) attributes {dimension_semantics = [#tpu.dimension_semantics<parallel>, #tpu.dimension_semantics<parallel>, #tpu.dimension_semantics<arbitrary>], iteration_bounds = array<i64: 2, 1, 2>, scalar_prefetch = 0 : i64, scratch_operands = 1 : i64, tpu.core_type = #tpu.core_type<tc>, window_params = [{transform_indices = @transform_0, window_bounds = array<i64: 192, 512>}, {transform_indices = @transform_1, window_bounds = array<i64: 512, 640>}, {transform_indices = @transform_2, window_bounds = array<i64: 1, 640>}, {transform_indices = @transform_3, window_bounds = array<i64: 192, 640>}]} {
    %c0_i32 = arith.constant 0 : i32
    %0 = arith.cmpi eq, %arg2, %c0_i32 : i32
    %1 = arith.extui %0 : i1 to i32
    %c0_i32_0 = arith.constant 0 : i32
    %2 = arith.cmpi ne, %1, %c0_i32_0 : i32
    scf.if %2 {
      %cst_9 = arith.constant 0.000000e+00 : f32
      %12 = vector.broadcast %cst_9 : f32 to vector<192x640xf32>
      %c0_10 = arith.constant 0 : index
      %c0_11 = arith.constant 0 : index
      %13 = vector.load %arg7[%c0_10, %c0_11] : memref<192x640xf32, #tpu.memory_space<vmem>>, vector<192x640xf32>
      tpu.vector_store %arg7[%c0_10, %c0_11], %12 {strides = array<i32>} : memref<192x640xf32, #tpu.memory_space<vmem>>, vector<192x640xf32>,
    } else {
    }
    %c0 = arith.constant 0 : index
    %c0_1 = arith.constant 0 : index
    %3 = vector.load %arg3[%c0, %c0_1] : memref<192x512xf32, #tpu.memory_space<vmem>>, vector<192x512xf32>
    %c0_2 = arith.constant 0 : index
    %c0_3 = arith.constant 0 : index
    %4 = vector.load %arg4[%c0_2, %c0_3] : memref<512x640xf32, #tpu.memory_space<vmem>>, vector<512x640xf32>
    %c0_4 = arith.constant 0 : index
    %c0_5 = arith.constant 0 : index
    %5 = vector.load %arg7[%c0_4, %c0_5] : memref<192x640xf32, #tpu.memory_space<vmem>>, vector<192x640xf32>
    %cst = arith.constant dense<0.000000e+00> : vector<192x640xf32>
    %6 = tpu.matmul %3, %4, %cst {dimension_numbers = #tpu.dot_dimension_numbers<[1], [0], [0], [1], [0, 0, 1, 1], [], []>} : vector<192x512xf32>, vector<512x640xf32>, vector<192x640xf32> -> vector<192x640xf32>
    %7 = arith.addf %5, %6 : vector<192x640xf32>
    %c0_6 = arith.constant 0 : index
    %c0_7 = arith.constant 0 : index
    %8 = vector.load %arg7[%c0_6, %c0_7] : memref<192x640xf32, #tpu.memory_space<vmem>>, vector<192x640xf32>
    tpu.vector_store %arg7[%c0_6, %c0_7], %7 {strides = array<i32>} : memref<192x640xf32, #tpu.memory_space<vmem>>, vector<192x640xf32>,
    %c1_i32 = arith.constant 1 : i32
    %9 = arith.cmpi eq, %arg2, %c1_i32 : i32
    %10 = arith.extui %9 : i1 to i32
    %c0_i32_8 = arith.constant 0 : i32
    %11 = arith.cmpi ne, %10, %c0_i32_8 : i32
    scf.if %11 {
      %c0_9 = arith.constant 0 : index
      %c0_10 = arith.constant 0 : index
      %12 = vector.load %arg7[%c0_9, %c0_10] : memref<192x640xf32, #tpu.memory_space<vmem>>, vector<192x640xf32>
      %c0_11 = arith.constant 0 : index
      %c0_12 = arith.constant 0 : index
      %13 = vector.load %arg5[%c0_11, %c0_12] : memref<1x640xf32, #tpu.memory_space<vmem>>, vector<1x640xf32>
      %14 = vector.broadcast %13 : vector<1x640xf32> to vector<192x640xf32>
      %15 = arith.addf %12, %14 : vector<192x640xf32>
      %cst_13 = arith.constant 0.000000e+00 : f32
      %16 = vector.broadcast %cst_13 : f32 to vector<192x640xf32>
      %17 = arith.maximumf %15, %16 : vector<192x640xf32>
      %c0_14 = arith.constant 0 : index
      %c0_15 = arith.constant 0 : index
      %18 = vector.load %arg6[%c0_14, %c0_15] : memref<192x640xf32, #tpu.memory_space<vmem>>, vector<192x640xf32>
      tpu.vector_store %arg6[%c0_14, %c0_15], %17 {strides = array<i32>} : memref<192x640xf32, #tpu.memory_space<vmem>>, vector<192x640xf32>,
    } else {
    }
    return
  }
  func.func @transform_0(%arg0: i32, %arg1: i32, %arg2: i32) -> (i32, i32) {
    %c0_i32 = arith.constant 0 : i32
    return %arg0, %arg2 : i32, i32
  }
  func.func @transform_1(%arg0: i32, %arg1: i32, %arg2: i32) -> (i32, i32) {
    %c0_i32 = arith.constant 0 : i32
    return %arg2, %arg1 : i32, i32
  }
  func.func @transform_2(%arg0: i32, %arg1: i32, %arg2: i32) -> (i32, i32) {
    %c0_i32 = arith.constant 0 : i32
    %c0_i32_0 = arith.constant 0 : i32
    return %c0_i32, %arg1 : i32, i32
  }
  func.func @transform_3(%arg0: i32, %arg1: i32, %arg2: i32) -> (i32, i32) {
    %c0_i32 = arith.constant 0 : i32
    return %arg0, %arg1 : i32, i32
  }
}

</mosaic_0001>

<bundles_post_ra>
// kernel: tpu_custom_call.1
= control target key start
LH: loop header
LB: loop body
LE: loop exit
PB: predicated region body
PF: predicated region fallthrough
CT: control target
= control target key end

     0   :  { %s6286_s0 = inlined_call_operand.hbm [shape: f32[384,1024], index: 0, kind: input, shape index: {}]   ;;  %s6287_s1 = inlined_call_operand.hbm [shape: f32[1024,640], index: 1, kind: input, shape index: {}]   ;;  %s6288_s2 = inlined_call_operand.hbm [shape: f32[1,640], index: 2, kind: input, shape index: {}]   ;;  %s6289_s3 = inlined_call_operand.hbm [shape: f32[384,640], index: 3, kind: output, shape index: {}]  }
   0x1   :  { %6399 = sst [smem:[#allocation76_spill]] %s6288_s2 }
   0x2   :  { %6400 = sst [smem:[#allocation77_spill]] %s6289_s3 }
   0x3   :  { %8 = vsyncpa [#allocation4], 0 }
   0x4   :  { %10 = vsyncpa [#allocation4 + $0x1], 0 }
   0x5   :  { %11 = vsyncpa [#allocation7], 0 }
   0x6   :  { %13 = vsyncpa [#allocation7 + $0x1], 0 }
   0x7   :  { %14 = vsyncpa [#allocation5], 0 }
   0x8   :  { %16 = vsyncpa [#allocation5 + $0x1], 0  ;;  %s4261_s12 = smov 0   ;;  %s4263_s13 = smov 0  }
   0x9   :  { %s4265_s14 = smov 0   ;;  %s4267_s15 = smov 0  }
   0xa   :  { %s4269_s16 = smov 0   ;;  %s4271_s17 = smov 0  }
   0xb   :  { %s4273_s18 = smov 0   ;;  %s4275_s19 = smov 0  }
   0xc   :  { %s4277_s20 = smov 0   ;;  %s4279_s21 = smov 0  }
   0xd   :  { %s4281_s22 = smov 0   ;;  %s4283_s23 = smov 0  }
   0xe   :  { %s4285_s24 = smov 0   ;;  %s4287_s25 = smov 0  }
   0xf LB: > { %6401 = sst [smem:[#allocation14_spill]] %s4178_s12  ;;  %s4328_s26 = sadd.s32 4294967295, %s4230_s25   ;;  %s4230_s25 = sphi %s4287_s25, %s22_s25   ;;  %s4226_s24 = sphi %s4285_s24, %s6636_s24   ;;  %s4222_s23 = sphi %s4283_s23, %s6644_s23   ;;  %s4218_s22 = sphi %s4281_s22, %s6634_s22   ;;  %s4214_s21 = sphi %s4279_s21, %s6643_s21   ;;  %s4210_s20 = sphi %s4277_s20, %s6633_s20   ;;  %s4206_s19 = sphi %s4275_s19, %s6642_s19   ;;  %s4202_s18 = sphi %s4273_s18, %s6641_s18   ;;  %s4198_s17 = sphi %s4271_s17, %s6640_s17   ;;  %s4194_s16 = sphi %s4269_s16, %s6639_s16   ;;  %s4190_s15 = sphi %s4267_s15, %s6638_s15   ;;  %s4186_s14 = sphi %s4265_s14, %s6630_s14   ;;  %s4182_s13 = sphi %s4263_s13, %s6629_s13   ;;  %s4178_s12 = sphi %s4261_s12, %s6628_s12  }
  0x10   : > { %6402 = sst [smem:[#allocation15_spill]] %s4182_s13  ;;  %s3618_s27 = sadd.s32 4294967294, %s4230_s25  }
  0x11   : > { %6403 = sst [smem:[#allocation16_spill]] %s4186_s14  ;;  %p58_p0 = scmp.eq.s32.totalorder %s4230_s25, 0 }
  0x12   : > { %6404 = sst [smem:[#allocation17_spill]] %s4210_s20  ;;  %p63_p1 = scmp.ne.s32.totalorder %s4206_s19, %s4202_s18 }
  0x13   : > { %6405 = sst [smem:[#allocation18_spill]] %s4214_s21  ;;  %p6292_p2 = scmp.eq.s32.totalorder %s4328_s26, 0 }
  0x14   : > { %6406 = sst [smem:[#allocation19_spill]] %s4218_s22  ;;  %s78_s28 = sadd.s32 1, %s4198_s17 }
  0x15   : > { %6407 = sst [smem:[#allocation20_spill]] %s4226_s24  ;;  %p85_p3 = scmp.ne.s32.totalorder %s4198_s17, %s4194_s16 }
  0x16   : > { %p91_p4 = scmp.ne.s32.totalorder %s4194_s16, %s4190_s15  ;;  %p4340_p5 = por %p6292_p2, %p63_p1 }
  0x17   : > { %p4347_p6 = por %p85_p3, %p58_p0  ;;  %p142_p8 = scmp.ne.s32.totalorder %s4186_s14, %s4182_s13 }
  0x18   : > { %p4353_p7 = por %p91_p4, %p6292_p2  ;;  %p143_p9 = scmp.eq.s32.totalorder %s4328_s26, 3 }
  0x19   : > { %p148_p10 = scmp.ne.s32.totalorder %s4182_s13, %s4178_s12  ;;  %p149_p11 = scmp.eq.s32.totalorder %s3618_s27, 3 }
  0x1a   : > { %s6410_s5 = scalar_select %p4353_p7, 1, 0 }
  0x1b   : > { %p4362_p12 = por %p143_p9, %p142_p8  ;;  %p3619_p13 = scmp.ge.s32.totalorder %s4230_s25, 1 }
  0x1c   : > { %6411 = sst [smem:[#allocation21_spill]] %s6410_s5  ;;  %p4367_p1 = por %p149_p11, %p148_p10 }
  0x1d   : > { %s6412_s6 = scalar_select %p4362_p12, 1, 0 }
  0x1e   : > { %s6414_s7 = scalar_select %p4367_p1, 1, 0 }
  0x1f   : > { %6413 = sst [smem:[#allocation22_spill]] %s6412_s6  ;;  %p156_p3 = scmp.lt.s32.totalorder %s4230_s25, 5 }
  0x20   : > { %6415 = sst [smem:[#allocation23_spill]] %s6414_s7  ;;  %s4232_s15 = smov [#allocation8]  }
  0x21   : > { %s6416_s2 = sld [smem:[#allocation76_spill]]  ;;  %p4375_p4 = pnand %p3619_p13, %p156_p3 }
  0x22   : > { %s172_s18 = sshll.u32 %s4232_s15, 4  ;;  %p3669_p9 = scmp.lt.s32.totalorder %s4230_s25, 4  ;;  %s173_s18 = int_to_ptr.vmem [resolvable:$true] %s172_s18 }
  0x23   : > { %p3653_p8 = pneg %p4375_p4  ;;  %s34_s8 = sadd.s32 1, %s4222_s23 }
  0x24   : > { %p4388_p11 = pnand %p3669_p9, %p4347_p6  ;;  %s41_s9 = sadd.s32 1, %s4226_s24 }
  0x25   : > { %p3654_p10 = pnand %p3653_p8, %p6292_p2  ;;  %p35_p13 = scmp.ge.s32.totalorder %s34_s8, 2 }
  0x26   : > { %s50_s30 = sadd.s32 1, %s4210_s20  ;;  %p57_p3 = scmp.ne.s32.totalorder %s4210_s20, %s4206_s19 }
  0x27   : > { %s170_s10 = sshll.u32 %s6416_s2, 4  ;;  %s183_s15 = sand.u32 1, %s4210_s20   ;;  %s171_s10 = int_to_ptr.hbm [resolvable:$true] %s170_s10 }
  0x28   : > { %3656 = dma.hbm_to_vmem [thread:$0]  (!%p3654_p10), %s171_s10, 80, %s173_s18, [#allocation7]  }
  0x29   : > { %s6646_s8 = smov (%p35_p13, %s34_s8), 0  ;;  %s6648_s9 = smov (!%p35_p13, %s41_s9), %s4226_s24 }
  0x2a   : > { %6419 = sst [smem:[#allocation24_spill]] %s6646_s8  ;;  %s46_s4 = ssub.s32 %s4222_s23, %s6646_s8 }
  0x2b   : > { %p4405_p6 = por %p58_p0, %p57_p3  ;;  %p43_p8 = scmp.ge.s32.totalorder %s6648_s9, 2 }
  0x2c   : > { %p76_p10 = scmp.eq.s32.totalorder %s46_s4, 0  ;;  %s3636_s18 = smul.u32 768, %s183_s15 }
  0x2d   : > { %s6650_s9 = smov (%p43_p8, %s6648_s9), 0  ;;  %s3622_s8 = sshll.u32 %s4222_s23, 2 }
  0x2e   : > { %6421 = sst [smem:[#allocation25_spill]] %s6650_s9  ;;  %s45_s7 = ssub.s32 %s4226_s24, %s6650_s9 }
  0x2f   : > { %s4414_s2 = scalar_select %p76_p10, %s4198_s17, %s78_s28  }
  0x30   : > { %s47_s12 = sor.u32 %s46_s4, %s45_s7  ;;  %p130_p13 = scmp.eq.s32.totalorder %s45_s7, 0 }
  0x31   : > { %6422 = sst [smem:[#allocation26_spill]] %s4414_s2  ;;  %p48_p2 = scmp.eq.s32.totalorder %s47_s12, 0 }
  0x32   : > { %s6423_s3 = sadd.s32 1, %s4186_s14  ;;  %s3635_s21 = smul.u32 192, %s4226_s24 }
  0x33   : > { %s4422_s6 = scalar_select %p130_p13, %s4186_s14, %s6423_s3  }
  0x34   : > { %s4425_s22 = scalar_select %p48_p2, %s4210_s20, %s50_s30  }
  0x35   : > { %6424 = sst [smem:[#allocation27_spill]] %s4422_s6  ;;  %s187_s13 = scalar_lea.vmem [#allocation3], %s3636_s18 }
  0x36   : > { %6425 = sst [smem:[#allocation28_spill]] %s4425_s22  ;;  %s198_s5 = sshll.u32 %s187_s13, 4  ;;  %s199_s5 = int_to_ptr.vmem [resolvable:$true] %s198_s5 }
  0x37   : > { %p3658_p0 = pnand %p3669_p9, %p4405_p6  ;;  %s193_s28 = sadd.s32 %s3635_s21, %s3622_s8 }
  0x38   : > { %s3624_s4 = sshll.u32 %s193_s28, 3  ;;  %s208_s3 = sand.u32 1, %s4230_s25  }
  0x39   : > { %s195_s12 = scalar_lea.hbm %s6286_s0, %s3624_s4  ;;  %s184_s30 = scalar_lea.sflag [#allocation4], %s183_s15 }
  0x3a   : > { %s196_s2 = sshll.u32 %s195_s12, 4  ;;  %s4233_s22 = smov 1024   ;;  %s197_s2 = int_to_ptr.hbm [resolvable:$true] %s196_s2 }
  0x3b   : > { %s4234_s24 = smov 512   ;;  %s4235_s18 = smov 32  }
  0x3c   : > { %3660 = dma.hbm_to_vmem [thread:$0]  (!%p3658_p0), %s197_s2, 12288, %s199_s5, %s184_s30, %s4233_s22, %s4234_s24, %s4235_s18  }
  0x3d   : > { %s210_s13 = sand.u32 1, %s4198_s17   ;;  %s3638_s10 = smul.u32 2560, %s4222_s23 }
  0x3e   : > { %s3637_s20 = smul.u32 2560, %s210_s13  ;;  %s209_s4 = scalar_lea.sflag [#allocation7], %s208_s3 }
  0x3f   : > { %s220_s21 = scalar_lea.hbm %s6287_s1, %s3638_s10  ;;  %s4236_s7 = smov 640  }
  0x40   : > { %s212_s8 = scalar_lea.vmem [#allocation6], %s3637_s20  ;;  %s221_s9 = sshll.u32 %s220_s21, 4  ;;  %s222_s9 = int_to_ptr.hbm [resolvable:$true] %s221_s9 }
  0x41   : > { %s223_s28 = sshll.u32 %s212_s8, 4  ;;  %s4237_s15 = smov 40   ;;  %s224_s28 = int_to_ptr.vmem [resolvable:$true] %s223_s28 }
  0x42   : > { %3663 = dma.hbm_to_vmem [thread:$0]  (!%p4388_p11), %s222_s9, 40960, %s224_s28, %s209_s4, %s4236_s7, %s4236_s7, %s4237_s15  }
  0x43   : > { %235 = sbr.rel (%p4375_p4) target bundleno = 1494 (0x5d6), region = 32 }
  0x48   : > { %s237_s2 = sand.u32 1, %s4206_s19  }
  0x49   : > { %s3639_s22 = smul.u32 768, %s237_s2  ;;  %s238_s24 = scalar_lea.sflag [#allocation4], %s237_s2 }
  0x4b   : > { %s4446_s14 = scalar_lea.vmem [#allocation3], %s3639_s22 }
  0x4c   : > { %4161 = dma.done.wait (%p4340_p5), %s238_s24, 12288  }
  0x4d   : > { %4163 = vsyncadd (%p4340_p5), %s238_s24, 4294955008  ;;  %s247_s5 = sand.u32 1, %s4328_s26   ;;  %s249_s6 = sand.u32 1, %s4194_s16  }
  0x4e   : > { %s3640_s27 = smul.u32 2560, %s249_s6  ;;  %s248_s11 = scalar_lea.sflag [#allocation7], %s247_s5 }
  0x50   : > { %s4454_s12 = scalar_lea.vmem [#allocation6], %s3640_s27 }
  0x51   : > { %4165 = dma.done.wait (%p4353_p7), %s248_s11, 40960  }
  0x52   : > { %4167 = vsyncadd (%p4353_p7), %s248_s11, 4294926336  ;;  %p6427_p2 = scmp.eq.s32.totalorder %s4328_s26, 0 }
  0x54   : > { %4169 = dma.done.wait (%p6427_p2), [#allocation7], 80   ;;  %p6428_p4 = pmov %p6427_p2 }
  0x55   : > { %s6429_s29 = sld [smem:[#allocation15_spill]] }
  0x56   : > { %4171 = vsyncadd (%p6428_p4), [#allocation7], 4294967216  ;;  %s6430_s13 = sld [smem:[#allocation18_spill]] }
  0x5b   : > { %s282_s3 = sand.u32 1, %s6429_s29  }
  0x5c   : > { %s3641_s30 = smul.u32 960, %s282_s3  ;;  %p3630_p5 = scmp.ne.s32.totalorder %s6430_s13, 0 }
  0x5e   : > { %s4467_s18 = scalar_lea.vmem [#allocation9], %s3641_s30  ;;  %295 = sbr.rel (%p3630_p5) target bundleno = 220 (0xdc), region = 48 }
  0x63   : > { %v4238_v0 = vmov 0.0  }
  0x64   : > { %296 = vst [vmem:[#allocation2 + $0x2b0] sm:$0xff] %v4238_v0 }
  0x65   : > { %297 = vst [vmem:[#allocation2 + $0x3b0] sm:$0xff] %v4238_v0 }
  0x66   : > { %298 = vst [vmem:[#allocation2 + $0xd8] sm:$0xff] %v4238_v0 }
  0x67   : > { %299 = vst [vmem:[#allocation2 + $0x18] sm:$0xff] %v4238_v0 }
  0x68   : > { %300 = vst [vmem:[#allocation2 + $0x50] sm:$0xff] %v4238_v0 }
  0x69   : > { %301 = vst [vmem:[#allocation2 + $0x368] sm:$0xff] %v4238_v0 }
  0x6a   : > { %302 = vst [vmem:[#allocation2 + $0x330] sm:$0xff] %v4238_v0 }
  0x6b   : > { %303 = vst [vmem:[#allocation2 + $0x48] sm:$0xff] %v4238_v0 }
  0x6c   : > { %304 = vst [vmem:[#allocation2 + $0x380] sm:$0xff] %v4238_v0 }
  0x6d   : > { %305 = vst [vmem:[#allocation2 + $0x110] sm:$0xff] %v4238_v0 }
  0x6e   : > { %306 = vst [vmem:[#allocation2 + $0x118] sm:$0xff] %v4238_v0 }
  0x6f   : > { %307 = vst [vmem:[#allocation2 + $0x98] sm:$0xff] %v4238_v0 }
  0x70   : > { %308 = vst [vmem:[#allocation2 + $0x320] sm:$0xff] %v4238_v0 }
  0x71   : > { %309 = vst [vmem:[#allocation2 + $0x150] sm:$0xff] %v4238_v0 }
  0x72   : > { %310 = vst [vmem:[#allocation2 + $0x108] sm:$0xff] %v4238_v0 }
  0x73   : > { %311 = vst [vmem:[#allocation2 + $0x60] sm:$0xff] %v4238_v0 }
  0x74   : > { %312 = vst [vmem:[#allocation2 + $0x2e0] sm:$0xff] %v4238_v0 }
  0x75   : > { %313 = vst [vmem:[#allocation2 + $0x388] sm:$0xff] %v4238_v0 }
  0x76   : > { %314 = vst [vmem:[#allocation2 + $0x338] sm:$0xff] %v4238_v0 }
  0x77   : > { %315 = vst [vmem:[#allocation2 + $0x340] sm:$0xff] %v4238_v0 }
  0x78   : > { %316 = vst [vmem:[#allocation2 + $0x80] sm:$0xff] %v4238_v0 }
  0x79   : > { %317 = vst [vmem:[#allocation2 + $0x1a8] sm:$0xff] %v4238_v0 }
  0x7a   : > { %318 = vst [vmem:[#allocation2 + $0x1b8] sm:$0xff] %v4238_v0 }
  0x7b   : > { %319 = vst [vmem:[#allocation2 + $0x168] sm:$0xff] %v4238_v0 }
  0x7c   : > { %320 = vst [vmem:[#allocation2 + $0x2f0] sm:$0xff] %v4238_v0 }
  0x7d   : > { %321 = vst [vmem:[#allocation2 + $0x288] sm:$0xff] %v4238_v0 }
  0x7e   : > { %322 = vst [vmem:[#allocation2 + $0x360] sm:$0xff] %v4238_v0 }
  0x7f   : > { %323 = vst [vmem:[#allocation2 + $0x130] sm:$0xff] %v4238_v0 }
  0x80   : > { %324 = vst [vmem:[#allocation2 + $0x1b0] sm:$0xff] %v4238_v0 }
  0x81   : > { %325 = vst [vmem:[#allocation2 + $0x270] sm:$0xff] %v4238_v0 }
  0x82   : > { %326 = vst [vmem:[#allocation2 + $0xf0] sm:$0xff] %v4238_v0 }
  0x83   : > { %327 = vst [vmem:[#allocation2 + $0x8] sm:$0xff] %v4238_v0 }
  0x84   : > { %328 = vst [vmem:[#allocation2 + $0x148] sm:$0xff] %v4238_v0 }
  0x85   : > { %329 = vst [vmem:[#allocation2 + $0x200] sm:$0xff] %v4238_v0 }
  0x86   : > { %330 = vst [vmem:[#allocation2 + $0x390] sm:$0xff] %v4238_v0 }
  0x87   : > { %331 = vst [vmem:[#allocation2 + $0x278] sm:$0xff] %v4238_v0 }
  0x88   : > { %332 = vst [vmem:[#allocation2] sm:$0xff] %v4238_v0 }
  0x89   : > { %333 = vst [vmem:[#allocation2 + $0x290] sm:$0xff] %v4238_v0 }
  0x8a   : > { %334 = vst [vmem:[#allocation2 + $0x188] sm:$0xff] %v4238_v0 }
  0x8b   : > { %335 = vst [vmem:[#allocation2 + $0xe0] sm:$0xff] %v4238_v0 }
  0x8c   : > { %336 = vst [vmem:[#allocation2 + $0x1c0] sm:$0xff] %v4238_v0 }
  0x8d   : > { %337 = vst [vmem:[#allocation2 + $0x90] sm:$0xff] %v4238_v0 }
  0x8e   : > { %338 = vst [vmem:[#allocation2 + $0x70] sm:$0xff] %v4238_v0 }
  0x8f   : > { %339 = vst [vmem:[#allocation2 + $0x210] sm:$0xff] %v4238_v0 }
  0x90   : > { %340 = vst [vmem:[#allocation2 + $0x308] sm:$0xff] %v4238_v0 }
  0x91   : > { %341 = vst [vmem:[#allocation2 + $0x370] sm:$0xff] %v4238_v0 }
  0x92   : > { %342 = vst [vmem:[#allocation2 + $0x1d8] sm:$0xff] %v4238_v0 }
  0x93   : > { %343 = vst [vmem:[#allocation2 + $0x260] sm:$0xff] %v4238_v0 }
  0x94   : > { %344 = vst [vmem:[#allocation2 + $0x358] sm:$0xff] %v4238_v0 }
  0x95   : > { %345 = vst [vmem:[#allocation2 + $0x2c0] sm:$0xff] %v4238_v0 }
  0x96   : > { %346 = vst [vmem:[#allocation2 + $0x328] sm:$0xff] %v4238_v0 }
  0x97   : > { %347 = vst [vmem:[#allocation2 + $0x238] sm:$0xff] %v4238_v0 }
  0x98   : > { %348 = vst [vmem:[#allocation2 + $0x78] sm:$0xff] %v4238_v0 }
  0x99   : > { %349 = vst [vmem:[#allocation2 + $0x158] sm:$0xff] %v4238_v0 }
  0x9a   : > { %350 = vst [vmem:[#allocation2 + $0xa8] sm:$0xff] %v4238_v0 }
  0x9b   : > { %351 = vst [vmem:[#allocation2 + $0x300] sm:$0xff] %v4238_v0 }
  0x9c   : > { %352 = vst [vmem:[#allocation2 + $0xe8] sm:$0xff] %v4238_v0 }
  0x9d   : > { %353 = vst [vmem:[#allocation2 + $0x20] sm:$0xff] %v4238_v0 }
  0x9e   : > { %354 = vst [vmem:[#allocation2 + $0x40] sm:$0xff] %v4238_v0 }
  0x9f   : > { %355 = vst [vmem:[#allocation2 + $0x1d0] sm:$0xff] %v4238_v0 }
  0xa0   : > { %356 = vst [vmem:[#allocation2 + $0x2e8] sm:$0xff] %v4238_v0 }
  0xa1   : > { %357 = vst [vmem:[#allocation2 + $0x1f0] sm:$0xff] %v4238_v0 }
  0xa2   : > { %358 = vst [vmem:[#allocation2 + $0x38] sm:$0xff] %v4238_v0 }
  0xa3   : > { %359 = vst [vmem:[#allocation2 + $0x2d0] sm:$0xff] %v4238_v0 }
  0xa4   : > { %360 = vst [vmem:[#allocation2 + $0x30] sm:$0xff] %v4238_v0 }
  0xa5   : > { %361 = vst [vmem:[#allocation2 + $0xc0] sm:$0xff] %v4238_v0 }
  0xa6   : > { %362 = vst [vmem:[#allocation2 + $0x228] sm:$0xff] %v4238_v0 }
  0xa7   : > { %363 = vst [vmem:[#allocation2 + $0x170] sm:$0xff] %v4238_v0 }
  0xa8   : > { %364 = vst [vmem:[#allocation2 + $0x280] sm:$0xff] %v4238_v0 }
  0xa9   : > { %365 = vst [vmem:[#allocation2 + $0x138] sm:$0xff] %v4238_v0 }
  0xaa   : > { %366 = vst [vmem:[#allocation2 + $0x348] sm:$0xff] %v4238_v0 }
  0xab   : > { %367 = vst [vmem:[#allocation2 + $0x3a8] sm:$0xff] %v4238_v0 }
  0xac   : > { %368 = vst [vmem:[#allocation2 + $0xf8] sm:$0xff] %v4238_v0 }
  0xad   : > { %369 = vst [vmem:[#allocation2 + $0x250] sm:$0xff] %v4238_v0 }
  0xae   : > { %370 = vst [vmem:[#allocation2 + $0xb8] sm:$0xff] %v4238_v0 }
  0xaf   : > { %371 = vst [vmem:[#allocation2 + $0x1e8] sm:$0xff] %v4238_v0 }
  0xb0   : > { %372 = vst [vmem:[#allocation2 + $0x2b8] sm:$0xff] %v4238_v0 }
  0xb1   : > { %373 = vst [vmem:[#allocation2 + $0x128] sm:$0xff] %v4238_v0 }
  0xb2   : > { %374 = vst [vmem:[#allocation2 + $0xa0] sm:$0xff] %v4238_v0 }
  0xb3   : > { %375 = vst [vmem:[#allocation2 + $0x3a0] sm:$0xff] %v4238_v0 }
  0xb4   : > { %376 = vst [vmem:[#allocation2 + $0x2f8] sm:$0xff] %v4238_v0 }
  0xb5   : > { %377 = vst [vmem:[#allocation2 + $0x350] sm:$0xff] %v4238_v0 }
  0xb6   : > { %378 = vst [vmem:[#allocation2 + $0x230] sm:$0xff] %v4238_v0 }
  0xb7   : > { %379 = vst [vmem:[#allocation2 + $0x298] sm:$0xff] %v4238_v0 }
  0xb8   : > { %380 = vst [vmem:[#allocation2 + $0x318] sm:$0xff] %v4238_v0 }
  0xb9   : > { %381 = vst [vmem:[#allocation2 + $0x160] sm:$0xff] %v4238_v0 }
  0xba   : > { %382 = vst [vmem:[#allocation2 + $0x88] sm:$0xff] %v4238_v0 }
  0xbb   : > { %383 = vst [vmem:[#allocation2 + $0x28] sm:$0xff] %v4238_v0 }
  0xbc   : > { %384 = vst [vmem:[#allocation2 + $0x120] sm:$0xff] %v4238_v0 }
  0xbd   : > { %385 = vst [vmem:[#allocation2 + $0x140] sm:$0xff] %v4238_v0 }
  0xbe   : > { %386 = vst [vmem:[#allocation2 + $0x68] sm:$0xff] %v4238_v0 }
  0xbf   : > { %387 = vst [vmem:[#allocation2 + $0xd0] sm:$0xff] %v4238_v0 }
  0xc0   : > { %388 = vst [vmem:[#allocation2 + $0x180] sm:$0xff] %v4238_v0 }
  0xc1   : > { %389 = vst [vmem:[#allocation2 + $0x378] sm:$0xff] %v4238_v0 }
  0xc2   : > { %390 = vst [vmem:[#allocation2 + $0x258] sm:$0xff] %v4238_v0 }
  0xc3   : > { %391 = vst [vmem:[#allocation2 + $0x220] sm:$0xff] %v4238_v0 }
  0xc4   : > { %392 = vst [vmem:[#allocation2 + $0x2a0] sm:$0xff] %v4238_v0 }
  0xc5   : > { %393 = vst [vmem:[#allocation2 + $0x1a0] sm:$0xff] %v4238_v0 }
  0xc6   : > { %394 = vst [vmem:[#allocation2 + $0x58] sm:$0xff] %v4238_v0 }
  0xc7   : > { %395 = vst [vmem:[#allocation2 + $0x208] sm:$0xff] %v4238_v0 }
  0xc8   : > { %396 = vst [vmem:[#allocation2 + $0x1e0] sm:$0xff] %v4238_v0 }
  0xc9   : > { %397 = vst [vmem:[#allocation2 + $0x100] sm:$0xff] %v4238_v0 }
  0xca   : > { %398 = vst [vmem:[#allocation2 + $0x10] sm:$0xff] %v4238_v0 }
  0xcb   : > { %399 = vst [vmem:[#allocation2 + $0x268] sm:$0xff] %v4238_v0 }
  0xcc   : > { %400 = vst [vmem:[#allocation2 + $0x248] sm:$0xff] %v4238_v0 }
  0xcd   : > { %401 = vst [vmem:[#allocation2 + $0x190] sm:$0xff] %v4238_v0 }
  0xce   : > { %402 = vst [vmem:[#allocation2 + $0x1f8] sm:$0xff] %v4238_v0 }
  0xcf   : > { %403 = vst [vmem:[#allocation2 + $0x218] sm:$0xff] %v4238_v0 }
  0xd0   : > { %404 = vst [vmem:[#allocation2 + $0x198] sm:$0xff] %v4238_v0 }
  0xd1   : > { %405 = vst [vmem:[#allocation2 + $0x2a8] sm:$0xff] %v4238_v0 }
  0xd2   : > { %406 = vst [vmem:[#allocation2 + $0xc8] sm:$0xff] %v4238_v0 }
  0xd3   : > { %407 = vst [vmem:[#allocation2 + $0x3b8] sm:$0xff] %v4238_v0 }
  0xd4   : > { %408 = vst [vmem:[#allocation2 + $0x240] sm:$0xff] %v4238_v0 }
  0xd5   : > { %409 = vst [vmem:[#allocation2 + $0x178] sm:$0xff] %v4238_v0 }
  0xd6   : > { %410 = vst [vmem:[#allocation2 + $0xb0] sm:$0xff] %v4238_v0 }
  0xd7   : > { %411 = vst [vmem:[#allocation2 + $0x398] sm:$0xff] %v4238_v0 }
  0xd8   : > { %412 = vst [vmem:[#allocation2 + $0x2d8] sm:$0xff] %v4238_v0 }
  0xd9   : > { %413 = vst [vmem:[#allocation2 + $0x1c8] sm:$0xff] %v4238_v0 }
  0xda   : > { %414 = vst [vmem:[#allocation2 + $0x2c8] sm:$0xff] %v4238_v0 }
  0xdb   : > { %415 = vst [vmem:[#allocation2 + $0x310] sm:$0xff] %v4238_v0 }
  0xdc PF: > { %v747_v1 = vld [vmem:[%s4454_s12 + $0x758] sm:$0xff]  ;;  %v742_v2 = vld [vmem:[%s4454_s12 + $0x730] sm:$0xff]  ;;  %v737_v6 = vld [vmem:[%s4454_s12 + $0x708] sm:$0xff]  ;;  %s6619_s26 = sld [smem:[#allocation18_spill]] }
  0xdd   : > { %v827_v3 = vld [vmem:[%s4454_s12 + $0x9d8] sm:$0xff]  ;;  %1130 = vmatpush.msra.mxu2 %v747_v1  ;;  %v822_v7 = vld [vmem:[%s4454_s12 + $0x9b0] sm:$0xff]  ;;  %v817_v10 = vld [vmem:[%s4454_s12 + $0x988] sm:$0xff] }
  0xde   : > { %1219 = vmatpush.msra.mxu3 %v827_v3  ;;  %v587_v4 = vld [vmem:[%s4454_s12 + $0x258] sm:$0xff]  ;;  %v582_v8 = vld [vmem:[%s4454_s12 + $0x230] sm:$0xff]  ;;  %v577_v11 = vld [vmem:[%s4454_s12 + $0x208] sm:$0xff] }
  0xdf   : > { %v667_v5 = vld [vmem:[%s4454_s12 + $0x4d8] sm:$0xff]  ;;  %952 = vmatpush.msra.mxu0 %v587_v4  ;;  %v662_v9 = vld [vmem:[%s4454_s12 + $0x4b0] sm:$0xff]  ;;  %1131 = vmatpush.msra.mxu2 %v742_v2  ;;  %v732_v12 = vld [vmem:[%s4454_s12 + $0x6e0] sm:$0xff] }
  0xe0   : > { %1041 = vmatpush.msra.mxu1 %v667_v5  ;;  %1220 = vmatpush.msra.mxu3 %v822_v7  ;;  %v657_v13 = vld [vmem:[%s4454_s12 + $0x488] sm:$0xff]  ;;  %v812_v14 = vld [vmem:[%s4454_s12 + $0x960] sm:$0xff]  ;;  %v727_v17 = vld [vmem:[%s4454_s12 + $0x6b8] sm:$0xff] }
  0xe1   : > { %953 = vmatpush.msra.mxu0 %v582_v8  ;;  %1132 = vmatpush.msra.mxu2 %v737_v6  ;;  %v572_v15 = vld [vmem:[%s4454_s12 + $0x1e0] sm:$0xff]  ;;  %v807_v18 = vld [vmem:[%s4454_s12 + $0x938] sm:$0xff]  ;;  %v722_v21 = vld [vmem:[%s4454_s12 + $0x690] sm:$0xff] }
  0xe2   : > { %1042 = vmatpush.msra.mxu1 %v662_v9  ;;  %1221 = vmatpush.msra.mxu3 %v817_v10  ;;  %v652_v16 = vld [vmem:[%s4454_s12 + $0x460] sm:$0xff]  ;;  %v567_v19 = vld [vmem:[%s4454_s12 + $0x1b8] sm:$0xff]  ;;  %v802_v22 = vld [vmem:[%s4454_s12 + $0x910] sm:$0xff]  ;;  %p3631_p7 = scmp.ne.s32.totalorder %s6619_s26, 1 }
  0xe3   : > { %954 = vmatpush.msra.mxu0 %v577_v11  ;;  %1133 = vmatpush.msra.mxu2 %v732_v12  ;;  %v647_v20 = vld [vmem:[%s4454_s12 + $0x438] sm:$0xff]  ;;  %v562_v23 = vld [vmem:[%s4454_s12 + $0x190] sm:$0xff]  ;;  %v717_v25 = vld [vmem:[%s4454_s12 + $0x668] sm:$0xff] }
  0xe4   : > { %1043 = vmatpush.msra.mxu1 %v657_v13  ;;  %1222 = vmatpush.msra.mxu3 %v812_v14  ;;  %v642_v24 = vld [vmem:[%s4454_s12 + $0x410] sm:$0xff]  ;;  %v797_v26 = vld [vmem:[%s4454_s12 + $0x8e8] sm:$0xff]  ;;  %v712_v29 = vld [vmem:[%s4454_s12 + $0x640] sm:$0xff] }
  0xe5   : > { %955 = vmatpush.msra.mxu0 %v572_v15  ;;  %1134 = vmatpush.msra.mxu2 %v727_v17  ;;  %v557_v27 = vld [vmem:[%s4454_s12 + $0x168] sm:$0xff]  ;;  %v792_v30 = vld [vmem:[%s4454_s12 + $0x8c0] sm:$0xff]  ;;  %v707_v33 = vld [vmem:[%s4454_s12 + $0x618] sm:$0xff] }
  0xe6   : > { %1044 = vmatpush.msra.mxu1 %v652_v16  ;;  %1223 = vmatpush.msra.mxu3 %v807_v18  ;;  %v637_v28 = vld [vmem:[%s4454_s12 + $0x3e8] sm:$0xff]  ;;  %v552_v31 = vld [vmem:[%s4454_s12 + $0x140] sm:$0xff]  ;;  %v787_v34 = vld [vmem:[%s4454_s12 + $0x898] sm:$0xff] }
  0xe7   : > { %956 = vmatpush.msra.mxu0 %v567_v19  ;;  %1135 = vmatpush.msra.mxu2 %v722_v21  ;;  %v632_v32 = vld [vmem:[%s4454_s12 + $0x3c0] sm:$0xff]  ;;  %v547_v35 = vld [vmem:[%s4454_s12 + $0x118] sm:$0xff]  ;;  %v702_v37 = vld [vmem:[%s4454_s12 + $0x5f0] sm:$0xff] }
  0xe8   : > { %1045 = vmatpush.msra.mxu1 %v647_v20  ;;  %1224 = vmatpush.msra.mxu3 %v802_v22  ;;  %v627_v36 = vld [vmem:[%s4454_s12 + $0x398] sm:$0xff]  ;;  %v782_v38 = vld [vmem:[%s4454_s12 + $0x870] sm:$0xff]  ;;  %v697_v41 = vld [vmem:[%s4454_s12 + $0x5c8] sm:$0xff] }
  0xe9   : > { %957 = vmatpush.msra.mxu0 %v562_v23  ;;  %1136 = vmatpush.msra.mxu2 %v717_v25  ;;  %v542_v39 = vld [vmem:[%s4454_s12 + $0xf0] sm:$0xff]  ;;  %v777_v42 = vld [vmem:[%s4454_s12 + $0x848] sm:$0xff]  ;;  %v692_v45 = vld [vmem:[%s4454_s12 + $0x5a0] sm:$0xff] }
  0xea   : > { %1046 = vmatpush.msra.mxu1 %v642_v24  ;;  %1225 = vmatpush.msra.mxu3 %v797_v26  ;;  %v622_v40 = vld [vmem:[%s4454_s12 + $0x370] sm:$0xff]  ;;  %v537_v43 = vld [vmem:[%s4454_s12 + $0xc8] sm:$0xff]  ;;  %v772_v46 = vld [vmem:[%s4454_s12 + $0x820] sm:$0xff] }
  0xeb   : > { %958 = vmatpush.msra.mxu0 %v557_v27  ;;  %1137 = vmatpush.msra.mxu2 %v712_v29  ;;  %v617_v44 = vld [vmem:[%s4454_s12 + $0x348] sm:$0xff]  ;;  %v532_v47 = vld [vmem:[%s4454_s12 + $0xa0] sm:$0xff]  ;;  %v687_v49 = vld [vmem:[%s4454_s12 + $0x578] sm:$0xff] }
  0xec   : > { %1047 = vmatpush.msra.mxu1 %v637_v28  ;;  %1226 = vmatpush.msra.mxu3 %v792_v30  ;;  %v612_v48 = vld [vmem:[%s4454_s12 + $0x320] sm:$0xff]  ;;  %v767_v50 = vld [vmem:[%s4454_s12 + $0x7f8] sm:$0xff]  ;;  %v682_v53 = vld [vmem:[%s4454_s12 + $0x550] sm:$0xff] }
  0xed   : > { %959 = vmatpush.msra.mxu0 %v552_v31  ;;  %1138 = vmatpush.msra.mxu2 %v707_v33  ;;  %v527_v51 = vld [vmem:[%s4454_s12 + $0x78] sm:$0xff]  ;;  %v762_v54 = vld [vmem:[%s4454_s12 + $0x7d0] sm:$0xff]  ;;  %v677_v57 = vld [vmem:[%s4454_s12 + $0x528] sm:$0xff] }
  0xee   : > { %1048 = vmatpush.msra.mxu1 %v632_v32  ;;  %1227 = vmatpush.msra.mxu3 %v787_v34  ;;  %v607_v52 = vld [vmem:[%s4454_s12 + $0x2f8] sm:$0xff]  ;;  %v522_v55 = vld [vmem:[%s4454_s12 + $0x50] sm:$0xff]  ;;  %v757_v58 = vld [vmem:[%s4454_s12 + $0x7a8] sm:$0xff] }
  0xef   : > { %960 = vmatpush.msra.mxu0 %v547_v35  ;;  %1139 = vmatpush.msra.mxu2 %v702_v37  ;;  %v602_v56 = vld [vmem:[%s4454_s12 + $0x2d0] sm:$0xff]  ;;  %v517_v59 = vld [vmem:[%s4454_s12 + $0x28] sm:$0xff]  ;;  %v672_v61 = vld [vmem:[%s4454_s12 + $0x500] sm:$0xff] }
  0xf0   : > { %1049 = vmatpush.msra.mxu1 %v627_v36  ;;  %1228 = vmatpush.msra.mxu3 %v782_v38  ;;  %v597_v60 = vld [vmem:[%s4454_s12 + $0x2a8] sm:$0xff]  ;;  %v752_v62 = vld [vmem:[%s4454_s12 + $0x780] sm:$0xff]  ;;  %v4653_v63 = vld [vmem:[%s4446_s14 + $0x10] sm:$0xff] }
  0xf1   : > { %961 = vmatpush.msra.mxu0 %v542_v39  ;;  %1140 = vmatpush.msra.mxu2 %v697_v41  ;;  %v4656_v0 = vld [vmem:[%s4446_s14 + $0x18] sm:$0xff]  ;;  %v748_v1 = vld [vmem:[%s4454_s12 + $0x760] sm:$0xff]  ;;  %v4668_v6 = vld [vmem:[%s4446_s14 + $0x8] sm:$0xff] }
  0xf2   : > { %1050 = vmatpush.msra.mxu1 %v622_v40  ;;  %1229 = vmatpush.msra.mxu3 %v777_v42  ;;  %v828_v2 = vld [vmem:[%s4454_s12 + $0x9e0] sm:$0xff]  ;;  %v743_v9 = vld [vmem:[%s4454_s12 + $0x738] sm:$0xff]  ;;  %v738_v13 = vld [vmem:[%s4454_s12 + $0x710] sm:$0xff] }
  0xf3   : > { %962 = vmatpush.msra.mxu0 %v537_v43  ;;  %1141 = vmatpush.msra.mxu2 %v692_v45  ;;  %v512_v3 = vld [vmem:[%s4454_s12] sm:$0xff]  ;;  %v823_v10 = vld [vmem:[%s4454_s12 + $0x9b8] sm:$0xff]  ;;  %v818_v14 = vld [vmem:[%s4454_s12 + $0x990] sm:$0xff] }
  0xf4   : > { %1051 = vmatpush.msra.mxu1 %v617_v44  ;;  %1230 = vmatpush.msra.mxu3 %v772_v46  ;;  %v592_v4 = vld [vmem:[%s4454_s12 + $0x280] sm:$0xff]  ;;  %v583_v11 = vld [vmem:[%s4454_s12 + $0x238] sm:$0xff]  ;;  %v4681_v15 = vld [vmem:[%s4446_s14 + $0x30] sm:$0xff] }
  0xf5   : > { %963 = vmatpush.msra.mxu0 %v532_v47  ;;  %1142 = vmatpush.msra.mxu2 %v687_v49  ;;  %v4665_v5 = vld [vmem:[%s4446_s14] sm:$0xff]  ;;  %v663_v12 = vld [vmem:[%s4454_s12 + $0x4b8] sm:$0xff]  ;;  %v578_v17 = vld [vmem:[%s4454_s12 + $0x210] sm:$0xff] }
  0xf6   : > { %1052 = vmatpush.msra.mxu1 %v612_v48  ;;  %1231 = vmatpush.msra.mxu3 %v767_v50  ;;  %v588_v7 = vld [vmem:[%s4454_s12 + $0x260] sm:$0xff]  ;;  %v4684_v16 = vld [vmem:[%s4446_s14 + $0x38] sm:$0xff]  ;;  %v658_v18 = vld [vmem:[%s4454_s12 + $0x490] sm:$0xff] }
  0xf7   : > { %964 = vmatpush.msra.mxu0 %v527_v51  ;;  %1143 = vmatpush.msra.mxu2 %v682_v53  ;;  %v668_v8 = vld [vmem:[%s4454_s12 + $0x4e0] sm:$0xff]  ;;  %v733_v19 = vld [vmem:[%s4454_s12 + $0x6e8] sm:$0xff]  ;;  %v4703_v25 = vld [vmem:[%s4446_s14 + $0x50] sm:$0xff] }
  0xf8   : > { %1053 = vmatpush.msra.mxu1 %v607_v52  ;;  %1232 = vmatpush.msra.mxu3 %v762_v54  ;;  %v813_v20 = vld [vmem:[%s4454_s12 + $0x968] sm:$0xff]  ;;  %v4693_v21 = vld [vmem:[%s4446_s14 + $0x20] sm:$0xff]  ;;  %v4706_v26 = vld [vmem:[%s4446_s14 + $0x58] sm:$0xff] }
  0xf9   : > { %965 = vmatpush.msra.mxu0 %v522_v55  ;;  %1144 = vmatpush.msra.mxu2 %v677_v57  ;;  %v4696_v22 = vld [vmem:[%s4446_s14 + $0x28] sm:$0xff]  ;;  %v4709_v27 = vld [vmem:[%s4446_s14 + $0x40] sm:$0xff]  ;;  %v4723_v33 = vld [vmem:[%s4446_s14 + $0x70] sm:$0xff] }
  0xfa   : > { %1054 = vmatpush.msra.mxu1 %v602_v56  ;;  %1233 = vmatpush.msra.mxu3 %v757_v58  ;;  %v573_v23 = vld [vmem:[%s4454_s12 + $0x1e8] sm:$0xff]  ;;  %v728_v29 = vld [vmem:[%s4454_s12 + $0x6c0] sm:$0xff]  ;;  %v4726_v34 = vld [vmem:[%s4446_s14 + $0x78] sm:$0xff] }
  0xfb   : > { %966 = vmatpush.msra.mxu0 %v517_v59  ;;  %1145 = vmatpush.msra.mxu2 %v672_v61  ;;  %v653_v24 = vld [vmem:[%s4454_s12 + $0x468] sm:$0xff]  ;;  %v808_v30 = vld [vmem:[%s4454_s12 + $0x940] sm:$0xff]  ;;  %v723_v37 = vld [vmem:[%s4454_s12 + $0x698] sm:$0xff] }
  0xfc   : > { %1055 = vmatpush.msra.mxu1 %v597_v60  ;;  %1234 = vmatpush.msra.mxu3 %v752_v62  ;;  %v4714_v28 = vld [vmem:[%s4446_s14 + $0x48] sm:$0xff]  ;;  %v568_v31 = vld [vmem:[%s4454_s12 + $0x1c0] sm:$0xff]  ;;  %v803_v38 = vld [vmem:[%s4454_s12 + $0x918] sm:$0xff] }
  0xfd   : > { %1146 = vmatmul.f32.vlgmr.msra.gmra.mxu2 %v4653_v63  ;;  %1235 = vmatmul.f32.vlgmr.msra.gmra.mxu3 %v4656_v0  ;;  %v648_v32 = vld [vmem:[%s4454_s12 + $0x440] sm:$0xff]  ;;  %v4734_v36 = vld [vmem:[%s4446_s14 + $0x68] sm:$0xff]  ;;  %v4741_v39 = vld [vmem:[%s4446_s14 + $0x90] sm:$0xff] }
  0xfe   : > { %1486 = vmatpush.msrb.mxu2 %v748_v1  ;;  %1575 = vmatpush.msrb.mxu3 %v828_v2  ;;  %v4731_v35 = vld [vmem:[%s4446_s14 + $0x60] sm:$0xff]  ;;  %v4744_v40 = vld [vmem:[%s4446_s14 + $0x98] sm:$0xff]  ;;  %v4752_v42 = vld [vmem:[%s4446_s14 + $0x88] sm:$0xff] }
  0xff   : > { %967 = vmatpush.msra.mxu0 %v512_v3  ;;  %1056 = vmatpush.msra.mxu1 %v592_v4  ;;  %v4747_v41 = vld [vmem:[%s4446_s14 + $0x80] sm:$0xff]  ;;  %v563_v43 = vld [vmem:[%s4454_s12 + $0x198] sm:$0xff]  ;;  %v4759_v45 = vld [vmem:[%s4446_s14 + $0xb0] sm:$0xff] }
 0x100   : > { %968 = vmatmul.f32.vlgmr.msra.gmra.mxu0 %v4665_v5  ;;  %1057 = vmatmul.f32.vlgmr.msra.gmra.mxu1 %v4668_v6  ;;  %v643_v44 = vld [vmem:[%s4454_s12 + $0x418] sm:$0xff]  ;;  %v4765_v47 = vld [vmem:[%s4446_s14 + $0xa0] sm:$0xff]  ;;  %v4770_v48 = vld [vmem:[%s4446_s14 + $0xa8] sm:$0xff] }
 0x101   : > { %1308 = vmatpush.msrb.mxu0 %v588_v7  ;;  %1397 = vmatpush.msrb.mxu1 %v668_v8  ;;  %v4762_v46 = vld [vmem:[%s4446_s14 + $0xb8] sm:$0xff]  ;;  %v718_v49 = vld [vmem:[%s4454_s12 + $0x670] sm:$0xff]  ;;  %v4787_v55 = vld [vmem:[%s4446_s14 + $0xc0] sm:$0xff] }
 0x102   : > { %1487 = vmatpush.msrb.mxu2 %v743_v9  ;;  %1576 = vmatpush.msrb.mxu3 %v823_v10  ;;  %v798_v50 = vld [vmem:[%s4454_s12 + $0x8f0] sm:$0xff]  ;;  %v4782_v54 = vld [vmem:[%s4446_s14 + $0xd8] sm:$0xff]  ;;  %v4790_v56 = vld [vmem:[%s4446_s14 + $0xc8] sm:$0xff] }
 0x103   : > { %1309 = vmatpush.msrb.mxu0 %v583_v11  ;;  %1398 = vmatpush.msrb.mxu1 %v663_v12  ;;  %v558_v51 = vld [vmem:[%s4454_s12 + $0x170] sm:$0xff]  ;;  %v713_v57 = vld [vmem:[%s4454_s12 + $0x648] sm:$0xff]  ;;  %v4800_v60 = vld [vmem:[%s4446_s14 + $0xf8] sm:$0xff] }
 0x104   : > { %1488 = vmatpush.msrb.mxu2 %v738_v13  ;;  %1577 = vmatpush.msrb.mxu3 %v818_v14  ;;  %v638_v52 = vld [vmem:[%s4454_s12 + $0x3f0] sm:$0xff]  ;;  %v793_v58 = vld [vmem:[%s4454_s12 + $0x8c8] sm:$0xff]  ;;  %v4803_v61 = vld [vmem:[%s4446_s14 + $0xe0] sm:$0xff] }
 0x105   : > { %1149 = vmatmul.f32.gmra.mxu2 %v4681_v15  ;;  %1238 = vmatmul.f32.gmra.mxu3 %v4684_v16  ;;  %v4779_v53 = vld [vmem:[%s4446_s14 + $0xd0] sm:$0xff]  ;;  %v4808_v62 = vld [vmem:[%s4446_s14 + $0xe8] sm:$0xff]  ;;  %v4818_v4 = vld [vmem:[%s4446_s14 + $0x118] sm:$0xff] }
 0x106   : > { %1310 = vmatpush.msrb.mxu0 %v578_v17  ;;  %1399 = vmatpush.msrb.mxu1 %v658_v18  ;;  %v4797_v59 = vld [vmem:[%s4446_s14 + $0xf0] sm:$0xff]  ;;  %v553_v1 = vld [vmem:[%s4454_s12 + $0x148] sm:$0xff]  ;;  %v4821_v7 = vld [vmem:[%s4446_s14 + $0x100] sm:$0xff] }
 0x107   : > { %1489 = vmatpush.msrb.mxu2 %v733_v19  ;;  %1578 = vmatpush.msrb.mxu3 %v813_v20  ;;  %v633_v2 = vld [vmem:[%s4454_s12 + $0x3c8] sm:$0xff]  ;;  %v4815_v3 = vld [vmem:[%s4446_s14 + $0x110] sm:$0xff]  ;;  %v708_v9 = vld [vmem:[%s4454_s12 + $0x620] sm:$0xff] }
 0x108   : > { %971 = vmatmul.f32.gmra.mxu0 %v4693_v21  ;;  %1060 = vmatmul.f32.gmra.mxu1 %v4696_v22  ;;  %v4826_v8 = vld [vmem:[%s4446_s14 + $0x108] sm:$0xff]  ;;  %v788_v10 = vld [vmem:[%s4454_s12 + $0x8a0] sm:$0xff]  ;;  %v4835_v13 = vld [vmem:[%s4446_s14 + $0x130] sm:$0xff] }
 0x109   : > { %1311 = vmatpush.msrb.mxu0 %v573_v23  ;;  %1400 = vmatpush.msrb.mxu1 %v653_v24  ;;  %v548_v11 = vld [vmem:[%s4454_s12 + $0x120] sm:$0xff]  ;;  %v4838_v14 = vld [vmem:[%s4446_s14 + $0x138] sm:$0xff]  ;;  %v4846_v18 = vld [vmem:[%s4446_s14 + $0x128] sm:$0xff] }
 0x10a   : > { %1490 = vmatpush.msrb.mxu2 %v728_v29  ;;  %1579 = vmatpush.msrb.mxu3 %v808_v30  ;;  %v628_v12 = vld [vmem:[%s4454_s12 + $0x3a0] sm:$0xff]  ;;  %v703_v19 = vld [vmem:[%s4454_s12 + $0x5f8] sm:$0xff]  ;;  %v4853_v23 = vld [vmem:[%s4446_s14 + $0x150] sm:$0xff] }
 0x10b   : > { %1312 = vmatpush.msrb.mxu0 %v568_v31  ;;  %1401 = vmatpush.msrb.mxu1 %v648_v32  ;;  %v4843_v17 = vld [vmem:[%s4446_s14 + $0x120] sm:$0xff]  ;;  %v783_v20 = vld [vmem:[%s4454_s12 + $0x878] sm:$0xff]  ;;  %v4864_v30 = vld [vmem:[%s4446_s14 + $0x148] sm:$0xff] }
 0x10c   : > { %1491 = vmatpush.msrb.mxu2 %v723_v37  ;;  %1580 = vmatpush.msrb.mxu3 %v803_v38  ;;  %v4856_v24 = vld [vmem:[%s4446_s14 + $0x158] sm:$0xff]  ;;  %v4859_v29 = vld [vmem:[%s4446_s14 + $0x140] sm:$0xff]  ;;  %v4871_v37 = vld [vmem:[%s4446_s14 + $0x170] sm:$0xff] }
 0x10d   : > { %1152 = vmatmul.f32.gmra.mxu2 %v4703_v25  ;;  %1241 = vmatmul.f32.gmra.mxu3 %v4706_v26  ;;  %v543_v31 = vld [vmem:[%s4454_s12 + $0xf8] sm:$0xff] }
 0x10e   : > { %1313 = vmatpush.msrb.mxu0 %v563_v43  ;;  %1402 = vmatpush.msrb.mxu1 %v643_v44  ;;  %v623_v32 = vld [vmem:[%s4454_s12 + $0x378] sm:$0xff]  ;;  %v4877_v43 = vld [vmem:[%s4446_s14 + $0x160] sm:$0xff]  ;;  %v4882_v44 = vld [vmem:[%s4446_s14 + $0x168] sm:$0xff] }
 0x10f   : > { %1492 = vmatpush.msrb.mxu2 %v718_v49  ;;  %1581 = vmatpush.msrb.mxu3 %v798_v50  ;;  %v4874_v38 = vld [vmem:[%s4446_s14 + $0x178] sm:$0xff]  ;;  %v698_v49 = vld [vmem:[%s4454_s12 + $0x5d0] sm:$0xff] }
 0x110   : > { %974 = vmatmul.f32.gmra.mxu0 %v4709_v27  ;;  %1063 = vmatmul.f32.gmra.mxu1 %v4714_v28  ;;  %v778_v50 = vld [vmem:[%s4454_s12 + $0x850] sm:$0xff] }
 0x111   : > { %1314 = vmatpush.msrb.mxu0 %v558_v51  ;;  %1403 = vmatpush.msrb.mxu1 %v638_v52  ;;  %v538_v51 = vld [vmem:[%s4454_s12 + $0xd0] sm:$0xff] }
 0x112   : > { %1493 = vmatpush.msrb.mxu2 %v713_v57  ;;  %1582 = vmatpush.msrb.mxu3 %v793_v58  ;;  %v618_v52 = vld [vmem:[%s4454_s12 + $0x350] sm:$0xff]  ;;  %v4894_v58 = vld [vmem:[%s4446_s14 + $0x198] sm:$0xff] }
 0x113   : > { %1315 = vmatpush.msrb.mxu0 %v553_v1  ;;  %1404 = vmatpush.msrb.mxu1 %v633_v2  ;;  %v4891_v57 = vld [vmem:[%s4446_s14 + $0x190] sm:$0xff]  ;;  %6432 = vst [vmem:[#allocation30_spill] sm:$0xff] %v4894_v58  ;;  %v4899_v1 = vld [vmem:[%s4446_s14 + $0x180] sm:$0xff]  ;;  %v4902_v2 = vld [vmem:[%s4446_s14 + $0x188] sm:$0xff] }
 0x114   : > { %1494 = vmatpush.msrb.mxu2 %v708_v9  ;;  %1583 = vmatpush.msrb.mxu3 %v788_v10  ;;  %6431 = vst [vmem:[#allocation29_spill] sm:$0xff] %v4891_v57  ;;  %v693_v9 = vld [vmem:[%s4454_s12 + $0x5a8] sm:$0xff]  ;;  %v4908_v10 = vld [vmem:[%s4446_s14 + $0x1b0] sm:$0xff] }
 0x115   : > { %1155 = vmatmul.f32.gmra.mxu2 %v4723_v33  ;;  %1244 = vmatmul.f32.gmra.mxu3 %v4726_v34  ;;  %6433 = vst [vmem:[#allocation31_spill] sm:$0xff] %v4899_v1 }
 0x116   : > { %1316 = vmatpush.msrb.mxu0 %v548_v11  ;;  %1405 = vmatpush.msrb.mxu1 %v628_v12  ;;  %6434 = vst [vmem:[#allocation32_spill] sm:$0xff] %v4902_v2  ;;  %v4911_v11 = vld [vmem:[%s4446_s14 + $0x1b8] sm:$0xff]  ;;  %v4916_v12 = vld [vmem:[%s4446_s14 + $0x1a0] sm:$0xff] }
 0x117   : > { %1495 = vmatpush.msrb.mxu2 %v703_v19  ;;  %1584 = vmatpush.msrb.mxu3 %v783_v20  ;;  %6435 = vst [vmem:[#allocation33_spill] sm:$0xff] %v4908_v10  ;;  %v4919_v19 = vld [vmem:[%s4446_s14 + $0x1a8] sm:$0xff] }
 0x118   : > { %977 = vmatmul.f32.gmra.mxu0 %v4731_v35  ;;  %1066 = vmatmul.f32.gmra.mxu1 %v4734_v36  ;;  %6436 = vst [vmem:[#allocation34_spill] sm:$0xff] %v4911_v11  ;;  %v773_v20 = vld [vmem:[%s4454_s12 + $0x828] sm:$0xff] }
 0x119   : > { %1317 = vmatpush.msrb.mxu0 %v543_v31  ;;  %1406 = vmatpush.msrb.mxu1 %v623_v32  ;;  %6437 = vst [vmem:[#allocation35_spill] sm:$0xff] %v4916_v12  ;;  %v533_v31 = vld [vmem:[%s4454_s12 + $0xa8] sm:$0xff] }
 0x11a   : > { %1496 = vmatpush.msrb.mxu2 %v698_v49  ;;  %1585 = vmatpush.msrb.mxu3 %v778_v50  ;;  %6438 = vst [vmem:[#allocation36_spill] sm:$0xff] %v4919_v19  ;;  %v613_v32 = vld [vmem:[%s4454_s12 + $0x328] sm:$0xff]  ;;  %v4927_v49 = vld [vmem:[%s4446_s14 + $0x1d0] sm:$0xff]  ;;  %v4930_v50 = vld [vmem:[%s4446_s14 + $0x1d8] sm:$0xff] }
 0x11b   : > { %1318 = vmatpush.msrb.mxu0 %v538_v51  ;;  %1407 = vmatpush.msrb.mxu1 %v618_v52  ;;  %6439 = vst [vmem:[#allocation37_spill] sm:$0xff] %v4927_v49  ;;  %v4935_v51 = vld [vmem:[%s4446_s14 + $0x1c0] sm:$0xff]  ;;  %v4938_v52 = vld [vmem:[%s4446_s14 + $0x1c8] sm:$0xff] }
 0x11c   : > { %1497 = vmatpush.msrb.mxu2 %v693_v9  ;;  %1586 = vmatpush.msrb.mxu3 %v773_v20  ;;  %6440 = vst [vmem:[#allocation38_spill] sm:$0xff] %v4930_v50  ;;  %v688_v9 = vld [vmem:[%s4454_s12 + $0x580] sm:$0xff] }
 0x11d   : > { %1158 = vmatmul.f32.gmra.mxu2 %v4741_v39  ;;  %1247 = vmatmul.f32.gmra.mxu3 %v4744_v40  ;;  %6441 = vst [vmem:[#allocation39_spill] sm:$0xff] %v4935_v51  ;;  %v768_v20 = vld [vmem:[%s4454_s12 + $0x800] sm:$0xff] }
 0x11e   : > { %1319 = vmatpush.msrb.mxu0 %v533_v31  ;;  %1408 = vmatpush.msrb.mxu1 %v613_v32  ;;  %6442 = vst [vmem:[#allocation40_spill] sm:$0xff] %v4938_v52  ;;  %v528_v31 = vld [vmem:[%s4454_s12 + $0x80] sm:$0xff] }
 0x11f   : > { %1498 = vmatpush.msrb.mxu2 %v688_v9  ;;  %1587 = vmatpush.msrb.mxu3 %v768_v20  ;;  %v608_v32 = vld [vmem:[%s4454_s12 + $0x300] sm:$0xff]  ;;  %v4958_v9 = vld [vmem:[%s4446_s14 + $0x1e8] sm:$0xff]  ;;  %v683_v20 = vld [vmem:[%s4454_s12 + $0x558] sm:$0xff] }
 0x120   : > { %980 = vmatmul.f32.gmra.mxu0 %v4747_v41  ;;  %1069 = vmatmul.f32.gmra.mxu1 %v4752_v42  ;;  %6446 = vst [vmem:[#allocation44_spill] sm:$0xff] %v4958_v9 }
 0x121   : > { %1320 = vmatpush.msrb.mxu0 %v528_v31  ;;  %1409 = vmatpush.msrb.mxu1 %v608_v32  ;;  %v4964_v31 = vld [vmem:[%s4446_s14 + $0x210] sm:$0xff]  ;;  %v4967_v32 = vld [vmem:[%s4446_s14 + $0x218] sm:$0xff] }
 0x122   : > { %6447 = vst [vmem:[#allocation45_spill] sm:$0xff] %v4964_v31  ;;  %1499 = vmatpush.msrb.mxu2 %v683_v20 }
 0x123   : > { %6448 = vst [vmem:[#allocation46_spill] sm:$0xff] %v4967_v32 }
 0x125   : > { %1161 = vmatmul.f32.gmra.mxu2 %v4759_v45  ;;  %1250 = vmatmul.f32.gmra.mxu3 %v4762_v46 }
 0x128   : > { %983 = vmatmul.f32.gmra.mxu0 %v4765_v47  ;;  %1072 = vmatmul.f32.gmra.mxu1 %v4770_v48 }
 0x12d   : > { %1164 = vmatmul.f32.gmra.mxu2 %v4779_v53  ;;  %1253 = vmatmul.f32.gmra.mxu3 %v4782_v54 }
 0x130   : > { %986 = vmatmul.f32.gmra.mxu0 %v4787_v55  ;;  %1075 = vmatmul.f32.gmra.mxu1 %v4790_v56 }
 0x135   : > { %1167 = vmatmul.f32.gmra.mxu2 %v4797_v59  ;;  %1256 = vmatmul.f32.gmra.mxu3 %v4800_v60 }
 0x138   : > { %989 = vmatmul.f32.gmra.mxu0 %v4803_v61  ;;  %1078 = vmatmul.f32.gmra.mxu1 %v4808_v62 }
 0x13d   : > { %1170 = vmatmul.f32.gmra.mxu2 %v4815_v3  ;;  %1259 = vmatmul.f32.gmra.mxu3 %v4818_v4 }
 0x140   : > { %992 = vmatmul.f32.gmra.mxu0 %v4821_v7  ;;  %1081 = vmatmul.f32.gmra.mxu1 %v4826_v8 }
 0x145   : > { %1173 = vmatmul.f32.gmra.mxu2 %v4835_v13  ;;  %1262 = vmatmul.f32.gmra.mxu3 %v4838_v14 }
 0x148   : > { %995 = vmatmul.f32.gmra.mxu0 %v4843_v17  ;;  %1084 = vmatmul.f32.gmra.mxu1 %v4846_v18 }
 0x14d   : > { %1176 = vmatmul.f32.gmra.mxu2 %v4853_v23  ;;  %1265 = vmatmul.f32.gmra.mxu3 %v4856_v24 }
 0x150   : > { %998 = vmatmul.f32.gmra.mxu0 %v4859_v29  ;;  %1087 = vmatmul.f32.gmra.mxu1 %v4864_v30 }
 0x155   : > { %1179 = vmatmul.f32.gmra.mxu2 %v4871_v37  ;;  %1268 = vmatmul.f32.gmra.mxu3 %v4874_v38 }
 0x158   : > { %1001 = vmatmul.f32.gmra.mxu0 %v4877_v43  ;;  %1090 = vmatmul.f32.gmra.mxu1 %v4882_v44 }
 0x15d   : > { %1182 = vmatmul.f32.gmra.mxu2 %v4891_v57  ;;  %1271 = vmatmul.f32.gmra.mxu3 %v4894_v58  ;;  %v5003_v58 = vld [vmem:[%s4446_s14 + $0x250] sm:$0xff]  ;;  %v593_v57 = vld [vmem:[%s4454_s12 + $0x288] sm:$0xff] }
 0x15e   : > { %6455 = vst [vmem:[#allocation53_spill] sm:$0xff] %v5003_v58 }
 0x160   : > { %1004 = vmatmul.f32.gmra.mxu0 %v4899_v1  ;;  %1093 = vmatmul.f32.gmra.mxu1 %v4902_v2  ;;  %v4983_v2 = vld [vmem:[%s4446_s14 + $0x230] sm:$0xff] }
 0x161   : > { %6451 = vst [vmem:[#allocation49_spill] sm:$0xff] %v4983_v2 }
 0x165   : > { %1185 = vmatmul.f32.gmra.mxu2 %v4908_v10  ;;  %1274 = vmatmul.f32.gmra.mxu3 %v4911_v11  ;;  %v603_v11 = vld [vmem:[%s4454_s12 + $0x2d8] sm:$0xff] }
 0x166   : > { %1410 = vmatpush.msrb.mxu1 %v603_v11  ;;  %v758_v11 = vld [vmem:[%s4454_s12 + $0x7b0] sm:$0xff] }
 0x168   : > { %1007 = vmatmul.f32.gmra.mxu0 %v4916_v12  ;;  %1096 = vmatmul.f32.gmra.mxu1 %v4919_v19  ;;  %v4975_v19 = vld [vmem:[%s4446_s14 + $0x208] sm:$0xff]  ;;  %v523_v12 = vld [vmem:[%s4454_s12 + $0x58] sm:$0xff] }
 0x169   : > { %6450 = vst [vmem:[#allocation48_spill] sm:$0xff] %v4975_v19  ;;  %1321 = vmatpush.msrb.mxu0 %v523_v12  ;;  %v4994_v12 = vld [vmem:[%s4446_s14 + $0x228] sm:$0xff] }
 0x16a   : > { %6454 = vst [vmem:[#allocation52_spill] sm:$0xff] %v4994_v12 }
 0x16d   : > { %1188 = vmatmul.f32.gmra.mxu2 %v4927_v49  ;;  %1277 = vmatmul.f32.gmra.mxu3 %v4930_v50  ;;  %v4947_v50 = vld [vmem:[%s4446_s14 + $0x1f0] sm:$0xff]  ;;  %v4950_v49 = vld [vmem:[%s4446_s14 + $0x1f8] sm:$0xff] }
 0x16e   : > { %6443 = vst [vmem:[#allocation41_spill] sm:$0xff] %v4947_v50 }
 0x16f   : > { %6444 = vst [vmem:[#allocation42_spill] sm:$0xff] %v4950_v49 }
 0x170   : > { %1010 = vmatmul.f32.gmra.mxu0 %v4935_v51  ;;  %1099 = vmatmul.f32.gmra.mxu1 %v4938_v52  ;;  %v4955_v52 = vld [vmem:[%s4446_s14 + $0x1e0] sm:$0xff] }
 0x171   : > { %6445 = vst [vmem:[#allocation43_spill] sm:$0xff] %v4955_v52  ;;  %v4972_v51 = vld [vmem:[%s4446_s14 + $0x200] sm:$0xff] }
 0x172   : > { %6449 = vst [vmem:[#allocation47_spill] sm:$0xff] %v4972_v51 }
 0x175   : > { %1191 = vmatmul.f32.gmra.mxu2 %v4947_v50  ;;  %1280 = vmatmul.f32.gmra.mxu3 %v4950_v49 }
 0x178   : > { %1013 = vmatmul.f32.gmra.mxu0 %v4955_v52  ;;  %1102 = vmatmul.f32.gmra.mxu1 %v4958_v9  ;;  %v763_v9 = vld [vmem:[%s4454_s12 + $0x7d8] sm:$0xff] }
 0x179   : > { %1588 = vmatpush.msrb.mxu3 %v763_v9  ;;  %v678_v9 = vld [vmem:[%s4454_s12 + $0x530] sm:$0xff] }
 0x17a   : > { %1500 = vmatpush.msrb.mxu2 %v678_v9 }
 0x17b   : > { %1589 = vmatpush.msrb.mxu3 %v758_v11  ;;  %v5011_v11 = vld [vmem:[%s4446_s14 + $0x240] sm:$0xff] }
 0x17c   : > { %6457 = vst [vmem:[#allocation55_spill] sm:$0xff] %v5011_v11 }
 0x17d   : > { %1194 = vmatmul.f32.gmra.mxu2 %v4964_v31  ;;  %v969_v49 = vpop.f32.mrf.mxu0  ;;  %v1058_v50 = vpop.f32.mrf.mxu1  ;;  %1283 = vmatmul.f32.gmra.mxu3 %v4967_v32  ;;  %v832_v32 = vld [vmem:[#allocation2 + $0x2b0] sm:$0xff] }
 0x17e   : > { %v1059_v52 = vadd.f32 %v1058_v50, %v969_v49  ;;  %v4986_v49 = vld [vmem:[%s4446_s14 + $0x238] sm:$0xff] }
 0x17f   : > { %6452 = vst [vmem:[#allocation50_spill] sm:$0xff] %v4986_v49 }
 0x180   : > { %v1147_v10 = vpop.f32.mrf.mxu2  ;;  %1016 = vmatmul.f32.gmra.mxu0 %v4972_v51  ;;  %1105 = vmatmul.f32.gmra.mxu1 %v4975_v19  ;;  %v1236_v20 = vpop.f32.mrf.mxu3 }
 0x181   : > { %v1148_v31 = vadd.f32 %v1147_v10, %v1059_v52  ;;  %v4991_v10 = vld [vmem:[%s4446_s14 + $0x220] sm:$0xff] }
 0x182   : > { %6453 = vst [vmem:[#allocation51_spill] sm:$0xff] %v4991_v10 }
 0x183   : > { %v1237_v50 = vadd.f32 %v1236_v20, %v1148_v31 }
 0x185   : > { %v2732_v1 = vadd.f32 %v1237_v50, %v832_v32  ;;  %1197 = vmatmul.f32.gmra.mxu2 %v4983_v2  ;;  %v972_v51 = vpop.f32.mrf.mxu0  ;;  %v1061_v19 = vpop.f32.mrf.mxu1  ;;  %1286 = vmatmul.f32.gmra.mxu3 %v4986_v49  ;;  %v518_v50 = vld [vmem:[%s4454_s12 + $0x30] sm:$0xff]  ;;  %v837_v2 = vld [vmem:[#allocation2 + $0x368] sm:$0xff] }
 0x186   : > { %v1062_v52 = vadd.f32 %v1061_v19, %v972_v51  ;;  %v598_v49 = vld [vmem:[%s4454_s12 + $0x2b0] sm:$0xff]  ;;  %v5006_v19 = vld [vmem:[%s4446_s14 + $0x258] sm:$0xff]  ;;  %1322 = vmatpush.msrb.mxu0 %v518_v50 }
 0x187   : > { %2852 = vst [vmem:[#allocation2 + $0x2b0] sm:$0xff] %v2732_v1  ;;  %1411 = vmatpush.msrb.mxu1 %v598_v49  ;;  %v5020_v50 = vld [vmem:[%s4446_s14 + $0x270] sm:$0xff] }
 0x188   : > { %v1150_v31 = vpop.f32.mrf.mxu2  ;;  %1019 = vmatmul.f32.gmra.mxu0 %v4991_v10  ;;  %1108 = vmatmul.f32.gmra.mxu1 %v4994_v12  ;;  %v1239_v32 = vpop.f32.mrf.mxu3  ;;  %6456 = vst [vmem:[#allocation54_spill] sm:$0xff] %v5006_v19 }
 0x189   : > { %v1151_v20 = vadd.f32 %v1150_v31, %v1062_v52  ;;  %v5014_v31 = vld [vmem:[%s4446_s14 + $0x248] sm:$0xff]  ;;  %6459 = vst [vmem:[#allocation57_spill] sm:$0xff] %v5020_v50  ;;  %1412 = vmatpush.msrb.mxu1 %v593_v57 }
 0x18a   : > { %6458 = vst [vmem:[#allocation56_spill] sm:$0xff] %v5014_v31  ;;  %v829_v57 = vld [vmem:[%s4454_s12 + $0x9e8] sm:$0xff] }
 0x18b   : > { %v1240_v1 = vadd.f32 %v1239_v32, %v1151_v20  ;;  %v673_v32 = vld [vmem:[%s4454_s12 + $0x508] sm:$0xff]  ;;  %v842_v20 = vld [vmem:[#allocation2 + $0x118] sm:$0xff] }
 0x18c   : > { %1501 = vmatpush.msrb.mxu2 %v673_v32 }
 0x18d   : > { %v2737_v51 = vadd.f32 %v1240_v1, %v837_v2  ;;  %1200 = vmatmul.f32.gmra.mxu2 %v5003_v58  ;;  %v975_v52 = vpop.f32.mrf.mxu0  ;;  %v1064_v9 = vpop.f32.mrf.mxu1  ;;  %1289 = vmatmul.f32.gmra.mxu3 %v5006_v19  ;;  %v5023_v1 = vld [vmem:[%s4446_s14 + $0x278] sm:$0xff]  ;;  %v753_v19 = vld [vmem:[%s4454_s12 + $0x788] sm:$0xff] }
 0x18e   : > { %v1065_v12 = vadd.f32 %v1064_v9, %v975_v52  ;;  %6460 = vst [vmem:[#allocation58_spill] sm:$0xff] %v5023_v1  ;;  %v513_v58 = vld [vmem:[%s4454_s12 + $0x8] sm:$0xff]  ;;  %1590 = vmatpush.msrb.mxu3 %v753_v19  ;;  %v5047_v19 = vld [vmem:[%s4446_s14 + $0x280] sm:$0xff] }
 0x18f   : > { %2857 = vst [vmem:[#allocation2 + $0x368] sm:$0xff] %v2737_v51  ;;  %1323 = vmatpush.msrb.mxu0 %v513_v58  ;;  %v5050_v58 = vld [vmem:[%s4446_s14 + $0x288] sm:$0xff] }
 0x190   : > { %v1153_v10 = vpop.f32.mrf.mxu2  ;;  %1022 = vmatmul.f32.gmra.mxu0 %v5011_v11  ;;  %1111 = vmatmul.f32.gmra.mxu1 %v5014_v31  ;;  %v1242_v2 = vpop.f32.mrf.mxu3  ;;  %6465 = vst [vmem:[#allocation63_spill] sm:$0xff] %v5047_v19 }
 0x191   : > { %v1154_v49 = vadd.f32 %v1153_v10, %v1065_v12  ;;  %v5028_v10 = vld [vmem:[%s4446_s14 + $0x260] sm:$0xff]  ;;  %v5031_v12 = vld [vmem:[%s4446_s14 + $0x268] sm:$0xff]  ;;  %6466 = vst [vmem:[#allocation64_spill] sm:$0xff] %v5050_v58  ;;  %1931 = vmatpush.msra.mxu3 %v829_v57 }
 0x192   : > { %6461 = vst [vmem:[#allocation59_spill] sm:$0xff] %v5028_v10  ;;  %v5067_v57 = vld [vmem:[%s4446_s14 + $0x2a0] sm:$0xff] }
 0x193   : > { %v1243_v51 = vadd.f32 %v1242_v2, %v1154_v49  ;;  %6462 = vst [vmem:[#allocation60_spill] sm:$0xff] %v5031_v12 }
 0x194   : > { %6469 = vst [vmem:[#allocation67_spill] sm:$0xff] %v5067_v57 }
 0x195   : > { %v2742_v52 = vadd.f32 %v1243_v51, %v842_v20  ;;  %1203 = vmatmul.f32.gmra.mxu2 %v5020_v50  ;;  %v978_v9 = vpop.f32.mrf.mxu0  ;;  %v1067_v11 = vpop.f32.mrf.mxu1  ;;  %1292 = vmatmul.f32.gmra.mxu3 %v5023_v1  ;;  %v847_v20 = vld [vmem:[#allocation2 + $0x60] sm:$0xff]  ;;  %v5039_v51 = vld [vmem:[%s4446_s14 + $0x290] sm:$0xff] }
 0x196   : > { %v1068_v31 = vadd.f32 %v1067_v11, %v978_v9  ;;  %6463 = vst [vmem:[#allocation61_spill] sm:$0xff] %v5039_v51  ;;  %v5042_v11 = vld [vmem:[%s4446_s14 + $0x298] sm:$0xff]  ;;  %v5059_v1 = vld [vmem:[%s4446_s14 + $0x2b0] sm:$0xff]  ;;  %v664_v50 = vld [vmem:[%s4454_s12 + $0x4c0] sm:$0xff] }
 0x197   : > { %2862 = vst [vmem:[#allocation2 + $0x118] sm:$0xff] %v2742_v52 }
 0x198   : > { %v1156_v32 = vpop.f32.mrf.mxu2  ;;  %1025 = vmatmul.f32.gmra.mxu0 %v5028_v10  ;;  %1114 = vmatmul.f32.gmra.mxu1 %v5031_v12  ;;  %v1245_v2 = vpop.f32.mrf.mxu3  ;;  %6464 = vst [vmem:[#allocation62_spill] sm:$0xff] %v5042_v11 }
 0x199   : > { %v1157_v49 = vadd.f32 %v1156_v32, %v1068_v31  ;;  %v749_v32 = vld [vmem:[%s4454_s12 + $0x768] sm:$0xff]  ;;  %6467 = vst [vmem:[#allocation65_spill] sm:$0xff] %v5059_v1 }
 0x19a   : > { %1842 = vmatpush.msra.mxu2 %v749_v32 }
 0x19b   : > { %v1246_v52 = vadd.f32 %v1245_v2, %v1157_v49 }
 0x19d   : > { %v2747_v9 = vadd.f32 %v1246_v52, %v847_v20  ;;  %1206 = vmatmul.f32.gmra.mxu2 %v5039_v51  ;;  %v981_v10 = vpop.f32.mrf.mxu0  ;;  %v1070_v12 = vpop.f32.mrf.mxu1  ;;  %1295 = vmatmul.f32.gmra.mxu3 %v5042_v11  ;;  %v589_v52 = vld [vmem:[%s4454_s12 + $0x268] sm:$0xff]  ;;  %v852_v51 = vld [vmem:[#allocation2 + $0x80] sm:$0xff] }
 0x19e   : > { %v1071_v31 = vadd.f32 %v1070_v12, %v981_v10  ;;  %v669_v11 = vld [vmem:[%s4454_s12 + $0x4e8] sm:$0xff]  ;;  %v5062_v10 = vld [vmem:[%s4446_s14 + $0x2b8] sm:$0xff]  ;;  %1664 = vmatpush.msra.mxu0 %v589_v52  ;;  %v5076_v52 = vld [vmem:[%s4446_s14 + $0x2d0] sm:$0xff] }
 0x19f   : > { %2867 = vst [vmem:[#allocation2 + $0x60] sm:$0xff] %v2747_v9  ;;  %1753 = vmatpush.msra.mxu1 %v669_v11 }
 0x1a0   : > { %v1159_v2 = vpop.f32.mrf.mxu2  ;;  %1028 = vmatmul.f32.gmra.mxu0 %v5047_v19  ;;  %1117 = vmatmul.f32.gmra.mxu1 %v5050_v58  ;;  %v1248_v49 = vpop.f32.mrf.mxu3  ;;  %6468 = vst [vmem:[#allocation66_spill] sm:$0xff] %v5062_v10 }
 0x1a1   : > { %v1160_v20 = vadd.f32 %v1159_v2, %v1071_v31  ;;  %v5070_v2 = vld [vmem:[%s4446_s14 + $0x2a8] sm:$0xff]  ;;  %6471 = vst [vmem:[#allocation69_spill] sm:$0xff] %v5076_v52  ;;  %1754 = vmatpush.msra.mxu1 %v664_v50 }
 0x1a2   : > { %6470 = vst [vmem:[#allocation68_spill] sm:$0xff] %v5070_v2 }
 0x1a3   : > { %v1249_v12 = vadd.f32 %v1248_v49, %v1160_v20  ;;  %v744_v49 = vld [vmem:[%s4454_s12 + $0x740] sm:$0xff]  ;;  %v857_v20 = vld [vmem:[#allocation2 + $0x288] sm:$0xff] }
 0x1a4   : > { %1843 = vmatpush.msra.mxu2 %v744_v49 }
 0x1a5   : > { %v2752_v9 = vadd.f32 %v1249_v12, %v852_v51  ;;  %1209 = vmatmul.f32.gmra.mxu2 %v5059_v1  ;;  %v984_v31 = vpop.f32.mrf.mxu0  ;;  %v1073_v32 = vpop.f32.mrf.mxu1  ;;  %1298 = vmatmul.f32.gmra.mxu3 %v5062_v10  ;;  %v5079_v12 = vld [vmem:[%s4446_s14 + $0x2d8] sm:$0xff]  ;;  %v824_v10 = vld [vmem:[%s4454_s12 + $0x9c0] sm:$0xff] }
 0x1a6   : > { %v1074_v58 = vadd.f32 %v1073_v32, %v984_v31  ;;  %6472 = vst [vmem:[#allocation70_spill] sm:$0xff] %v5079_v12  ;;  %v584_v1 = vld [vmem:[%s4454_s12 + $0x240] sm:$0xff]  ;;  %1932 = vmatpush.msra.mxu3 %v824_v10 }
 0x1a7   : > { %2872 = vst [vmem:[#allocation2 + $0x80] sm:$0xff] %v2752_v9  ;;  %1665 = vmatpush.msra.mxu0 %v584_v1  ;;  %v5103_v10 = vld [vmem:[%s4446_s14 + $0x2e0] sm:$0xff]  ;;  %v5106_v1 = vld [vmem:[%s4446_s14 + $0x2e8] sm:$0xff] }
 0x1a8   : > { %v1162_v19 = vpop.f32.mrf.mxu2  ;;  %1031 = vmatmul.f32.gmra.mxu0 %v5067_v57  ;;  %1120 = vmatmul.f32.gmra.mxu1 %v5070_v2  ;;  %v1251_v51 = vpop.f32.mrf.mxu3  ;;  %6476 = vst [vmem:[#allocation74_spill] sm:$0xff] %v5103_v10 }
 0x1a9   : > { %v1163_v11 = vadd.f32 %v1162_v19, %v1074_v58  ;;  %v5084_v19 = vld [vmem:[%s4446_s14 + $0x2c0] sm:$0xff]  ;;  %v5087_v58 = vld [vmem:[%s4446_s14 + $0x2c8] sm:$0xff]  ;;  %6477 = vst [vmem:[#allocation75_spill] sm:$0xff] %v5106_v1 }
 0x1aa   : > { %6473 = vst [vmem:[#allocation71_spill] sm:$0xff] %v5084_v19 }
 0x1ab   : > { %v1252_v9 = vadd.f32 %v1251_v51, %v1163_v11  ;;  %6474 = vst [vmem:[#allocation72_spill] sm:$0xff] %v5087_v58 }
 0x1ad   : > { %v2757_v31 = vadd.f32 %v1252_v9, %v857_v20  ;;  %1212 = vmatmul.f32.gmra.mxu2 %v5076_v52  ;;  %v987_v32 = vpop.f32.mrf.mxu0  ;;  %v1076_v57 = vpop.f32.mrf.mxu1  ;;  %1301 = vmatmul.f32.gmra.mxu3 %v5079_v12  ;;  %v862_v20 = vld [vmem:[#allocation2 + $0xf0] sm:$0xff]  ;;  %v819_v12 = vld [vmem:[%s4454_s12 + $0x998] sm:$0xff] }
 0x1ae   : > { %v1077_v2 = vadd.f32 %v1076_v57, %v987_v32  ;;  %v5095_v9 = vld [vmem:[%s4446_s14 + $0x2f0] sm:$0xff]  ;;  %v5098_v57 = vld [vmem:[%s4446_s14 + $0x2f8] sm:$0xff]  ;;  %1933 = vmatpush.msra.mxu3 %v819_v12 }
 0x1af   : > { %2877 = vst [vmem:[#allocation2 + $0x288] sm:$0xff] %v2757_v31 }
 0x1b0   : > { %v1165_v49 = vpop.f32.mrf.mxu2  ;;  %1034 = vmatmul.f32.gmra.mxu0 %v5084_v19  ;;  %1123 = vmatmul.f32.gmra.mxu1 %v5087_v58  ;;  %v1254_v51 = vpop.f32.mrf.mxu3  ;;  %6475 = vst [vmem:[#allocation73_spill] sm:$0xff] %v5098_v57 }
 0x1b1   : > { %v1166_v11 = vadd.f32 %v1165_v49, %v1077_v2  ;;  %v739_v49 = vld [vmem:[%s4454_s12 + $0x718] sm:$0xff] }
 0x1b2   : > { %1844 = vmatpush.msra.mxu2 %v739_v49 }
 0x1b3   : > { %v1255_v31 = vadd.f32 %v1254_v51, %v1166_v11  ;;  %v579_v11 = vld [vmem:[%s4454_s12 + $0x218] sm:$0xff] }
 0x1b4   : > { %1666 = vmatpush.msra.mxu0 %v579_v11  ;;  %v574_v11 = vld [vmem:[%s4454_s12 + $0x1f0] sm:$0xff] }
 0x1b5   : > { %v2762_v32 = vadd.f32 %v1255_v31, %v862_v20  ;;  %1215 = vmatmul.f32.gmra.mxu2 %v5095_v9  ;;  %v990_v19 = vpop.f32.mrf.mxu0  ;;  %v1079_v58 = vpop.f32.mrf.mxu1  ;;  %1304 = vmatmul.f32.gmra.mxu3 %v5098_v57  ;;  %v659_v20 = vld [vmem:[%s4454_s12 + $0x498] sm:$0xff] }
 0x1b6   : > { %v1080_v2 = vadd.f32 %v1079_v58, %v990_v19  ;;  %v867_v31 = vld [vmem:[#allocation2 + $0x278] sm:$0xff]  ;;  %1755 = vmatpush.msra.mxu1 %v659_v20  ;;  %v654_v20 = vld [vmem:[%s4454_s12 + $0x470] sm:$0xff]  ;;  %1667 = vmatpush.msra.mxu0 %v574_v11  ;;  %v724_v11 = vld [vmem:[%s4454_s12 + $0x6a0] sm:$0xff] }
 0x1b7   : > { %2882 = vst [vmem:[#allocation2 + $0xf0] sm:$0xff] %v2762_v32 }
 0x1b8   : > { %v1168_v52 = vpop.f32.mrf.mxu2  ;;  %1037 = vmatmul.f32.gmra.mxu0 %v5103_v10  ;;  %1126 = vmatmul.f32.gmra.mxu1 %v5106_v1  ;;  %v1257_v50 = vpop.f32.mrf.mxu3 }
 0x1b9   : > { %v1169_v51 = vadd.f32 %v1168_v52, %v1080_v2  ;;  %v734_v2 = vld [vmem:[%s4454_s12 + $0x6f0] sm:$0xff]  ;;  %1756 = vmatpush.msra.mxu1 %v654_v20  ;;  %v887_v20 = vld [vmem:[#allocation2 + $0x300] sm:$0xff] }
 0x1ba   : > { %1845 = vmatpush.msra.mxu2 %v734_v2 }
 0x1bb   : > { %v1258_v57 = vadd.f32 %v1257_v50, %v1169_v51 }
 0x1bd   : > { %v2767_v19 = vadd.f32 %v1258_v57, %v867_v31  ;;  %1502 = vmatmul.f32.vlgmr.msrb.gmra.mxu2 %v4653_v63  ;;  %v993_v58 = vpop.f32.mrf.mxu0  ;;  %v1082_v32 = vpop.f32.mrf.mxu1  ;;  %1591 = vmatmul.f32.vlgmr.msrb.gmra.mxu3 %v4656_v0  ;;  %v872_v57 = vld [vmem:[#allocation2 + $0x1c0] sm:$0xff] }
 0x1be   : > { %v1083_v10 = vadd.f32 %v1082_v32, %v993_v58  ;;  %v809_v32 = vld [vmem:[%s4454_s12 + $0x948] sm:$0xff] }
 0x1bf   : > { %2887 = vst [vmem:[#allocation2 + $0x278] sm:$0xff] %v2767_v19 }
 0x1c0   : > { %v1171_v1 = vpop.f32.mrf.mxu2  ;;  %1324 = vmatmul.f32.vlgmr.msrb.gmra.mxu0 %v4665_v5  ;;  %1413 = vmatmul.f32.vlgmr.msrb.gmra.mxu1 %v4668_v6  ;;  %v1260_v52 = vpop.f32.mrf.mxu3  ;;  %v814_v5 = vld [vmem:[%s4454_s12 + $0x970] sm:$0xff] }
 0x1c1   : > { %v1172_v12 = vadd.f32 %v1171_v1, %v1083_v10  ;;  %1934 = vmatpush.msra.mxu3 %v814_v5 }
 0x1c3   : > { %v1261_v63 = vadd.f32 %v1260_v52, %v1172_v12  ;;  %1935 = vmatpush.msra.mxu3 %v809_v32  ;;  %v799_v32 = vld [vmem:[%s4454_s12 + $0x8f8] sm:$0xff] }
 0x1c5   : > { %v2772_v49 = vadd.f32 %v1261_v63, %v872_v57  ;;  %1505 = vmatmul.f32.gmra.mxu2 %v4681_v15  ;;  %v996_v0 = vpop.f32.mrf.mxu0  ;;  %v1085_v50 = vpop.f32.mrf.mxu1  ;;  %1594 = vmatmul.f32.gmra.mxu3 %v4684_v16  ;;  %v877_v15 = vld [vmem:[#allocation2 + $0x370] sm:$0xff]  ;;  %v569_v57 = vld [vmem:[%s4454_s12 + $0x1c8] sm:$0xff] }
 0x1c6   : > { %v1086_v51 = vadd.f32 %v1085_v50, %v996_v0  ;;  %v882_v63 = vld [vmem:[#allocation2 + $0x328] sm:$0xff]  ;;  %1668 = vmatpush.msra.mxu0 %v569_v57  ;;  %v559_v57 = vld [vmem:[%s4454_s12 + $0x178] sm:$0xff] }
 0x1c7   : > { %2892 = vst [vmem:[#allocation2 + $0x1c0] sm:$0xff] %v2772_v49 }
 0x1c8   : > { %v1174_v6 = vpop.f32.mrf.mxu2  ;;  %1327 = vmatmul.f32.gmra.mxu0 %v4693_v21  ;;  %1416 = vmatmul.f32.gmra.mxu1 %v4696_v22  ;;  %v1263_v10 = vpop.f32.mrf.mxu3  ;;  %v729_v22 = vld [vmem:[%s4454_s12 + $0x6c8] sm:$0xff] }
 0x1c9   : > { %v1175_v1 = vadd.f32 %v1174_v6, %v1086_v51  ;;  %1846 = vmatpush.msra.mxu2 %v729_v22 }
 0x1cb   : > { %v1264_v31 = vadd.f32 %v1263_v10, %v1175_v1  ;;  %1847 = vmatpush.msra.mxu2 %v724_v11 }
 0x1cd   : > { %v2777_v16 = vadd.f32 %v1264_v31, %v877_v15  ;;  %1508 = vmatmul.f32.gmra.mxu2 %v4703_v25  ;;  %v999_v19 = vpop.f32.mrf.mxu0  ;;  %v1088_v58 = vpop.f32.mrf.mxu1  ;;  %1597 = vmatmul.f32.gmra.mxu3 %v4706_v26  ;;  %v649_v25 = vld [vmem:[%s4454_s12 + $0x448] sm:$0xff]  ;;  %v564_v15 = vld [vmem:[%s4454_s12 + $0x1a0] sm:$0xff] }
 0x1ce   : > { %v1089_v21 = vadd.f32 %v1088_v58, %v999_v19  ;;  %1757 = vmatpush.msra.mxu1 %v649_v25  ;;  %v644_v31 = vld [vmem:[%s4454_s12 + $0x420] sm:$0xff]  ;;  %1669 = vmatpush.msra.mxu0 %v564_v15  ;;  %v789_v15 = vld [vmem:[%s4454_s12 + $0x8a8] sm:$0xff] }
 0x1cf   : > { %2897 = vst [vmem:[#allocation2 + $0x370] sm:$0xff] %v2777_v16  ;;  %v897_v25 = vld [vmem:[#allocation2 + $0xc0] sm:$0xff] }
 0x1d0   : > { %v1177_v52 = vpop.f32.mrf.mxu2  ;;  %1330 = vmatmul.f32.gmra.mxu0 %v4709_v27  ;;  %1419 = vmatmul.f32.gmra.mxu1 %v4714_v28  ;;  %v1266_v12 = vpop.f32.mrf.mxu3 }
 0x1d1   : > { %v1178_v2 = vadd.f32 %v1177_v52, %v1089_v21  ;;  %1758 = vmatpush.msra.mxu1 %v644_v31  ;;  %1670 = vmatpush.msra.mxu0 %v559_v57  ;;  %v544_v57 = vld [vmem:[%s4454_s12 + $0x100] sm:$0xff] }
 0x1d3   : > { %v1267_v26 = vadd.f32 %v1266_v12, %v1178_v2 }
 0x1d5   : > { %v2782_v49 = vadd.f32 %v1267_v26, %v882_v63  ;;  %1511 = vmatmul.f32.gmra.mxu2 %v4723_v33  ;;  %v1002_v0 = vpop.f32.mrf.mxu0  ;;  %v1091_v50 = vpop.f32.mrf.mxu1  ;;  %1600 = vmatmul.f32.gmra.mxu3 %v4726_v34 }
 0x1d6   : > { %v1092_v27 = vadd.f32 %v1091_v50, %v1002_v0 }
 0x1d7   : > { %2902 = vst [vmem:[#allocation2 + $0x328] sm:$0xff] %v2782_v49 }
 0x1d8   : > { %v1180_v28 = vpop.f32.mrf.mxu2  ;;  %1333 = vmatmul.f32.gmra.mxu0 %v4731_v35  ;;  %1422 = vmatmul.f32.gmra.mxu1 %v4734_v36  ;;  %v1269_v51 = vpop.f32.mrf.mxu3  ;;  %v804_v35 = vld [vmem:[%s4454_s12 + $0x920] sm:$0xff] }
 0x1d9   : > { %v1181_v5 = vadd.f32 %v1180_v28, %v1092_v27  ;;  %1936 = vmatpush.msra.mxu3 %v804_v35  ;;  %v714_v27 = vld [vmem:[%s4454_s12 + $0x650] sm:$0xff]  ;;  %v902_v28 = vld [vmem:[#allocation2 + $0x348] sm:$0xff] }
 0x1db   : > { %v1270_v33 = vadd.f32 %v1269_v51, %v1181_v5  ;;  %1937 = vmatpush.msra.mxu3 %v799_v32  ;;  %v917_v32 = vld [vmem:[#allocation2 + $0x160] sm:$0xff] }
 0x1dd   : > { %v2787_v6 = vadd.f32 %v1270_v33, %v887_v20  ;;  %1514 = vmatmul.f32.gmra.mxu2 %v4741_v39  ;;  %v1005_v34 = vpop.f32.mrf.mxu0  ;;  %v1094_v10 = vpop.f32.mrf.mxu1  ;;  %1603 = vmatmul.f32.gmra.mxu3 %v4744_v40  ;;  %v892_v39 = vld [vmem:[#allocation2 + $0x2e8] sm:$0xff]  ;;  %v554_v20 = vld [vmem:[%s4454_s12 + $0x150] sm:$0xff] }
 0x1de   : > { %v1095_v1 = vadd.f32 %v1094_v10, %v1005_v34  ;;  %v634_v33 = vld [vmem:[%s4454_s12 + $0x3d0] sm:$0xff]  ;;  %1671 = vmatpush.msra.mxu0 %v554_v20  ;;  %v6481_v20 = vld [vmem:[#allocation32_spill] sm:$0xff] }
 0x1df   : > { %2907 = vst [vmem:[#allocation2 + $0x300] sm:$0xff] %v2787_v6 }
 0x1e0   : > { %v1183_v36 = vpop.f32.mrf.mxu2  ;;  %1336 = vmatmul.f32.gmra.mxu0 %v4747_v41  ;;  %1425 = vmatmul.f32.gmra.mxu1 %v4752_v42  ;;  %v1272_v16 = vpop.f32.mrf.mxu3  ;;  %v719_v42 = vld [vmem:[%s4454_s12 + $0x678] sm:$0xff] }
 0x1e1   : > { %v1184_v19 = vadd.f32 %v1183_v36, %v1095_v1  ;;  %1848 = vmatpush.msra.mxu2 %v719_v42  ;;  %v704_v42 = vld [vmem:[%s4454_s12 + $0x600] sm:$0xff] }
 0x1e3   : > { %v1273_v58 = vadd.f32 %v1272_v16, %v1184_v19  ;;  %1849 = vmatpush.msra.mxu2 %v714_v27  ;;  %v549_v19 = vld [vmem:[%s4454_s12 + $0x128] sm:$0xff]  ;;  %v539_v27 = vld [vmem:[%s4454_s12 + $0xd8] sm:$0xff] }
 0x1e4   : > { %1672 = vmatpush.msra.mxu0 %v549_v19  ;;  %v6484_v19 = vld [vmem:[#allocation35_spill] sm:$0xff] }
 0x1e5   : > { %v2792_v40 = vadd.f32 %v1273_v58, %v892_v39  ;;  %1517 = vmatmul.f32.gmra.mxu2 %v4759_v45  ;;  %v1008_v21 = vpop.f32.mrf.mxu0  ;;  %v1097_v22 = vpop.f32.mrf.mxu1  ;;  %1606 = vmatmul.f32.gmra.mxu3 %v4762_v46  ;;  %v639_v45 = vld [vmem:[%s4454_s12 + $0x3f8] sm:$0xff] }
 0x1e6   : > { %v1098_v41 = vadd.f32 %v1097_v22, %v1008_v21  ;;  %1759 = vmatpush.msra.mxu1 %v639_v45  ;;  %v912_v39 = vld [vmem:[#allocation2 + $0x2f8] sm:$0xff]  ;;  %v624_v45 = vld [vmem:[%s4454_s12 + $0x380] sm:$0xff]  ;;  %1673 = vmatpush.msra.mxu0 %v544_v57  ;;  %v529_v57 = vld [vmem:[%s4454_s12 + $0x88] sm:$0xff] }
 0x1e7   : > { %2912 = vst [vmem:[#allocation2 + $0x2e8] sm:$0xff] %v2792_v40 }
 0x1e8   : > { %v1186_v52 = vpop.f32.mrf.mxu2  ;;  %1339 = vmatmul.f32.gmra.mxu0 %v4765_v47  ;;  %1428 = vmatmul.f32.gmra.mxu1 %v4770_v48  ;;  %v1275_v12 = vpop.f32.mrf.mxu3 }
 0x1e9   : > { %v1187_v2 = vadd.f32 %v1186_v52, %v1098_v41  ;;  %1760 = vmatpush.msra.mxu1 %v634_v33  ;;  %1674 = vmatpush.msra.mxu0 %v539_v27  ;;  %v947_v27 = vld [vmem:[#allocation2 + $0x398] sm:$0xff] }
 0x1eb   : > { %v1276_v46 = vadd.f32 %v1275_v12, %v1187_v2 }
 0x1ed   : > { %v2797_v63 = vadd.f32 %v1276_v46, %v897_v25  ;;  %1520 = vmatmul.f32.gmra.mxu2 %v4779_v53  ;;  %v1011_v26 = vpop.f32.mrf.mxu0  ;;  %v1100_v49 = vpop.f32.mrf.mxu1  ;;  %1609 = vmatmul.f32.gmra.mxu3 %v4782_v54 }
 0x1ee   : > { %v1101_v47 = vadd.f32 %v1100_v49, %v1011_v26 }
 0x1ef   : > { %2917 = vst [vmem:[#allocation2 + $0xc0] sm:$0xff] %v2797_v63 }
 0x1f0   : > { %v1189_v48 = vpop.f32.mrf.mxu2  ;;  %1342 = vmatmul.f32.gmra.mxu0 %v4787_v55  ;;  %1431 = vmatmul.f32.gmra.mxu1 %v4790_v56  ;;  %v1278_v0 = vpop.f32.mrf.mxu3  ;;  %v794_v55 = vld [vmem:[%s4454_s12 + $0x8d0] sm:$0xff] }
 0x1f1   : > { %v1190_v50 = vadd.f32 %v1189_v48, %v1101_v47  ;;  %1938 = vmatpush.msra.mxu3 %v794_v55  ;;  %v779_v47 = vld [vmem:[%s4454_s12 + $0x858] sm:$0xff] }
 0x1f2   : > { %v6480_v55 = vld [vmem:[#allocation31_spill] sm:$0xff] }
 0x1f3   : > { %v1279_v53 = vadd.f32 %v1278_v0, %v1190_v50  ;;  %1939 = vmatpush.msra.mxu3 %v789_v15  ;;  %v774_v15 = vld [vmem:[%s4454_s12 + $0x830] sm:$0xff] }
 0x1f5   : > { %v2802_v51 = vadd.f32 %v1279_v53, %v902_v28  ;;  %1523 = vmatmul.f32.gmra.mxu2 %v4797_v59  ;;  %v1014_v54 = vpop.f32.mrf.mxu0  ;;  %v1103_v5 = vpop.f32.mrf.mxu1  ;;  %1612 = vmatmul.f32.gmra.mxu3 %v4800_v60  ;;  %v907_v59 = vld [vmem:[#allocation2 + $0x1e8] sm:$0xff]  ;;  %v927_v28 = vld [vmem:[#allocation2 + $0x220] sm:$0xff] }
 0x1f6   : > { %v1104_v11 = vadd.f32 %v1103_v5, %v1014_v54 }
 0x1f7   : > { %2922 = vst [vmem:[#allocation2 + $0x348] sm:$0xff] %v2802_v51  ;;  %v6478_v51 = vld [vmem:[#allocation29_spill] sm:$0xff] }
 0x1f8   : > { %v1192_v56 = vpop.f32.mrf.mxu2  ;;  %1345 = vmatmul.f32.gmra.mxu0 %v4803_v61  ;;  %1434 = vmatmul.f32.gmra.mxu1 %v4808_v62  ;;  %v1281_v6 = vpop.f32.mrf.mxu3  ;;  %v709_v62 = vld [vmem:[%s4454_s12 + $0x628] sm:$0xff] }
 0x1f9   : > { %v1193_v34 = vadd.f32 %v1192_v56, %v1104_v11  ;;  %1850 = vmatpush.msra.mxu2 %v709_v62  ;;  %v6479_v11 = vld [vmem:[#allocation30_spill] sm:$0xff] }
 0x1fb   : > { %v1282_v10 = vadd.f32 %v1281_v6, %v1193_v34  ;;  %1851 = vmatpush.msra.mxu2 %v704_v42  ;;  %v694_v6 = vld [vmem:[%s4454_s12 + $0x5b0] sm:$0xff]  ;;  %v932_v34 = vld [vmem:[#allocation2 + $0x1e0] sm:$0xff] }
 0x1fd   : > { %v2807_v60 = vadd.f32 %v1282_v10, %v907_v59  ;;  %1526 = vmatmul.f32.gmra.mxu2 %v4815_v3  ;;  %v1017_v1 = vpop.f32.mrf.mxu0  ;;  %v1106_v35 = vpop.f32.mrf.mxu1  ;;  %1615 = vmatmul.f32.gmra.mxu3 %v4818_v4  ;;  %v629_v3 = vld [vmem:[%s4454_s12 + $0x3a8] sm:$0xff] }
 0x1fe   : > { %v1107_v61 = vadd.f32 %v1106_v35, %v1017_v1  ;;  %1761 = vmatpush.msra.mxu1 %v629_v3  ;;  %v6485_v3 = vld [vmem:[#allocation36_spill] sm:$0xff] }
 0x1ff   : > { %2927 = vst [vmem:[#allocation2 + $0x1e8] sm:$0xff] %v2807_v60  ;;  %v6482_v60 = vld [vmem:[#allocation33_spill] sm:$0xff] }
 0x200   : > { %v1195_v31 = vpop.f32.mrf.mxu2  ;;  %1348 = vmatmul.f32.gmra.mxu0 %v4821_v7  ;;  %1437 = vmatmul.f32.gmra.mxu1 %v4826_v8  ;;  %v1284_v36 = vpop.f32.mrf.mxu3 }
 0x201   : > { %v1196_v16 = vadd.f32 %v1195_v31, %v1107_v61  ;;  %1762 = vmatpush.msra.mxu1 %v624_v45  ;;  %v6483_v61 = vld [vmem:[#allocation34_spill] sm:$0xff] }
 0x202   : > { %v534_v31 = vld [vmem:[%s4454_s12 + $0xb0] sm:$0xff]  ;;  %v609_v45 = vld [vmem:[%s4454_s12 + $0x308] sm:$0xff] }
 0x203   : > { %v1285_v4 = vadd.f32 %v1284_v36, %v1196_v16  ;;  %v614_v36 = vld [vmem:[%s4454_s12 + $0x330] sm:$0xff]  ;;  %1675 = vmatpush.msra.mxu0 %v534_v31  ;;  %v759_v31 = vld [vmem:[%s4454_s12 + $0x7b8] sm:$0xff] }
 0x205   : > { %v2812_v58 = vadd.f32 %v1285_v4, %v912_v39  ;;  %1529 = vmatmul.f32.gmra.mxu2 %v4835_v13  ;;  %v1020_v40 = vpop.f32.mrf.mxu0  ;;  %v1109_v21 = vpop.f32.mrf.mxu1  ;;  %1618 = vmatmul.f32.gmra.mxu3 %v4838_v14 }
 0x206   : > { %v1110_v7 = vadd.f32 %v1109_v21, %v1020_v40  ;;  %1676 = vmatpush.msra.mxu0 %v529_v57  ;;  %v843_v57 = vld [vmem:[#allocation2 + $0x98] sm:$0xff] }
 0x207   : > { %2932 = vst [vmem:[#allocation2 + $0x2f8] sm:$0xff] %v2812_v58  ;;  %v937_v58 = vld [vmem:[#allocation2 + $0x190] sm:$0xff] }
 0x208   : > { %v1198_v8 = vpop.f32.mrf.mxu2  ;;  %1351 = vmatmul.f32.gmra.mxu0 %v4843_v17  ;;  %1440 = vmatmul.f32.gmra.mxu1 %v4846_v18  ;;  %v1287_v22 = vpop.f32.mrf.mxu3  ;;  %v784_v17 = vld [vmem:[%s4454_s12 + $0x880] sm:$0xff] }
 0x209   : > { %v1199_v41 = vadd.f32 %v1198_v8, %v1110_v7  ;;  %1940 = vmatpush.msra.mxu3 %v784_v17  ;;  %v6486_v7 = vld [vmem:[#allocation37_spill] sm:$0xff] }
 0x20b   : > { %v1288_v13 = vadd.f32 %v1287_v22, %v1199_v41  ;;  %1941 = vmatpush.msra.mxu3 %v779_v47  ;;  %v6487_v41 = vld [vmem:[#allocation38_spill] sm:$0xff]  ;;  %v6493_v47 = vld [vmem:[#allocation44_spill] sm:$0xff] }
 0x20d   : > { %v2817_v52 = vadd.f32 %v1288_v13, %v917_v32  ;;  %1532 = vmatmul.f32.gmra.mxu2 %v4853_v23  ;;  %v1023_v14 = vpop.f32.mrf.mxu0  ;;  %v1112_v12 = vpop.f32.mrf.mxu1  ;;  %1621 = vmatmul.f32.gmra.mxu3 %v4856_v24  ;;  %v922_v23 = vld [vmem:[#allocation2 + $0x68] sm:$0xff] }
 0x20e   : > { %v1113_v2 = vadd.f32 %v1112_v12, %v1023_v14  ;;  %1942 = vmatpush.msra.mxu3 %v774_v15  ;;  %v689_v32 = vld [vmem:[%s4454_s12 + $0x588] sm:$0xff]  ;;  %v6488_v14 = vld [vmem:[#allocation39_spill] sm:$0xff]  ;;  %v6489_v12 = vld [vmem:[#allocation40_spill] sm:$0xff] }
 0x20f   : > { %2937 = vst [vmem:[#allocation2 + $0x160] sm:$0xff] %v2817_v52  ;;  %v769_v13 = vld [vmem:[%s4454_s12 + $0x808] sm:$0xff]  ;;  %v679_v15 = vld [vmem:[%s4454_s12 + $0x538] sm:$0xff] }
 0x210   : > { %v1201_v18 = vpop.f32.mrf.mxu2  ;;  %1354 = vmatmul.f32.gmra.mxu0 %v4859_v29  ;;  %1443 = vmatmul.f32.gmra.mxu1 %v4864_v30  ;;  %v1290_v25 = vpop.f32.mrf.mxu3  ;;  %v699_v30 = vld [vmem:[%s4454_s12 + $0x5d8] sm:$0xff] }
 0x211   : > { %v1202_v46 = vadd.f32 %v1201_v18, %v1113_v2  ;;  %1852 = vmatpush.msra.mxu2 %v699_v30  ;;  %1943 = vmatpush.msra.mxu3 %v769_v13  ;;  %v942_v18 = vld [vmem:[#allocation2 + $0xc8] sm:$0xff]  ;;  %v6492_v30 = vld [vmem:[#allocation43_spill] sm:$0xff] }
 0x213   : > { %v1291_v63 = vadd.f32 %v1290_v25, %v1202_v46  ;;  %1853 = vmatpush.msra.mxu2 %v694_v6 }
 0x215   : > { %v2822_v24 = vadd.f32 %v1291_v63, %v922_v23  ;;  %1535 = vmatmul.f32.gmra.mxu2 %v4871_v37  ;;  %v1026_v26 = vpop.f32.mrf.mxu0  ;;  %v1115_v49 = vpop.f32.mrf.mxu1  ;;  %1624 = vmatmul.f32.gmra.mxu3 %v4874_v38  ;;  %v619_v37 = vld [vmem:[%s4454_s12 + $0x358] sm:$0xff]  ;;  %v6490_v23 = vld [vmem:[#allocation41_spill] sm:$0xff] }
 0x216   : > { %v1116_v29 = vadd.f32 %v1115_v49, %v1026_v26  ;;  %1763 = vmatpush.msra.mxu1 %v619_v37  ;;  %1854 = vmatpush.msra.mxu2 %v689_v32  ;;  %v6491_v26 = vld [vmem:[#allocation42_spill] sm:$0xff] }
 0x217   : > { %2942 = vst [vmem:[#allocation2 + $0x68] sm:$0xff] %v2822_v24 }
 0x218   : > { %v1204_v48 = vpop.f32.mrf.mxu2  ;;  %1357 = vmatmul.f32.gmra.mxu0 %v4877_v43  ;;  %1446 = vmatmul.f32.gmra.mxu1 %v4882_v44  ;;  %v1293_v0 = vpop.f32.mrf.mxu3 }
 0x219   : > { %v1205_v50 = vadd.f32 %v1204_v48, %v1116_v29  ;;  %1764 = vmatpush.msra.mxu1 %v614_v36 }
 0x21b   : > { %v1294_v38 = vadd.f32 %v1293_v0, %v1205_v50  ;;  %1765 = vmatpush.msra.mxu1 %v609_v45  ;;  %v684_v50 = vld [vmem:[%s4454_s12 + $0x560] sm:$0xff] }
 0x21c   : > { %1855 = vmatpush.msra.mxu2 %v684_v50 }
 0x21d   : > { %v2827_v53 = vadd.f32 %v1294_v38, %v927_v28  ;;  %1538 = vmatmul.f32.gmra.mxu2 %v6478_v51  ;;  %v1029_v54 = vpop.f32.mrf.mxu0  ;;  %v1118_v5 = vpop.f32.mrf.mxu1  ;;  %1627 = vmatmul.f32.gmra.mxu3 %v6479_v11  ;;  %v6494_v38 = vld [vmem:[#allocation45_spill] sm:$0xff] }
 0x21e   : > { %v1119_v43 = vadd.f32 %v1118_v5, %v1029_v54  ;;  %v6495_v54 = vld [vmem:[#allocation46_spill] sm:$0xff]  ;;  %v764_v11 = vld [vmem:[%s4454_s12 + $0x7e0] sm:$0xff]  ;;  %1856 = vmatpush.msra.mxu2 %v679_v15 }
 0x21f   : > { %2947 = vst [vmem:[#allocation2 + $0x220] sm:$0xff] %v2827_v53  ;;  %1944 = vmatpush.msra.mxu3 %v764_v11  ;;  %v750_v11 = vld [vmem:[%s4454_s12 + $0x770] sm:$0xff] }
 0x220   : > { %v1207_v44 = vpop.f32.mrf.mxu2  ;;  %1360 = vmatmul.f32.gmra.mxu0 %v6480_v55  ;;  %1449 = vmatmul.f32.gmra.mxu1 %v6481_v20  ;;  %v1296_v33 = vpop.f32.mrf.mxu3  ;;  %v6496_v20 = vld [vmem:[#allocation47_spill] sm:$0xff] }
 0x221   : > { %v1208_v56 = vadd.f32 %v1207_v44, %v1119_v43  ;;  %v524_v43 = vld [vmem:[%s4454_s12 + $0x60] sm:$0xff]  ;;  %1945 = vmatpush.msra.mxu3 %v759_v31 }
 0x222   : > { %v604_v44 = vld [vmem:[%s4454_s12 + $0x2e0] sm:$0xff]  ;;  %1677 = vmatpush.msra.mxu0 %v524_v43  ;;  %v830_v43 = vld [vmem:[%s4454_s12 + $0x9f0] sm:$0xff] }
 0x223   : > { %v1297_v59 = vadd.f32 %v1296_v33, %v1208_v56  ;;  %v6497_v33 = vld [vmem:[#allocation48_spill] sm:$0xff]  ;;  %1766 = vmatpush.msra.mxu1 %v604_v44 }
 0x225   : > { %v2832_v10 = vadd.f32 %v1297_v59, %v932_v34  ;;  %1541 = vmatmul.f32.gmra.mxu2 %v6482_v60  ;;  %v1032_v1 = vpop.f32.mrf.mxu0  ;;  %v1121_v35 = vpop.f32.mrf.mxu1  ;;  %1630 = vmatmul.f32.gmra.mxu3 %v6483_v61  ;;  %v833_v34 = vld [vmem:[#allocation2 + $0x3b0] sm:$0xff]  ;;  %v6498_v60 = vld [vmem:[#allocation49_spill] sm:$0xff] }
 0x226   : > { %v1122_v62 = vadd.f32 %v1121_v35, %v1032_v1  ;;  %v6499_v61 = vld [vmem:[#allocation50_spill] sm:$0xff] }
 0x227   : > { %2952 = vst [vmem:[#allocation2 + $0x1e0] sm:$0xff] %v2832_v10 }
 0x228   : > { %v1210_v16 = vpop.f32.mrf.mxu2  ;;  %1363 = vmatmul.f32.gmra.mxu0 %v6484_v19  ;;  %1452 = vmatmul.f32.gmra.mxu1 %v6485_v3  ;;  %v1299_v39 = vpop.f32.mrf.mxu3  ;;  %v6501_v19 = vld [vmem:[#allocation52_spill] sm:$0xff] }
 0x229   : > { %v1211_v4 = vadd.f32 %v1210_v16, %v1122_v62  ;;  %v6500_v16 = vld [vmem:[#allocation51_spill] sm:$0xff] }
 0x22b   : > { %v1300_v40 = vadd.f32 %v1299_v39, %v1211_v4  ;;  %v519_v4 = vld [vmem:[%s4454_s12 + $0x38] sm:$0xff] }
 0x22c   : > { %1678 = vmatpush.msra.mxu0 %v519_v4  ;;  %v858_v4 = vld [vmem:[#allocation2 + $0x360] sm:$0xff] }
 0x22d   : > { %v2837_v21 = vadd.f32 %v1300_v40, %v937_v58  ;;  %1544 = vmatmul.f32.gmra.mxu2 %v6486_v7  ;;  %v1035_v8 = vpop.f32.mrf.mxu0  ;;  %v1124_v22 = vpop.f32.mrf.mxu1  ;;  %1633 = vmatmul.f32.gmra.mxu3 %v6487_v41  ;;  %v599_v58 = vld [vmem:[%s4454_s12 + $0x2b8] sm:$0xff]  ;;  %v838_v40 = vld [vmem:[#allocation2 + $0x330] sm:$0xff] }
 0x22e   : > { %v1125_v42 = vadd.f32 %v1124_v22, %v1035_v8  ;;  %1767 = vmatpush.msra.mxu1 %v599_v58  ;;  %v6502_v8 = vld [vmem:[#allocation53_spill] sm:$0xff] }
 0x22f   : > { %2957 = vst [vmem:[#allocation2 + $0x190] sm:$0xff] %v2837_v21 }
 0x230   : > { %v1213_v52 = vpop.f32.mrf.mxu2  ;;  %1366 = vmatmul.f32.gmra.mxu0 %v6488_v14  ;;  %1455 = vmatmul.f32.gmra.mxu1 %v6489_v12  ;;  %v1302_v2 = vpop.f32.mrf.mxu3  ;;  %v6505_v14 = vld [vmem:[#allocation56_spill] sm:$0xff] }
 0x231   : > { %v1214_v17 = vadd.f32 %v1213_v52, %v1125_v42  ;;  %v6503_v42 = vld [vmem:[#allocation54_spill] sm:$0xff]  ;;  %v6504_v52 = vld [vmem:[#allocation55_spill] sm:$0xff] }
 0x233   : > { %v1303_v25 = vadd.f32 %v1302_v2, %v1214_v17  ;;  %v674_v17 = vld [vmem:[%s4454_s12 + $0x510] sm:$0xff] }
 0x234   : > { %1857 = vmatpush.msra.mxu2 %v674_v17 }
 0x235   : > { %v2842_v46 = vadd.f32 %v1303_v25, %v942_v18  ;;  %1547 = vmatmul.f32.gmra.mxu2 %v6490_v23  ;;  %v1038_v63 = vpop.f32.mrf.mxu0  ;;  %v1127_v24 = vpop.f32.mrf.mxu1  ;;  %1636 = vmatmul.f32.gmra.mxu3 %v6491_v26  ;;  %v6506_v25 = vld [vmem:[#allocation57_spill] sm:$0xff]  ;;  %v754_v26 = vld [vmem:[%s4454_s12 + $0x790] sm:$0xff] }
 0x236   : > { %v1128_v49 = vadd.f32 %v1127_v24, %v1038_v63  ;;  %v6507_v63 = vld [vmem:[#allocation58_spill] sm:$0xff]  ;;  %1946 = vmatpush.msra.mxu3 %v754_v26  ;;  %2198 = vmatpush.msrb.mxu2 %v750_v11  ;;  %v820_v26 = vld [vmem:[%s4454_s12 + $0x9a0] sm:$0xff] }
 0x237   : > { %2962 = vst [vmem:[#allocation2 + $0xc8] sm:$0xff] %v2842_v46  ;;  %v5283_v11 = vld [vmem:[%s4446_s14] sm:$0xff] }
 0x238   : > { %v1216_v29 = vpop.f32.mrf.mxu2  ;;  %1369 = vmatmul.f32.gmra.mxu0 %v6492_v30  ;;  %1458 = vmatmul.f32.gmra.mxu1 %v6493_v47  ;;  %v1305_v48 = vpop.f32.mrf.mxu3  ;;  %v6508_v47 = vld [vmem:[#allocation59_spill] sm:$0xff] }
 0x239   : > { %v1217_v0 = vadd.f32 %v1216_v29, %v1128_v49  ;;  %v514_v49 = vld [vmem:[%s4454_s12 + $0x10] sm:$0xff]  ;;  %2287 = vmatpush.msrb.mxu3 %v830_v43  ;;  %v5287_v43 = vld [vmem:[%s4446_s14 + $0x8] sm:$0xff] }
 0x23a   : > { %v594_v29 = vld [vmem:[%s4454_s12 + $0x290] sm:$0xff]  ;;  %1679 = vmatpush.msra.mxu0 %v514_v49 }
 0x23b   : > { %v1306_v37 = vadd.f32 %v1305_v48, %v1217_v0  ;;  %v6509_v48 = vld [vmem:[#allocation60_spill] sm:$0xff]  ;;  %1768 = vmatpush.msra.mxu1 %v594_v29  ;;  %v6523_v29 = vld [vmem:[#allocation74_spill] sm:$0xff] }
 0x23d   : > { %v2847_v28 = vadd.f32 %v1306_v37, %v947_v27  ;;  %1550 = vmatmul.f32.gmra.mxu2 %v6494_v38  ;;  %v1325_v53 = vpop.f32.mrf.mxu0  ;;  %v1414_v51 = vpop.f32.mrf.mxu1  ;;  %1639 = vmatmul.f32.gmra.mxu3 %v6495_v54  ;;  %v848_v27 = vld [vmem:[#allocation2 + $0x2e0] sm:$0xff]  ;;  %v6511_v54 = vld [vmem:[#allocation62_spill] sm:$0xff] }
 0x23e   : > { %v1415_v5 = vadd.f32 %v1414_v51, %v1325_v53  ;;  %v6510_v38 = vld [vmem:[#allocation61_spill] sm:$0xff] }
 0x23f   : > { %2967 = vst [vmem:[#allocation2 + $0x398] sm:$0xff] %v2847_v28 }
 0x240   : > { %v1503_v55 = vpop.f32.mrf.mxu2  ;;  %1372 = vmatmul.f32.gmra.mxu0 %v6496_v20  ;;  %1461 = vmatmul.f32.gmra.mxu1 %v6497_v33  ;;  %v1592_v56 = vpop.f32.mrf.mxu3  ;;  %v6513_v20 = vld [vmem:[#allocation64_spill] sm:$0xff] }
 0x241   : > { %v1504_v6 = vadd.f32 %v1503_v55, %v1415_v5  ;;  %v6512_v55 = vld [vmem:[#allocation63_spill] sm:$0xff] }
 0x243   : > { %v1593_v59 = vadd.f32 %v1592_v56, %v1504_v6  ;;  %v590_v6 = vld [vmem:[%s4454_s12 + $0x270] sm:$0xff] }
 0x244   : > { %2020 = vmatpush.msrb.mxu0 %v590_v6 }
 0x245   : > { %v2733_v10 = vadd.f32 %v1593_v59, %v833_v34  ;;  %1553 = vmatmul.f32.gmra.mxu2 %v6498_v60  ;;  %v1328_v1 = vpop.f32.mrf.mxu0  ;;  %v1417_v35 = vpop.f32.mrf.mxu1  ;;  %1642 = vmatmul.f32.gmra.mxu3 %v6499_v61  ;;  %v670_v34 = vld [vmem:[%s4454_s12 + $0x4f0] sm:$0xff]  ;;  %v853_v59 = vld [vmem:[#allocation2 + $0x1a8] sm:$0xff] }
 0x246   : > { %v1418_v62 = vadd.f32 %v1417_v35, %v1328_v1  ;;  %2109 = vmatpush.msrb.mxu1 %v670_v34  ;;  %v6514_v1 = vld [vmem:[#allocation65_spill] sm:$0xff]  ;;  %v5292_v34 = vld [vmem:[%s4446_s14 + $0x30] sm:$0xff] }
 0x247   : > { %2853 = vst [vmem:[#allocation2 + $0x3b0] sm:$0xff] %v2733_v10 }
 0x248   : > { %v1506_v36 = vpop.f32.mrf.mxu2  ;;  %1375 = vmatmul.f32.gmra.mxu0 %v6500_v16  ;;  %1464 = vmatmul.f32.gmra.mxu1 %v6501_v19  ;;  %v1595_v3 = vpop.f32.mrf.mxu3  ;;  %v6517_v16 = vld [vmem:[#allocation68_spill] sm:$0xff] }
 0x249   : > { %v1507_v39 = vadd.f32 %v1506_v36, %v1418_v62  ;;  %v6515_v62 = vld [vmem:[#allocation66_spill] sm:$0xff]  ;;  %v6516_v36 = vld [vmem:[#allocation67_spill] sm:$0xff] }
 0x24b   : > { %v1596_v21 = vadd.f32 %v1595_v3, %v1507_v39  ;;  %v745_v39 = vld [vmem:[%s4454_s12 + $0x748] sm:$0xff] }
 0x24c   : > { %2199 = vmatpush.msrb.mxu2 %v745_v39 }
 0x24d   : > { %v2738_v7 = vadd.f32 %v1596_v21, %v838_v40  ;;  %1556 = vmatmul.f32.gmra.mxu2 %v6502_v8  ;;  %v1331_v22 = vpop.f32.mrf.mxu0  ;;  %v1420_v41 = vpop.f32.mrf.mxu1  ;;  %1645 = vmatmul.f32.gmra.mxu3 %v6503_v42  ;;  %v6518_v21 = vld [vmem:[#allocation69_spill] sm:$0xff] }
 0x24e   : > { %v1421_v32 = vadd.f32 %v1420_v41, %v1331_v22  ;;  %v6519_v22 = vld [vmem:[#allocation70_spill] sm:$0xff] }
 0x24f   : > { %2858 = vst [vmem:[#allocation2 + $0x330] sm:$0xff] %v2738_v7  ;;  %v825_v42 = vld [vmem:[%s4454_s12 + $0x9c8] sm:$0xff] }
 0x250   : > { %v1509_v13 = vpop.f32.mrf.mxu2  ;;  %1378 = vmatmul.f32.gmra.mxu0 %v6504_v52  ;;  %1467 = vmatmul.f32.gmra.mxu1 %v6505_v14  ;;  %v1598_v12 = vpop.f32.mrf.mxu3  ;;  %v6520_v14 = vld [vmem:[#allocation71_spill] sm:$0xff] }
 0x251   : > { %v1510_v2 = vadd.f32 %v1509_v13, %v1421_v32  ;;  %v585_v32 = vld [vmem:[%s4454_s12 + $0x248] sm:$0xff]  ;;  %2288 = vmatpush.msrb.mxu3 %v825_v42 }
 0x252   : > { %v665_v13 = vld [vmem:[%s4454_s12 + $0x4c8] sm:$0xff]  ;;  %2021 = vmatpush.msrb.mxu0 %v585_v32  ;;  %v5321_v32 = vld [vmem:[%s4446_s14 + $0x40] sm:$0xff] }
 0x253   : > { %v1599_v45 = vadd.f32 %v1598_v12, %v1510_v2  ;;  %v6521_v12 = vld [vmem:[#allocation72_spill] sm:$0xff]  ;;  %2110 = vmatpush.msrb.mxu1 %v665_v13  ;;  %2289 = vmatpush.msrb.mxu3 %v820_v26  ;;  %v5325_v13 = vld [vmem:[%s4446_s14 + $0x48] sm:$0xff] }
 0x254   : > { %v5339_v26 = vld [vmem:[%s4446_s14 + $0x60] sm:$0xff] }
 0x255   : > { %v2743_v18 = vadd.f32 %v1599_v45, %v843_v57  ;;  %1559 = vmatmul.f32.gmra.mxu2 %v6506_v25  ;;  %v1334_v46 = vpop.f32.mrf.mxu0  ;;  %v1423_v23 = vpop.f32.mrf.mxu1  ;;  %1648 = vmatmul.f32.gmra.mxu3 %v6507_v63  ;;  %v863_v57 = vld [vmem:[#allocation2 + $0x8] sm:$0xff] }
 0x256   : > { %v1424_v24 = vadd.f32 %v1423_v23, %v1334_v46  ;;  %v6522_v23 = vld [vmem:[#allocation73_spill] sm:$0xff] }
 0x257   : > { %2863 = vst [vmem:[#allocation2 + $0x98] sm:$0xff] %v2743_v18 }
 0x258   : > { %v1512_v30 = vpop.f32.mrf.mxu2  ;;  %1381 = vmatmul.f32.gmra.mxu0 %v6508_v47  ;;  %1470 = vmatmul.f32.gmra.mxu1 %v6509_v48  ;;  %v1601_v0 = vpop.f32.mrf.mxu3 }
 0x259   : > { %v1513_v50 = vadd.f32 %v1512_v30, %v1424_v24  ;;  %v740_v24 = vld [vmem:[%s4454_s12 + $0x720] sm:$0xff]  ;;  %v6524_v30 = vld [vmem:[#allocation75_spill] sm:$0xff] }
 0x25a   : > { %2200 = vmatpush.msrb.mxu2 %v740_v24 }
 0x25b   : > { %v1602_v37 = vadd.f32 %v1601_v0, %v1513_v50  ;;  %v660_v0 = vld [vmem:[%s4454_s12 + $0x4a0] sm:$0xff] }
 0x25c   : > { %v868_v50 = vld [vmem:[#allocation2] sm:$0xff]  ;;  %2111 = vmatpush.msrb.mxu1 %v660_v0 }
 0x25d   : > { %v2748_v28 = vadd.f32 %v1602_v37, %v848_v27  ;;  %1562 = vmatmul.f32.gmra.mxu2 %v6510_v38  ;;  %v1337_v53 = vpop.f32.mrf.mxu0  ;;  %v1426_v51 = vpop.f32.mrf.mxu1  ;;  %1651 = vmatmul.f32.gmra.mxu3 %v6511_v54 }
 0x25e   : > { %v1427_v5 = vadd.f32 %v1426_v51, %v1337_v53  ;;  %v5279_v51 = vld [vmem:[%s4446_s14 + $0x18] sm:$0xff] }
 0x25f   : > { %2868 = vst [vmem:[#allocation2 + $0x2e0] sm:$0xff] %v2748_v28  ;;  %v5275_v28 = vld [vmem:[%s4446_s14 + $0x10] sm:$0xff] }
 0x260   : > { %v1515_v44 = vpop.f32.mrf.mxu2  ;;  %1384 = vmatmul.f32.gmra.mxu0 %v6512_v55  ;;  %1473 = vmatmul.f32.gmra.mxu1 %v6513_v20  ;;  %v1604_v33 = vpop.f32.mrf.mxu3  ;;  %v735_v20 = vld [vmem:[%s4454_s12 + $0x6f8] sm:$0xff] }
 0x261   : > { %v1516_v56 = vadd.f32 %v1515_v44, %v1427_v5  ;;  %2201 = vmatpush.msrb.mxu2 %v735_v20  ;;  %v5359_v20 = vld [vmem:[%s4446_s14 + $0x80] sm:$0xff] }
 0x263   : > { %v1605_v10 = vadd.f32 %v1604_v33, %v1516_v56  ;;  %v873_v33 = vld [vmem:[#allocation2 + $0x90] sm:$0xff] }
 0x265   : > { %v2753_v60 = vadd.f32 %v1605_v10, %v853_v59  ;;  %1565 = vmatmul.f32.gmra.mxu2 %v6514_v1  ;;  %v1340_v35 = vpop.f32.mrf.mxu0  ;;  %v1429_v61 = vpop.f32.mrf.mxu1  ;;  %1654 = vmatmul.f32.gmra.mxu3 %v6515_v62  ;;  %v655_v62 = vld [vmem:[%s4454_s12 + $0x478] sm:$0xff] }
 0x266   : > { %v1430_v15 = vadd.f32 %v1429_v61, %v1340_v35  ;;  %v815_v35 = vld [vmem:[%s4454_s12 + $0x978] sm:$0xff]  ;;  %2112 = vmatpush.msrb.mxu1 %v655_v62 }
 0x267   : > { %2873 = vst [vmem:[#allocation2 + $0x1a8] sm:$0xff] %v2753_v60  ;;  %v5296_v60 = vld [vmem:[%s4446_s14 + $0x38] sm:$0xff]  ;;  %2290 = vmatpush.msrb.mxu3 %v815_v35  ;;  %v5367_v35 = vld [vmem:[%s4446_s14 + $0xb0] sm:$0xff] }
 0x268   : > { %v1518_v31 = vpop.f32.mrf.mxu2  ;;  %1387 = vmatmul.f32.gmra.mxu0 %v6516_v36  ;;  %1476 = vmatmul.f32.gmra.mxu1 %v6517_v16  ;;  %v1607_v19 = vpop.f32.mrf.mxu3  ;;  %v575_v61 = vld [vmem:[%s4454_s12 + $0x1f8] sm:$0xff]  ;;  %v5307_v36 = vld [vmem:[%s4446_s14 + $0x28] sm:$0xff] }
 0x269   : > { %v1519_v3 = vadd.f32 %v1518_v31, %v1430_v15  ;;  %v5303_v31 = vld [vmem:[%s4446_s14 + $0x20] sm:$0xff] }
 0x26b   : > { %v1608_v58 = vadd.f32 %v1607_v19, %v1519_v3  ;;  %v878_v3 = vld [vmem:[#allocation2 + $0x1d8] sm:$0xff] }
 0x26d   : > { %v2758_v40 = vadd.f32 %v1608_v58, %v858_v4  ;;  %1568 = vmatmul.f32.gmra.mxu2 %v6518_v21  ;;  %v1343_v7 = vpop.f32.mrf.mxu0  ;;  %v1432_v8 = vpop.f32.mrf.mxu1  ;;  %1657 = vmatmul.f32.gmra.mxu3 %v6519_v22  ;;  %v5311_v58 = vld [vmem:[%s4446_s14 + $0x50] sm:$0xff] }
 0x26e   : > { %v1433_v41 = vadd.f32 %v1432_v8, %v1343_v7  ;;  %v5315_v7 = vld [vmem:[%s4446_s14 + $0x58] sm:$0xff]  ;;  %v730_v22 = vld [vmem:[%s4454_s12 + $0x6d0] sm:$0xff] }
 0x26f   : > { %2878 = vst [vmem:[#allocation2 + $0x360] sm:$0xff] %v2758_v40  ;;  %2202 = vmatpush.msrb.mxu2 %v730_v22  ;;  %v560_v22 = vld [vmem:[%s4454_s12 + $0x180] sm:$0xff] }
 0x270   : > { %v1521_v52 = vpop.f32.mrf.mxu2  ;;  %1390 = vmatmul.f32.gmra.mxu0 %v6520_v14  ;;  %1479 = vmatmul.f32.gmra.mxu1 %v6521_v12  ;;  %v1610_v2 = vpop.f32.mrf.mxu3  ;;  %v570_v12 = vld [vmem:[%s4454_s12 + $0x1d0] sm:$0xff] }
 0x271   : > { %v1522_v17 = vadd.f32 %v1521_v52, %v1433_v41  ;;  %v810_v41 = vld [vmem:[%s4454_s12 + $0x950] sm:$0xff] }
 0x272   : > { %2291 = vmatpush.msrb.mxu3 %v810_v41  ;;  %v640_v41 = vld [vmem:[%s4454_s12 + $0x400] sm:$0xff] }
 0x273   : > { %v1611_v45 = vadd.f32 %v1610_v2, %v1522_v17  ;;  %v650_v2 = vld [vmem:[%s4454_s12 + $0x450] sm:$0xff]  ;;  %v883_v17 = vld [vmem:[#allocation2 + $0x238] sm:$0xff] }
 0x274   : > { %2113 = vmatpush.msrb.mxu1 %v650_v2 }
 0x275   : > { %v2763_v18 = vadd.f32 %v1611_v45, %v863_v57  ;;  %1571 = vmatmul.f32.gmra.mxu2 %v5095_v9  ;;  %v1346_v25 = vpop.f32.mrf.mxu0  ;;  %v1435_v46 = vpop.f32.mrf.mxu1  ;;  %1660 = vmatmul.f32.gmra.mxu3 %v6522_v23  ;;  %v580_v9 = vld [vmem:[%s4454_s12 + $0x220] sm:$0xff]  ;;  %v5335_v23 = vld [vmem:[%s4446_s14 + $0x78] sm:$0xff] }
 0x276   : > { %v1436_v63 = vadd.f32 %v1435_v46, %v1346_v25  ;;  %2022 = vmatpush.msrb.mxu0 %v580_v9 }
 0x277   : > { %2883 = vst [vmem:[#allocation2 + $0x8] sm:$0xff] %v2763_v18  ;;  %v5331_v18 = vld [vmem:[%s4446_s14 + $0x70] sm:$0xff] }
 0x278   : > { %v1524_v49 = vpop.f32.mrf.mxu2  ;;  %1393 = vmatmul.f32.gmra.mxu0 %v6523_v29  ;;  %1482 = vmatmul.f32.gmra.mxu1 %v6524_v30  ;;  %v1613_v47 = vpop.f32.mrf.mxu3 }
 0x279   : > { %v1525_v48 = vadd.f32 %v1524_v49, %v1436_v63  ;;  %2023 = vmatpush.msrb.mxu0 %v575_v61  ;;  %v5343_v49 = vld [vmem:[%s4446_s14 + $0x68] sm:$0xff] }
 0x27b   : > { %v1614_v27 = vadd.f32 %v1613_v47, %v1525_v48  ;;  %2024 = vmatpush.msrb.mxu0 %v570_v12  ;;  %v725_v47 = vld [vmem:[%s4454_s12 + $0x6a8] sm:$0xff]  ;;  %v5387_v12 = vld [vmem:[%s4446_s14 + $0xd0] sm:$0xff] }
 0x27c   : > { %v888_v48 = vld [vmem:[#allocation2 + $0xe8] sm:$0xff]  ;;  %2203 = vmatpush.msrb.mxu2 %v725_v47 }
 0x27d   : > { %v2768_v37 = vadd.f32 %v1614_v27, %v868_v50  ;;  %1858 = vmatmul.f32.vlgmr.msra.gmra.mxu2 %v5275_v28  ;;  %v1349_v38 = vpop.f32.mrf.mxu0  ;;  %v1438_v53 = vpop.f32.mrf.mxu1  ;;  %1947 = vmatmul.f32.vlgmr.msra.gmra.mxu3 %v5279_v51  ;;  %v5348_v50 = vld [vmem:[%s4446_s14 + $0x90] sm:$0xff]  ;;  %v903_v47 = vld [vmem:[#allocation2 + $0x3a8] sm:$0xff] }
 0x27e   : > { %v1439_v54 = vadd.f32 %v1438_v53, %v1349_v38  ;;  %v5352_v38 = vld [vmem:[%s4446_s14 + $0x98] sm:$0xff] }
 0x27f   : > { %2888 = vst [vmem:[#allocation2] sm:$0xff] %v2768_v37 }
 0x280   : > { %v1527_v5 = vpop.f32.mrf.mxu2  ;;  %1680 = vmatmul.f32.vlgmr.msra.gmra.mxu0 %v5283_v11  ;;  %1769 = vmatmul.f32.vlgmr.msra.gmra.mxu1 %v5287_v43  ;;  %v1616_v44 = vpop.f32.mrf.mxu3 }
 0x281   : > { %v1528_v55 = vadd.f32 %v1527_v5, %v1439_v54  ;;  %v805_v54 = vld [vmem:[%s4454_s12 + $0x928] sm:$0xff] }
 0x282   : > { %v565_v5 = vld [vmem:[%s4454_s12 + $0x1a8] sm:$0xff]  ;;  %2292 = vmatpush.msrb.mxu3 %v805_v54 }
 0x283   : > { %v1617_v56 = vadd.f32 %v1616_v44, %v1528_v55  ;;  %v645_v44 = vld [vmem:[%s4454_s12 + $0x428] sm:$0xff]  ;;  %2025 = vmatpush.msrb.mxu0 %v565_v5  ;;  %v795_v5 = vld [vmem:[%s4454_s12 + $0x8d8] sm:$0xff] }
 0x284   : > { %2114 = vmatpush.msrb.mxu1 %v645_v44  ;;  %v555_v44 = vld [vmem:[%s4454_s12 + $0x158] sm:$0xff] }
 0x285   : > { %v2773_v6 = vadd.f32 %v1617_v56, %v873_v33  ;;  %1861 = vmatmul.f32.gmra.mxu2 %v5292_v34  ;;  %v1352_v59 = vpop.f32.mrf.mxu0  ;;  %v1441_v10 = vpop.f32.mrf.mxu1  ;;  %1950 = vmatmul.f32.gmra.mxu3 %v5296_v60  ;;  %v5363_v33 = vld [vmem:[%s4446_s14 + $0x88] sm:$0xff] }
 0x286   : > { %v1442_v1 = vadd.f32 %v1441_v10, %v1352_v59  ;;  %v893_v59 = vld [vmem:[#allocation2 + $0x1f0] sm:$0xff]  ;;  %2026 = vmatpush.msrb.mxu0 %v560_v22  ;;  %2115 = vmatpush.msrb.mxu1 %v640_v41 }
 0x287   : > { %2893 = vst [vmem:[#allocation2 + $0x90] sm:$0xff] %v2773_v6  ;;  %v710_v22 = vld [vmem:[%s4454_s12 + $0x630] sm:$0xff] }
 0x288   : > { %v1530_v15 = vpop.f32.mrf.mxu2  ;;  %1683 = vmatmul.f32.gmra.mxu0 %v5303_v31  ;;  %1772 = vmatmul.f32.gmra.mxu1 %v5307_v36  ;;  %v1619_v16 = vpop.f32.mrf.mxu3  ;;  %v790_v41 = vld [vmem:[%s4454_s12 + $0x8b0] sm:$0xff] }
 0x289   : > { %v1531_v19 = vadd.f32 %v1530_v15, %v1442_v1  ;;  %v5371_v15 = vld [vmem:[%s4446_s14 + $0xb8] sm:$0xff]  ;;  %2027 = vmatpush.msrb.mxu0 %v555_v44  ;;  %v5455_v44 = vld [vmem:[%s4446_s14 + $0x128] sm:$0xff] }
 0x28b   : > { %v1620_v39 = vadd.f32 %v1619_v16, %v1531_v19  ;;  %v720_v19 = vld [vmem:[%s4454_s12 + $0x680] sm:$0xff] }
 0x28c   : > { %2204 = vmatpush.msrb.mxu2 %v720_v19  ;;  %v5423_v19 = vld [vmem:[%s4446_s14 + $0x110] sm:$0xff] }
 0x28d   : > { %v2778_v4 = vadd.f32 %v1620_v39, %v878_v3  ;;  %1864 = vmatmul.f32.gmra.mxu2 %v5311_v58  ;;  %v1355_v40 = vpop.f32.mrf.mxu0  ;;  %v1444_v21 = vpop.f32.mrf.mxu1  ;;  %1953 = vmatmul.f32.gmra.mxu3 %v5315_v7  ;;  %v800_v3 = vld [vmem:[%s4454_s12 + $0x900] sm:$0xff] }
 0x28e   : > { %v1445_v8 = vadd.f32 %v1444_v21, %v1355_v40  ;;  %v5381_v40 = vld [vmem:[%s4446_s14 + $0xa8] sm:$0xff]  ;;  %2293 = vmatpush.msrb.mxu3 %v800_v3 }
 0x28f   : > { %2898 = vst [vmem:[#allocation2 + $0x1d8] sm:$0xff] %v2778_v4  ;;  %v5377_v4 = vld [vmem:[%s4446_s14 + $0xa0] sm:$0xff] }
 0x290   : > { %v1533_v42 = vpop.f32.mrf.mxu2  ;;  %1686 = vmatmul.f32.gmra.mxu0 %v5321_v32  ;;  %1775 = vmatmul.f32.gmra.mxu1 %v5325_v13  ;;  %v1622_v52 = vpop.f32.mrf.mxu3 }
 0x291   : > { %v1534_v14 = vadd.f32 %v1533_v42, %v1445_v8  ;;  %v898_v42 = vld [vmem:[#allocation2 + $0x228] sm:$0xff]  ;;  %2294 = vmatpush.msrb.mxu3 %v795_v5  ;;  %v5451_v5 = vld [vmem:[%s4446_s14 + $0x120] sm:$0xff] }
 0x293   : > { %v1623_v57 = vadd.f32 %v1622_v52, %v1534_v14  ;;  %2295 = vmatpush.msrb.mxu3 %v790_v41  ;;  %v785_v41 = vld [vmem:[%s4454_s12 + $0x888] sm:$0xff] }
 0x295   : > { %v2783_v45 = vadd.f32 %v1623_v57, %v883_v17  ;;  %1867 = vmatmul.f32.gmra.mxu2 %v5331_v18  ;;  %v1358_v25 = vpop.f32.mrf.mxu0  ;;  %v1447_v46 = vpop.f32.mrf.mxu1  ;;  %1956 = vmatmul.f32.gmra.mxu3 %v5335_v23  ;;  %v5391_v57 = vld [vmem:[%s4446_s14 + $0xd8] sm:$0xff] }
 0x296   : > { %v1448_v63 = vadd.f32 %v1447_v46, %v1358_v25  ;;  %v5395_v46 = vld [vmem:[%s4446_s14 + $0xc0] sm:$0xff]  ;;  %2296 = vmatpush.msrb.mxu3 %v785_v41 }
 0x297   : > { %2903 = vst [vmem:[#allocation2 + $0x238] sm:$0xff] %v2783_v45 }
 0x298   : > { %v1536_v24 = vpop.f32.mrf.mxu2  ;;  %1689 = vmatmul.f32.gmra.mxu0 %v5339_v26  ;;  %1778 = vmatmul.f32.gmra.mxu1 %v5343_v49  ;;  %v1625_v29 = vpop.f32.mrf.mxu3 }
 0x299   : > { %v1537_v30 = vadd.f32 %v1536_v24, %v1448_v63  ;;  %v5399_v63 = vld [vmem:[%s4446_s14 + $0xc8] sm:$0xff] }
 0x29b   : > { %v1626_v9 = vadd.f32 %v1625_v29, %v1537_v30  ;;  %v715_v30 = vld [vmem:[%s4454_s12 + $0x658] sm:$0xff] }
 0x29c   : > { %2205 = vmatpush.msrb.mxu2 %v715_v30 }
 0x29d   : > { %v2788_v0 = vadd.f32 %v1626_v9, %v888_v48  ;;  %1870 = vmatmul.f32.gmra.mxu2 %v5348_v50  ;;  %v1361_v27 = vpop.f32.mrf.mxu0  ;;  %v1450_v37 = vpop.f32.mrf.mxu1  ;;  %1959 = vmatmul.f32.gmra.mxu3 %v5352_v38 }
 0x29e   : > { %v1451_v53 = vadd.f32 %v1450_v37, %v1361_v27  ;;  %2206 = vmatpush.msrb.mxu2 %v710_v22 }
 0x29f   : > { %2908 = vst [vmem:[#allocation2 + $0xe8] sm:$0xff] %v2788_v0  ;;  %v5404_v0 = vld [vmem:[%s4446_s14 + $0xf0] sm:$0xff] }
 0x2a0   : > { %v1539_v55 = vpop.f32.mrf.mxu2  ;;  %1692 = vmatmul.f32.gmra.mxu0 %v5359_v20  ;;  %1781 = vmatmul.f32.gmra.mxu1 %v5363_v33  ;;  %v1628_v56 = vpop.f32.mrf.mxu3 }
 0x2a1   : > { %v1540_v6 = vadd.f32 %v1539_v55, %v1451_v53  ;;  %v5408_v53 = vld [vmem:[%s4446_s14 + $0xf8] sm:$0xff] }
 0x2a2   : > { %v635_v55 = vld [vmem:[%s4454_s12 + $0x3d8] sm:$0xff] }
 0x2a3   : > { %v1629_v10 = vadd.f32 %v1628_v56, %v1540_v6  ;;  %v5415_v6 = vld [vmem:[%s4446_s14 + $0xe0] sm:$0xff]  ;;  %2116 = vmatpush.msrb.mxu1 %v635_v55 }
 0x2a5   : > { %v2793_v1 = vadd.f32 %v1629_v10, %v893_v59  ;;  %1873 = vmatmul.f32.gmra.mxu2 %v5367_v35  ;;  %v1364_v61 = vpop.f32.mrf.mxu0  ;;  %v1453_v62 = vpop.f32.mrf.mxu1  ;;  %1962 = vmatmul.f32.gmra.mxu3 %v5371_v15  ;;  %v5419_v59 = vld [vmem:[%s4446_s14 + $0xe8] sm:$0xff] }
 0x2a6   : > { %v1454_v16 = vadd.f32 %v1453_v62, %v1364_v61  ;;  %v908_v61 = vld [vmem:[#allocation2 + $0x2b8] sm:$0xff] }
 0x2a7   : > { %2913 = vst [vmem:[#allocation2 + $0x1f0] sm:$0xff] %v2793_v1 }
 0x2a8   : > { %v1542_v39 = vpop.f32.mrf.mxu2  ;;  %1695 = vmatmul.f32.gmra.mxu0 %v5377_v4  ;;  %1784 = vmatmul.f32.gmra.mxu1 %v5381_v40  ;;  %v1631_v21 = vpop.f32.mrf.mxu3 }
 0x2a9   : > { %v1543_v8 = vadd.f32 %v1542_v39, %v1454_v16 }
 0x2ab   : > { %v1632_v52 = vadd.f32 %v1631_v21, %v1543_v8  ;;  %v5427_v21 = vld [vmem:[%s4446_s14 + $0x118] sm:$0xff] }
 0x2ad   : > { %v2798_v14 = vadd.f32 %v1632_v52, %v898_v42  ;;  %1876 = vmatmul.f32.gmra.mxu2 %v5387_v12  ;;  %v1367_v2 = vpop.f32.mrf.mxu0  ;;  %v1456_v17 = vpop.f32.mrf.mxu1  ;;  %1965 = vmatmul.f32.gmra.mxu3 %v5391_v57  ;;  %v5433_v52 = vld [vmem:[%s4446_s14 + $0x100] sm:$0xff] }
 0x2ae   : > { %v1457_v45 = vadd.f32 %v1456_v17, %v1367_v2 }
 0x2af   : > { %2918 = vst [vmem:[#allocation2 + $0x228] sm:$0xff] %v2798_v14  ;;  %v5437_v14 = vld [vmem:[%s4446_s14 + $0x108] sm:$0xff] }
 0x2b0   : > { %v1545_v25 = vpop.f32.mrf.mxu2  ;;  %1698 = vmatmul.f32.gmra.mxu0 %v5395_v46  ;;  %1787 = vmatmul.f32.gmra.mxu1 %v5399_v63  ;;  %v1634_v24 = vpop.f32.mrf.mxu3 }
 0x2b1   : > { %v1546_v29 = vadd.f32 %v1545_v25, %v1457_v45  ;;  %v550_v45 = vld [vmem:[%s4454_s12 + $0x130] sm:$0xff] }
 0x2b2   : > { %v630_v25 = vld [vmem:[%s4454_s12 + $0x3b0] sm:$0xff]  ;;  %2028 = vmatpush.msrb.mxu0 %v550_v45  ;;  %v5471_v45 = vld [vmem:[%s4446_s14 + $0x140] sm:$0xff] }
 0x2b3   : > { %v1635_v48 = vadd.f32 %v1634_v24, %v1546_v29  ;;  %v913_v24 = vld [vmem:[#allocation2 + $0x350] sm:$0xff]  ;;  %2117 = vmatpush.msrb.mxu1 %v630_v25  ;;  %v5475_v25 = vld [vmem:[%s4446_s14 + $0x148] sm:$0xff] }
 0x2b5   : > { %v2803_v9 = vadd.f32 %v1635_v48, %v903_v47  ;;  %1879 = vmatmul.f32.gmra.mxu2 %v5404_v0  ;;  %v1370_v27 = vpop.f32.mrf.mxu0  ;;  %v1459_v37 = vpop.f32.mrf.mxu1  ;;  %1968 = vmatmul.f32.gmra.mxu3 %v5408_v53  ;;  %v5443_v47 = vld [vmem:[%s4446_s14 + $0x130] sm:$0xff] }
 0x2b6   : > { %v1460_v54 = vadd.f32 %v1459_v37, %v1370_v27  ;;  %v5447_v27 = vld [vmem:[%s4446_s14 + $0x138] sm:$0xff] }
 0x2b7   : > { %2923 = vst [vmem:[#allocation2 + $0x3a8] sm:$0xff] %v2803_v9 }
 0x2b8   : > { %v1548_v56 = vpop.f32.mrf.mxu2  ;;  %1701 = vmatmul.f32.gmra.mxu0 %v5415_v6  ;;  %1790 = vmatmul.f32.gmra.mxu1 %v5419_v59  ;;  %v1637_v10 = vpop.f32.mrf.mxu3 }
 0x2b9   : > { %v1549_v1 = vadd.f32 %v1548_v56, %v1460_v54 }
 0x2bb   : > { %v1638_v62 = vadd.f32 %v1637_v10, %v1549_v1  ;;  %v705_v10 = vld [vmem:[%s4454_s12 + $0x608] sm:$0xff] }
 0x2bc   : > { %v918_v1 = vld [vmem:[#allocation2 + $0x88] sm:$0xff]  ;;  %2207 = vmatpush.msrb.mxu2 %v705_v10 }
 0x2bd   : > { %v2808_v16 = vadd.f32 %v1638_v62, %v908_v61  ;;  %1882 = vmatmul.f32.gmra.mxu2 %v5423_v19  ;;  %v1373_v3 = vpop.f32.mrf.mxu0  ;;  %v1462_v39 = vpop.f32.mrf.mxu1  ;;  %1971 = vmatmul.f32.gmra.mxu3 %v5427_v21 }
 0x2be   : > { %v1463_v8 = vadd.f32 %v1462_v39, %v1373_v3 }
 0x2bf   : > { %2928 = vst [vmem:[#allocation2 + $0x2b8] sm:$0xff] %v2808_v16  ;;  %v5460_v16 = vld [vmem:[%s4446_s14 + $0x150] sm:$0xff] }
 0x2c0   : > { %v1551_v42 = vpop.f32.mrf.mxu2  ;;  %1704 = vmatmul.f32.gmra.mxu0 %v5433_v52  ;;  %1793 = vmatmul.f32.gmra.mxu1 %v5437_v14  ;;  %v1640_v2 = vpop.f32.mrf.mxu3 }
 0x2c1   : > { %v1552_v17 = vadd.f32 %v1551_v42, %v1463_v8  ;;  %v5464_v8 = vld [vmem:[%s4446_s14 + $0x158] sm:$0xff]  ;;  %v545_v42 = vld [vmem:[%s4454_s12 + $0x108] sm:$0xff] }
 0x2c2   : > { %2029 = vmatpush.msrb.mxu0 %v545_v42  ;;  %v540_v42 = vld [vmem:[%s4454_s12 + $0xe0] sm:$0xff] }
 0x2c3   : > { %v1641_v29 = vadd.f32 %v1640_v2, %v1552_v17  ;;  %v625_v2 = vld [vmem:[%s4454_s12 + $0x388] sm:$0xff] }
 0x2c4   : > { %2118 = vmatpush.msrb.mxu1 %v625_v2  ;;  %v620_v2 = vld [vmem:[%s4454_s12 + $0x360] sm:$0xff]  ;;  %2030 = vmatpush.msrb.mxu0 %v540_v42 }
 0x2c5   : > { %v2813_v30 = vadd.f32 %v1641_v29, %v913_v24  ;;  %1885 = vmatmul.f32.gmra.mxu2 %v5443_v47  ;;  %v1376_v48 = vpop.f32.mrf.mxu0  ;;  %v1465_v9 = vpop.f32.mrf.mxu1  ;;  %1974 = vmatmul.f32.gmra.mxu3 %v5447_v27  ;;  %v933_v42 = vld [vmem:[#allocation2 + $0x100] sm:$0xff] }
 0x2c6   : > { %v1466_v37 = vadd.f32 %v1465_v9, %v1376_v48  ;;  %2119 = vmatpush.msrb.mxu1 %v620_v2 }
 0x2c7   : > { %2933 = vst [vmem:[#allocation2 + $0x350] sm:$0xff] %v2813_v30  ;;  %v923_v30 = vld [vmem:[#allocation2 + $0xd0] sm:$0xff] }
 0x2c8   : > { %v1554_v54 = vpop.f32.mrf.mxu2  ;;  %1707 = vmatmul.f32.gmra.mxu0 %v5451_v5  ;;  %1796 = vmatmul.f32.gmra.mxu1 %v5455_v44  ;;  %v1643_v55 = vpop.f32.mrf.mxu3 }
 0x2c9   : > { %v1555_v56 = vadd.f32 %v1554_v54, %v1466_v37  ;;  %v5479_v37 = vld [vmem:[%s4446_s14 + $0x170] sm:$0xff] }
 0x2cb   : > { %v1644_v61 = vadd.f32 %v1643_v55, %v1555_v56  ;;  %v5483_v56 = vld [vmem:[%s4446_s14 + $0x178] sm:$0xff] }
 0x2cd   : > { %v2818_v62 = vadd.f32 %v1644_v61, %v918_v1  ;;  %1888 = vmatmul.f32.gmra.mxu2 %v5460_v16  ;;  %v1379_v3 = vpop.f32.mrf.mxu0  ;;  %v1468_v39 = vpop.f32.mrf.mxu1  ;;  %1977 = vmatmul.f32.gmra.mxu3 %v5464_v8  ;;  %v700_v1 = vld [vmem:[%s4454_s12 + $0x5e0] sm:$0xff] }
 0x2ce   : > { %v1469_v22 = vadd.f32 %v1468_v39, %v1379_v3  ;;  %v780_v61 = vld [vmem:[%s4454_s12 + $0x860] sm:$0xff]  ;;  %v5493_v39 = vld [vmem:[%s4446_s14 + $0x168] sm:$0xff]  ;;  %2208 = vmatpush.msrb.mxu2 %v700_v1 }
 0x2cf   : > { %2938 = vst [vmem:[#allocation2 + $0x88] sm:$0xff] %v2818_v62  ;;  %v5489_v3 = vld [vmem:[%s4446_s14 + $0x160] sm:$0xff]  ;;  %2297 = vmatpush.msrb.mxu3 %v780_v61  ;;  %v5511_v61 = vld [vmem:[%s4446_s14 + $0x188] sm:$0xff] }
 0x2d0   : > { %v1557_v17 = vpop.f32.mrf.mxu2  ;;  %1710 = vmatmul.f32.gmra.mxu0 %v5471_v45  ;;  %1799 = vmatmul.f32.gmra.mxu1 %v5475_v25  ;;  %v1646_v24 = vpop.f32.mrf.mxu3  ;;  %v5507_v1 = vld [vmem:[%s4446_s14 + $0x180] sm:$0xff]  ;;  %6527 = vst [vmem:[#allocation31_spill] sm:$0xff] %v5511_v61 }
 0x2d1   : > { %v1558_v29 = vadd.f32 %v1557_v17, %v1469_v22  ;;  %v928_v17 = vld [vmem:[#allocation2 + $0x2a0] sm:$0xff]  ;;  %6526 = vst [vmem:[#allocation30_spill] sm:$0xff] %v5507_v1 }
 0x2d3   : > { %v1647_v48 = vadd.f32 %v1646_v24, %v1558_v29 }
 0x2d5   : > { %v2823_v9 = vadd.f32 %v1647_v48, %v923_v30  ;;  %1891 = vmatmul.f32.gmra.mxu2 %v5479_v37  ;;  %v1382_v54 = vpop.f32.mrf.mxu0  ;;  %v1471_v55 = vpop.f32.mrf.mxu1  ;;  %1980 = vmatmul.f32.gmra.mxu3 %v5483_v56  ;;  %v5499_v30 = vld [vmem:[%s4446_s14 + $0x190] sm:$0xff] }
 0x2d6   : > { %v1472_v10 = vadd.f32 %v1471_v55, %v1382_v54  ;;  %v5503_v54 = vld [vmem:[%s4446_s14 + $0x198] sm:$0xff] }
 0x2d7   : > { %2943 = vst [vmem:[#allocation2 + $0xd0] sm:$0xff] %v2823_v9 }
 0x2d8   : > { %v1560_v62 = vpop.f32.mrf.mxu2  ;;  %1713 = vmatmul.f32.gmra.mxu0 %v5489_v3  ;;  %1802 = vmatmul.f32.gmra.mxu1 %v5493_v39  ;;  %v1649_v22 = vpop.f32.mrf.mxu3  ;;  %6525 = vst [vmem:[#allocation29_spill] sm:$0xff] %v5503_v54 }
 0x2d9   : > { %v1561_v41 = vadd.f32 %v1560_v62, %v1472_v10 }
 0x2db   : > { %v1650_v24 = vadd.f32 %v1649_v22, %v1561_v41  ;;  %v695_v41 = vld [vmem:[%s4454_s12 + $0x5b8] sm:$0xff] }
 0x2dc   : > { %2209 = vmatpush.msrb.mxu2 %v695_v41 }
 0x2dd   : > { %v2828_v29 = vadd.f32 %v1650_v24, %v928_v17  ;;  %1894 = vmatmul.f32.gmra.mxu2 %v5499_v30  ;;  %v1385_v48 = vpop.f32.mrf.mxu0  ;;  %v1474_v9 = vpop.f32.mrf.mxu1  ;;  %1983 = vmatmul.f32.gmra.mxu3 %v5503_v54  ;;  %v5516_v24 = vld [vmem:[%s4446_s14 + $0x1b0] sm:$0xff]  ;;  %v5559_v54 = vld [vmem:[%s4446_s14 + $0x1f8] sm:$0xff] }
 0x2de   : > { %v1475_v55 = vadd.f32 %v1474_v9, %v1385_v48  ;;  %6528 = vst [vmem:[#allocation32_spill] sm:$0xff] %v5516_v24  ;;  %v5520_v9 = vld [vmem:[%s4446_s14 + $0x1b8] sm:$0xff] }
 0x2df   : > { %2948 = vst [vmem:[#allocation2 + $0x2a0] sm:$0xff] %v2828_v29 }
 0x2e0   : > { %v1563_v10 = vpop.f32.mrf.mxu2  ;;  %1716 = vmatmul.f32.gmra.mxu0 %v5507_v1  ;;  %1805 = vmatmul.f32.gmra.mxu1 %v5511_v61  ;;  %v1652_v62 = vpop.f32.mrf.mxu3  ;;  %6529 = vst [vmem:[#allocation33_spill] sm:$0xff] %v5520_v9  ;;  %v615_v1 = vld [vmem:[%s4454_s12 + $0x338] sm:$0xff] }
 0x2e1   : > { %v1564_v22 = vadd.f32 %v1563_v10, %v1475_v55  ;;  %v775_v55 = vld [vmem:[%s4454_s12 + $0x838] sm:$0xff]  ;;  %2120 = vmatpush.msrb.mxu1 %v615_v1  ;;  %6537 = vst [vmem:[#allocation41_spill] sm:$0xff] %v5559_v54 }
 0x2e2   : > { %v535_v10 = vld [vmem:[%s4454_s12 + $0xb8] sm:$0xff]  ;;  %2298 = vmatpush.msrb.mxu3 %v775_v55  ;;  %v690_v55 = vld [vmem:[%s4454_s12 + $0x590] sm:$0xff] }
 0x2e3   : > { %v1653_v2 = vadd.f32 %v1652_v62, %v1564_v22  ;;  %v5527_v62 = vld [vmem:[%s4446_s14 + $0x1a0] sm:$0xff]  ;;  %v5531_v22 = vld [vmem:[%s4446_s14 + $0x1a8] sm:$0xff]  ;;  %2031 = vmatpush.msrb.mxu0 %v535_v10  ;;  %v770_v10 = vld [vmem:[%s4454_s12 + $0x810] sm:$0xff]  ;;  %2210 = vmatpush.msrb.mxu2 %v690_v55 }
 0x2e4   : > { %6530 = vst [vmem:[#allocation34_spill] sm:$0xff] %v5527_v62  ;;  %2299 = vmatpush.msrb.mxu3 %v770_v10  ;;  %v5563_v10 = vld [vmem:[%s4446_s14 + $0x1e0] sm:$0xff] }
 0x2e5   : > { %v2833_v17 = vadd.f32 %v1653_v2, %v933_v42  ;;  %1897 = vmatmul.f32.gmra.mxu2 %v5516_v24  ;;  %v1388_v29 = vpop.f32.mrf.mxu0  ;;  %v1477_v48 = vpop.f32.mrf.mxu1  ;;  %1986 = vmatmul.f32.gmra.mxu3 %v5520_v9  ;;  %6531 = vst [vmem:[#allocation35_spill] sm:$0xff] %v5531_v22  ;;  %v5535_v9 = vld [vmem:[%s4446_s14 + $0x1d0] sm:$0xff] }
 0x2e6   : > { %v1478_v61 = vadd.f32 %v1477_v48, %v1388_v29  ;;  %6532 = vst [vmem:[#allocation36_spill] sm:$0xff] %v5535_v9 }
 0x2e7   : > { %2953 = vst [vmem:[#allocation2 + $0x100] sm:$0xff] %v2833_v17  ;;  %v938_v17 = vld [vmem:[#allocation2 + $0x1f8] sm:$0xff] }
 0x2e8   : > { %v1566_v41 = vpop.f32.mrf.mxu2  ;;  %1719 = vmatmul.f32.gmra.mxu0 %v5527_v62  ;;  %1808 = vmatmul.f32.gmra.mxu1 %v5531_v22  ;;  %v1655_v42 = vpop.f32.mrf.mxu3  ;;  %v5539_v22 = vld [vmem:[%s4446_s14 + $0x1d8] sm:$0xff]  ;;  %6538 = vst [vmem:[#allocation42_spill] sm:$0xff] %v5563_v10 }
 0x2e9   : > { %v1567_v2 = vadd.f32 %v1566_v41, %v1478_v61  ;;  %6533 = vst [vmem:[#allocation37_spill] sm:$0xff] %v5539_v22  ;;  %v5545_v41 = vld [vmem:[%s4446_s14 + $0x1c0] sm:$0xff] }
 0x2ea   : > { %6534 = vst [vmem:[#allocation38_spill] sm:$0xff] %v5545_v41 }
 0x2eb   : > { %v1656_v29 = vadd.f32 %v1655_v42, %v1567_v2  ;;  %v5549_v42 = vld [vmem:[%s4446_s14 + $0x1c8] sm:$0xff] }
 0x2ec   : > { %6535 = vst [vmem:[#allocation39_spill] sm:$0xff] %v5549_v42 }
 0x2ed   : > { %v2838_v48 = vadd.f32 %v1656_v29, %v938_v17  ;;  %1900 = vmatmul.f32.gmra.mxu2 %v5535_v9  ;;  %v1391_v62 = vpop.f32.mrf.mxu0  ;;  %v1480_v24 = vpop.f32.mrf.mxu1  ;;  %1989 = vmatmul.f32.gmra.mxu3 %v5539_v22  ;;  %v530_v29 = vld [vmem:[%s4454_s12 + $0x90] sm:$0xff] }
 0x2ee   : > { %v1481_v61 = vadd.f32 %v1480_v24, %v1391_v62  ;;  %v610_v24 = vld [vmem:[%s4454_s12 + $0x310] sm:$0xff]  ;;  %v943_v62 = vld [vmem:[#allocation2 + $0x3b8] sm:$0xff]  ;;  %2032 = vmatpush.msrb.mxu0 %v530_v29  ;;  %v685_v29 = vld [vmem:[%s4454_s12 + $0x568] sm:$0xff] }
 0x2ef   : > { %2958 = vst [vmem:[#allocation2 + $0x1f8] sm:$0xff] %v2838_v48  ;;  %2121 = vmatpush.msrb.mxu1 %v610_v24  ;;  %v948_v24 = vld [vmem:[#allocation2 + $0x2d8] sm:$0xff]  ;;  %2211 = vmatpush.msrb.mxu2 %v685_v29 }
 0x2f0   : > { %v1569_v1 = vpop.f32.mrf.mxu2  ;;  %1722 = vmatmul.f32.gmra.mxu0 %v5545_v41  ;;  %1811 = vmatmul.f32.gmra.mxu1 %v5549_v42  ;;  %v1658_v2 = vpop.f32.mrf.mxu3  ;;  %v5555_v41 = vld [vmem:[%s4446_s14 + $0x1f0] sm:$0xff] }
 0x2f1   : > { %v1570_v17 = vadd.f32 %v1569_v1, %v1481_v61  ;;  %6536 = vst [vmem:[#allocation40_spill] sm:$0xff] %v5555_v41  ;;  %v5567_v1 = vld [vmem:[%s4446_s14 + $0x1e8] sm:$0xff] }
 0x2f2   : > { %6539 = vst [vmem:[#allocation43_spill] sm:$0xff] %v5567_v1 }
 0x2f3   : > { %v1659_v48 = vadd.f32 %v1658_v2, %v1570_v17 }
 0x2f5   : > { %v2843_v22 = vadd.f32 %v1659_v48, %v943_v62  ;;  %1903 = vmatmul.f32.gmra.mxu2 %v5555_v41  ;;  %v1394_v42 = vpop.f32.mrf.mxu0  ;;  %v1483_v9 = vpop.f32.mrf.mxu1  ;;  %1992 = vmatmul.f32.gmra.mxu3 %v5559_v54  ;;  %v605_v54 = vld [vmem:[%s4454_s12 + $0x2e8] sm:$0xff]  ;;  %v5615_v41 = vld [vmem:[%s4446_s14 + $0x258] sm:$0xff] }
 0x2f6   : > { %v1484_v61 = vadd.f32 %v1483_v9, %v1394_v42  ;;  %v5572_v42 = vld [vmem:[%s4446_s14 + $0x210] sm:$0xff]  ;;  %2122 = vmatpush.msrb.mxu1 %v605_v54  ;;  %6549 = vst [vmem:[#allocation53_spill] sm:$0xff] %v5615_v41 }
 0x2f7   : > { %2963 = vst [vmem:[#allocation2 + $0x3b8] sm:$0xff] %v2843_v22 }
 0x2f8   : > { %v1572_v55 = vpop.f32.mrf.mxu2  ;;  %1725 = vmatmul.f32.gmra.mxu0 %v5563_v10  ;;  %1814 = vmatmul.f32.gmra.mxu1 %v5567_v1  ;;  %v1661_v2 = vpop.f32.mrf.mxu3  ;;  %6540 = vst [vmem:[#allocation44_spill] sm:$0xff] %v5572_v42  ;;  %v5576_v10 = vld [vmem:[%s4446_s14 + $0x218] sm:$0xff] }
 0x2f9   : > { %v1573_v17 = vadd.f32 %v1572_v55, %v1484_v61  ;;  %6541 = vst [vmem:[#allocation45_spill] sm:$0xff] %v5576_v10  ;;  %v765_v61 = vld [vmem:[%s4454_s12 + $0x7e8] sm:$0xff] }
 0x2fa   : > { %v525_v55 = vld [vmem:[%s4454_s12 + $0x68] sm:$0xff]  ;;  %2300 = vmatpush.msrb.mxu3 %v765_v61  ;;  %v680_v61 = vld [vmem:[%s4454_s12 + $0x540] sm:$0xff] }
 0x2fb   : > { %v1662_v9 = vadd.f32 %v1661_v2, %v1573_v17  ;;  %v5583_v2 = vld [vmem:[%s4446_s14 + $0x200] sm:$0xff]  ;;  %v5587_v17 = vld [vmem:[%s4446_s14 + $0x208] sm:$0xff]  ;;  %2033 = vmatpush.msrb.mxu0 %v525_v55  ;;  %2212 = vmatpush.msrb.mxu2 %v680_v61 }
 0x2fc   : > { %6542 = vst [vmem:[#allocation46_spill] sm:$0xff] %v5583_v2  ;;  %v760_v55 = vld [vmem:[%s4454_s12 + $0x7c0] sm:$0xff] }
 0x2fd   : > { %v2848_v22 = vadd.f32 %v1662_v9, %v948_v24  ;;  %1906 = vmatmul.f32.gmra.mxu2 %v5572_v42  ;;  %v1681_v62 = vpop.f32.mrf.mxu0  ;;  %v1770_v48 = vpop.f32.mrf.mxu1  ;;  %1995 = vmatmul.f32.gmra.mxu3 %v5576_v10  ;;  %6543 = vst [vmem:[#allocation47_spill] sm:$0xff] %v5587_v17  ;;  %v5591_v10 = vld [vmem:[%s4446_s14 + $0x230] sm:$0xff] }
 0x2fe   : > { %v1771_v1 = vadd.f32 %v1770_v48, %v1681_v62  ;;  %6544 = vst [vmem:[#allocation48_spill] sm:$0xff] %v5591_v10  ;;  %2301 = vmatpush.msrb.mxu3 %v760_v55  ;;  %v5619_v55 = vld [vmem:[%s4446_s14 + $0x240] sm:$0xff] }
 0x2ff   : > { %2968 = vst [vmem:[#allocation2 + $0x2d8] sm:$0xff] %v2848_v22  ;;  %v834_v22 = vld [vmem:[#allocation2 + $0xd8] sm:$0xff] }
 0x300   : > { %v1859_v29 = vpop.f32.mrf.mxu2  ;;  %1728 = vmatmul.f32.gmra.mxu0 %v5583_v2  ;;  %1817 = vmatmul.f32.gmra.mxu1 %v5587_v17  ;;  %v1948_v24 = vpop.f32.mrf.mxu3  ;;  %v5595_v17 = vld [vmem:[%s4446_s14 + $0x238] sm:$0xff]  ;;  %6550 = vst [vmem:[#allocation54_spill] sm:$0xff] %v5619_v55 }
 0x301   : > { %v1860_v9 = vadd.f32 %v1859_v29, %v1771_v1  ;;  %6545 = vst [vmem:[#allocation49_spill] sm:$0xff] %v5595_v17  ;;  %v5601_v29 = vld [vmem:[%s4446_s14 + $0x220] sm:$0xff] }
 0x302   : > { %6546 = vst [vmem:[#allocation50_spill] sm:$0xff] %v5601_v29 }
 0x303   : > { %v1949_v62 = vadd.f32 %v1948_v24, %v1860_v9  ;;  %v5605_v24 = vld [vmem:[%s4446_s14 + $0x228] sm:$0xff] }
 0x304   : > { %6547 = vst [vmem:[#allocation51_spill] sm:$0xff] %v5605_v24 }
 0x305   : > { %v2734_v48 = vadd.f32 %v1949_v62, %v834_v22  ;;  %1909 = vmatmul.f32.gmra.mxu2 %v5591_v10  ;;  %v1684_v2 = vpop.f32.mrf.mxu0  ;;  %v1773_v42 = vpop.f32.mrf.mxu1  ;;  %1998 = vmatmul.f32.gmra.mxu3 %v5595_v17  ;;  %v520_v62 = vld [vmem:[%s4454_s12 + $0x40] sm:$0xff] }
 0x306   : > { %v1774_v1 = vadd.f32 %v1773_v42, %v1684_v2  ;;  %v600_v42 = vld [vmem:[%s4454_s12 + $0x2c0] sm:$0xff]  ;;  %v839_v2 = vld [vmem:[#allocation2 + $0x48] sm:$0xff]  ;;  %2034 = vmatpush.msrb.mxu0 %v520_v62  ;;  %v675_v62 = vld [vmem:[%s4454_s12 + $0x518] sm:$0xff] }
 0x307   : > { %2854 = vst [vmem:[#allocation2 + $0xd8] sm:$0xff] %v2734_v48  ;;  %2123 = vmatpush.msrb.mxu1 %v600_v42  ;;  %v844_v42 = vld [vmem:[#allocation2 + $0x320] sm:$0xff]  ;;  %2213 = vmatpush.msrb.mxu2 %v675_v62 }
 0x308   : > { %v1862_v54 = vpop.f32.mrf.mxu2  ;;  %1731 = vmatmul.f32.gmra.mxu0 %v5601_v29  ;;  %1820 = vmatmul.f32.gmra.mxu1 %v5605_v24  ;;  %v1951_v9 = vpop.f32.mrf.mxu3  ;;  %v5611_v29 = vld [vmem:[%s4446_s14 + $0x250] sm:$0xff] }
 0x309   : > { %v1863_v22 = vadd.f32 %v1862_v54, %v1774_v1  ;;  %6548 = vst [vmem:[#allocation52_spill] sm:$0xff] %v5611_v29  ;;  %v5623_v54 = vld [vmem:[%s4446_s14 + $0x248] sm:$0xff] }
 0x30a   : > { %6551 = vst [vmem:[#allocation55_spill] sm:$0xff] %v5623_v54 }
 0x30b   : > { %v1952_v48 = vadd.f32 %v1951_v9, %v1863_v22 }
 0x30d   : > { %v2739_v17 = vadd.f32 %v1952_v48, %v839_v2  ;;  %1912 = vmatmul.f32.gmra.mxu2 %v5611_v29  ;;  %v1687_v24 = vpop.f32.mrf.mxu0  ;;  %v1776_v10 = vpop.f32.mrf.mxu1  ;;  %2001 = vmatmul.f32.gmra.mxu3 %v5615_v41  ;;  %v595_v41 = vld [vmem:[%s4454_s12 + $0x298] sm:$0xff] }
 0x30e   : > { %v1777_v1 = vadd.f32 %v1776_v10, %v1687_v24  ;;  %v5628_v24 = vld [vmem:[%s4446_s14 + $0x270] sm:$0xff]  ;;  %2124 = vmatpush.msrb.mxu1 %v595_v41  ;;  %v5671_v29 = vld [vmem:[%s4446_s14 + $0x2b8] sm:$0xff] }
 0x30f   : > { %2859 = vst [vmem:[#allocation2 + $0x48] sm:$0xff] %v2739_v17 }
 0x310   : > { %v1865_v61 = vpop.f32.mrf.mxu2  ;;  %1734 = vmatmul.f32.gmra.mxu0 %v5619_v55  ;;  %1823 = vmatmul.f32.gmra.mxu1 %v5623_v54  ;;  %v1954_v9 = vpop.f32.mrf.mxu3  ;;  %6552 = vst [vmem:[#allocation56_spill] sm:$0xff] %v5628_v24  ;;  %v5632_v55 = vld [vmem:[%s4446_s14 + $0x278] sm:$0xff] }
 0x311   : > { %v1866_v22 = vadd.f32 %v1865_v61, %v1777_v1  ;;  %6553 = vst [vmem:[#allocation57_spill] sm:$0xff] %v5632_v55  ;;  %v755_v1 = vld [vmem:[%s4454_s12 + $0x798] sm:$0xff] }
 0x312   : > { %v515_v61 = vld [vmem:[%s4454_s12 + $0x18] sm:$0xff]  ;;  %2302 = vmatpush.msrb.mxu3 %v755_v1  ;;  %6561 = vst [vmem:[#allocation65_spill] sm:$0xff] %v5671_v29 }
 0x313   : > { %v1955_v10 = vadd.f32 %v1954_v9, %v1866_v22  ;;  %v5639_v9 = vld [vmem:[%s4446_s14 + $0x260] sm:$0xff]  ;;  %v5643_v22 = vld [vmem:[%s4446_s14 + $0x268] sm:$0xff]  ;;  %2035 = vmatpush.msrb.mxu0 %v515_v61  ;;  %v751_v1 = vld [vmem:[%s4454_s12 + $0x778] sm:$0xff] }
 0x314   : > { %6554 = vst [vmem:[#allocation58_spill] sm:$0xff] %v5639_v9  ;;  %v831_v61 = vld [vmem:[%s4454_s12 + $0x9f8] sm:$0xff]  ;;  %2554 = vmatpush.msra.mxu2 %v751_v1 }
 0x315   : > { %v2744_v17 = vadd.f32 %v1955_v10, %v844_v42  ;;  %1915 = vmatmul.f32.gmra.mxu2 %v5628_v24  ;;  %v1690_v2 = vpop.f32.mrf.mxu0  ;;  %v1779_v48 = vpop.f32.mrf.mxu1  ;;  %2004 = vmatmul.f32.gmra.mxu3 %v5632_v55  ;;  %6555 = vst [vmem:[#allocation59_spill] sm:$0xff] %v5643_v22  ;;  %v5647_v55 = vld [vmem:[%s4446_s14 + $0x290] sm:$0xff] }
 0x316   : > { %v1780_v54 = vadd.f32 %v1779_v48, %v1690_v2  ;;  %6556 = vst [vmem:[#allocation60_spill] sm:$0xff] %v5647_v55  ;;  %2643 = vmatpush.msra.mxu3 %v831_v61  ;;  %v5675_v61 = vld [vmem:[%s4446_s14 + $0x2a0] sm:$0xff] }
 0x317   : > { %2864 = vst [vmem:[#allocation2 + $0x320] sm:$0xff] %v2744_v17  ;;  %v849_v17 = vld [vmem:[#allocation2 + $0x388] sm:$0xff] }
 0x318   : > { %v1868_v62 = vpop.f32.mrf.mxu2  ;;  %1737 = vmatmul.f32.gmra.mxu0 %v5639_v9  ;;  %1826 = vmatmul.f32.gmra.mxu1 %v5643_v22  ;;  %v1957_v42 = vpop.f32.mrf.mxu3  ;;  %v5651_v22 = vld [vmem:[%s4446_s14 + $0x298] sm:$0xff]  ;;  %6562 = vst [vmem:[#allocation66_spill] sm:$0xff] %v5675_v61 }
 0x319   : > { %v1869_v10 = vadd.f32 %v1868_v62, %v1780_v54  ;;  %6557 = vst [vmem:[#allocation61_spill] sm:$0xff] %v5651_v22  ;;  %v5657_v62 = vld [vmem:[%s4446_s14 + $0x280] sm:$0xff] }
 0x31a   : > { %6558 = vst [vmem:[#allocation62_spill] sm:$0xff] %v5657_v62 }
 0x31b   : > { %v1958_v2 = vadd.f32 %v1957_v42, %v1869_v10  ;;  %v5661_v42 = vld [vmem:[%s4446_s14 + $0x288] sm:$0xff] }
 0x31c   : > { %6559 = vst [vmem:[#allocation63_spill] sm:$0xff] %v5661_v42 }
 0x31d   : > { %v2749_v48 = vadd.f32 %v1958_v2, %v849_v17  ;;  %1918 = vmatmul.f32.gmra.mxu2 %v5647_v55  ;;  %v1693_v9 = vpop.f32.mrf.mxu0  ;;  %v1782_v24 = vpop.f32.mrf.mxu1  ;;  %2007 = vmatmul.f32.gmra.mxu3 %v5651_v22  ;;  %v591_v2 = vld [vmem:[%s4454_s12 + $0x278] sm:$0xff] }
 0x31e   : > { %v1783_v54 = vadd.f32 %v1782_v24, %v1693_v9  ;;  %v671_v24 = vld [vmem:[%s4454_s12 + $0x4f8] sm:$0xff]  ;;  %2376 = vmatpush.msra.mxu0 %v591_v2  ;;  %v746_v2 = vld [vmem:[%s4454_s12 + $0x750] sm:$0xff] }
 0x31f   : > { %2869 = vst [vmem:[#allocation2 + $0x388] sm:$0xff] %v2749_v48  ;;  %v854_v9 = vld [vmem:[#allocation2 + $0x1b8] sm:$0xff]  ;;  %2465 = vmatpush.msra.mxu1 %v671_v24  ;;  %v859_v24 = vld [vmem:[#allocation2 + $0x130] sm:$0xff]  ;;  %2555 = vmatpush.msra.mxu2 %v746_v2 }
 0x320   : > { %v1871_v41 = vpop.f32.mrf.mxu2  ;;  %1740 = vmatmul.f32.gmra.mxu0 %v5657_v62  ;;  %1829 = vmatmul.f32.gmra.mxu1 %v5661_v42  ;;  %v1960_v10 = vpop.f32.mrf.mxu3  ;;  %v5667_v62 = vld [vmem:[%s4446_s14 + $0x2b0] sm:$0xff] }
 0x321   : > { %v1872_v17 = vadd.f32 %v1871_v41, %v1783_v54  ;;  %6560 = vst [vmem:[#allocation64_spill] sm:$0xff] %v5667_v62  ;;  %v5679_v41 = vld [vmem:[%s4446_s14 + $0x2a8] sm:$0xff] }
 0x322   : > { %6563 = vst [vmem:[#allocation67_spill] sm:$0xff] %v5679_v41 }
 0x323   : > { %v1961_v48 = vadd.f32 %v1960_v10, %v1872_v17 }
 0x325   : > { %v2754_v22 = vadd.f32 %v1961_v48, %v854_v9  ;;  %1921 = vmatmul.f32.gmra.mxu2 %v5667_v62  ;;  %v1696_v42 = vpop.f32.mrf.mxu0  ;;  %v1785_v55 = vpop.f32.mrf.mxu1  ;;  %2010 = vmatmul.f32.gmra.mxu3 %v5671_v29  ;;  %v666_v29 = vld [vmem:[%s4454_s12 + $0x4d0] sm:$0xff] }
 0x326   : > { %v1786_v54 = vadd.f32 %v1785_v55, %v1696_v42  ;;  %v5684_v42 = vld [vmem:[%s4446_s14 + $0x2d0] sm:$0xff]  ;;  %2466 = vmatpush.msra.mxu1 %v666_v29 }
 0x327   : > { %2874 = vst [vmem:[#allocation2 + $0x1b8] sm:$0xff] %v2754_v22 }
 0x328   : > { %v1874_v1 = vpop.f32.mrf.mxu2  ;;  %1743 = vmatmul.f32.gmra.mxu0 %v5675_v61  ;;  %1832 = vmatmul.f32.gmra.mxu1 %v5679_v41  ;;  %v1963_v10 = vpop.f32.mrf.mxu3  ;;  %6564 = vst [vmem:[#allocation68_spill] sm:$0xff] %v5684_v42  ;;  %v5688_v61 = vld [vmem:[%s4446_s14 + $0x2d8] sm:$0xff] }
 0x329   : > { %v1875_v17 = vadd.f32 %v1874_v1, %v1786_v54  ;;  %6565 = vst [vmem:[#allocation69_spill] sm:$0xff] %v5688_v61  ;;  %v826_v54 = vld [vmem:[%s4454_s12 + $0x9d0] sm:$0xff] }
 0x32a   : > { %v586_v1 = vld [vmem:[%s4454_s12 + $0x250] sm:$0xff]  ;;  %2644 = vmatpush.msra.mxu3 %v826_v54  ;;  %v741_v54 = vld [vmem:[%s4454_s12 + $0x728] sm:$0xff] }
 0x32b   : > { %v1964_v55 = vadd.f32 %v1963_v10, %v1875_v17  ;;  %v5695_v10 = vld [vmem:[%s4446_s14 + $0x2c0] sm:$0xff]  ;;  %v5699_v17 = vld [vmem:[%s4446_s14 + $0x2c8] sm:$0xff]  ;;  %2377 = vmatpush.msra.mxu0 %v586_v1  ;;  %2556 = vmatpush.msra.mxu2 %v741_v54 }
 0x32c   : > { %6566 = vst [vmem:[#allocation70_spill] sm:$0xff] %v5695_v10  ;;  %v821_v1 = vld [vmem:[%s4454_s12 + $0x9a8] sm:$0xff]  ;;  %v736_v54 = vld [vmem:[%s4454_s12 + $0x700] sm:$0xff] }
 0x32d   : > { %v2759_v22 = vadd.f32 %v1964_v55, %v859_v24  ;;  %1924 = vmatmul.f32.gmra.mxu2 %v5684_v42  ;;  %v1699_v9 = vpop.f32.mrf.mxu0  ;;  %v1788_v48 = vpop.f32.mrf.mxu1  ;;  %2013 = vmatmul.f32.gmra.mxu3 %v5688_v61  ;;  %6567 = vst [vmem:[#allocation71_spill] sm:$0xff] %v5699_v17  ;;  %v5703_v61 = vld [vmem:[%s4446_s14 + $0x2f0] sm:$0xff] }
 0x32e   : > { %v1789_v41 = vadd.f32 %v1788_v48, %v1699_v9  ;;  %6568 = vst [vmem:[#allocation72_spill] sm:$0xff] %v5703_v61  ;;  %2645 = vmatpush.msra.mxu3 %v821_v1  ;;  %2557 = vmatpush.msra.mxu2 %v736_v54 }
 0x32f   : > { %2879 = vst [vmem:[#allocation2 + $0x130] sm:$0xff] %v2759_v22  ;;  %v864_v22 = vld [vmem:[#allocation2 + $0x148] sm:$0xff] }
 0x330   : > { %v1877_v2 = vpop.f32.mrf.mxu2  ;;  %1746 = vmatmul.f32.gmra.mxu0 %v5695_v10  ;;  %1835 = vmatmul.f32.gmra.mxu1 %v5699_v17  ;;  %v1966_v24 = vpop.f32.mrf.mxu3  ;;  %v5707_v17 = vld [vmem:[%s4446_s14 + $0x2f8] sm:$0xff] }
 0x331   : > { %v1878_v55 = vadd.f32 %v1877_v2, %v1789_v41  ;;  %6569 = vst [vmem:[#allocation73_spill] sm:$0xff] %v5707_v17  ;;  %v5713_v2 = vld [vmem:[%s4446_s14 + $0x2e0] sm:$0xff] }
 0x332   : > { %6570 = vst [vmem:[#allocation74_spill] sm:$0xff] %v5713_v2 }
 0x333   : > { %v1967_v9 = vadd.f32 %v1966_v24, %v1878_v55  ;;  %v5717_v24 = vld [vmem:[%s4446_s14 + $0x2e8] sm:$0xff] }
 0x334   : > { %6571 = vst [vmem:[#allocation75_spill] sm:$0xff] %v5717_v24 }
 0x335   : > { %v2764_v48 = vadd.f32 %v1967_v9, %v864_v22  ;;  %1927 = vmatmul.f32.gmra.mxu2 %v5703_v61  ;;  %v1702_v10 = vpop.f32.mrf.mxu0  ;;  %v1791_v42 = vpop.f32.mrf.mxu1  ;;  %2016 = vmatmul.f32.gmra.mxu3 %v5707_v17  ;;  %v581_v9 = vld [vmem:[%s4454_s12 + $0x228] sm:$0xff]  ;;  %v869_v17 = vld [vmem:[#allocation2 + $0x290] sm:$0xff] }
 0x336   : > { %v1792_v41 = vadd.f32 %v1791_v42, %v1702_v10  ;;  %v661_v61 = vld [vmem:[%s4454_s12 + $0x4a8] sm:$0xff]  ;;  %2378 = vmatpush.msra.mxu0 %v581_v9 }
 0x337   : > { %2884 = vst [vmem:[#allocation2 + $0x148] sm:$0xff] %v2764_v48  ;;  %2467 = vmatpush.msra.mxu1 %v661_v61 }
 0x338   : > { %v1880_v29 = vpop.f32.mrf.mxu2  ;;  %1749 = vmatmul.f32.gmra.mxu0 %v5713_v2  ;;  %1838 = vmatmul.f32.gmra.mxu1 %v5717_v24  ;;  %v1969_v55 = vpop.f32.mrf.mxu3 }
 0x339   : > { %v1881_v22 = vadd.f32 %v1880_v29, %v1792_v41 }
 0x33b   : > { %v1970_v42 = vadd.f32 %v1969_v55, %v1881_v22  ;;  %v576_v55 = vld [vmem:[%s4454_s12 + $0x200] sm:$0xff] }
 0x33c   : > { %v656_v22 = vld [vmem:[%s4454_s12 + $0x480] sm:$0xff]  ;;  %2379 = vmatpush.msra.mxu0 %v576_v55  ;;  %v726_v55 = vld [vmem:[%s4454_s12 + $0x6b0] sm:$0xff] }
 0x33d   : > { %v2769_v10 = vadd.f32 %v1970_v42, %v869_v17  ;;  %2214 = vmatmul.f32.vlgmr.msrb.gmra.mxu2 %v5275_v28  ;;  %v1705_v48 = vpop.f32.mrf.mxu0  ;;  %v1794_v2 = vpop.f32.mrf.mxu1  ;;  %2303 = vmatmul.f32.vlgmr.msrb.gmra.mxu3 %v5279_v51  ;;  %v874_v17 = vld [vmem:[#allocation2 + $0x70] sm:$0xff] }
 0x33e   : > { %v1795_v62 = vadd.f32 %v1794_v2, %v1705_v48  ;;  %2468 = vmatpush.msra.mxu1 %v656_v22  ;;  %v811_v48 = vld [vmem:[%s4454_s12 + $0x958] sm:$0xff]  ;;  %v889_v22 = vld [vmem:[#allocation2 + $0x20] sm:$0xff] }
 0x33f   : > { %2889 = vst [vmem:[#allocation2 + $0x290] sm:$0xff] %v2769_v10 }
 0x340   : > { %v1883_v24 = vpop.f32.mrf.mxu2  ;;  %2036 = vmatmul.f32.vlgmr.msrb.gmra.mxu0 %v5283_v11  ;;  %2125 = vmatmul.f32.vlgmr.msrb.gmra.mxu1 %v5287_v43  ;;  %v1972_v41 = vpop.f32.mrf.mxu3  ;;  %v816_v11 = vld [vmem:[%s4454_s12 + $0x980] sm:$0xff] }
 0x341   : > { %v1884_v61 = vadd.f32 %v1883_v24, %v1795_v62  ;;  %2646 = vmatpush.msra.mxu3 %v816_v11 }
 0x343   : > { %v1973_v28 = vadd.f32 %v1972_v41, %v1884_v61  ;;  %2647 = vmatpush.msra.mxu3 %v811_v48  ;;  %v801_v48 = vld [vmem:[%s4454_s12 + $0x908] sm:$0xff] }
 0x345   : > { %v2774_v1 = vadd.f32 %v1973_v28, %v874_v17  ;;  %2217 = vmatmul.f32.gmra.mxu2 %v5292_v34  ;;  %v1708_v51 = vpop.f32.mrf.mxu0  ;;  %v1797_v29 = vpop.f32.mrf.mxu1  ;;  %2306 = vmatmul.f32.gmra.mxu3 %v5296_v60  ;;  %v879_v34 = vld [vmem:[#allocation2 + $0x260] sm:$0xff]  ;;  %v571_v17 = vld [vmem:[%s4454_s12 + $0x1d8] sm:$0xff] }
 0x346   : > { %v1798_v2 = vadd.f32 %v1797_v29, %v1708_v51  ;;  %v884_v28 = vld [vmem:[#allocation2 + $0x78] sm:$0xff]  ;;  %2380 = vmatpush.msra.mxu0 %v571_v17  ;;  %v561_v17 = vld [vmem:[%s4454_s12 + $0x188] sm:$0xff] }
 0x347   : > { %2894 = vst [vmem:[#allocation2 + $0x70] sm:$0xff] %v2774_v1 }
 0x348   : > { %v1886_v43 = vpop.f32.mrf.mxu2  ;;  %2039 = vmatmul.f32.gmra.mxu0 %v5303_v31  ;;  %2128 = vmatmul.f32.gmra.mxu1 %v5307_v36  ;;  %v1975_v62 = vpop.f32.mrf.mxu3  ;;  %v731_v36 = vld [vmem:[%s4454_s12 + $0x6d8] sm:$0xff] }
 0x349   : > { %v1887_v24 = vadd.f32 %v1886_v43, %v1798_v2  ;;  %2558 = vmatpush.msra.mxu2 %v731_v36 }
 0x34b   : > { %v1976_v9 = vadd.f32 %v1975_v62, %v1887_v24  ;;  %2559 = vmatpush.msra.mxu2 %v726_v55 }
 0x34d   : > { %v2779_v60 = vadd.f32 %v1976_v9, %v879_v34  ;;  %2220 = vmatmul.f32.gmra.mxu2 %v5311_v58  ;;  %v1711_v42 = vpop.f32.mrf.mxu0  ;;  %v1800_v10 = vpop.f32.mrf.mxu1  ;;  %2309 = vmatmul.f32.gmra.mxu3 %v5315_v7  ;;  %v651_v58 = vld [vmem:[%s4454_s12 + $0x458] sm:$0xff]  ;;  %v566_v34 = vld [vmem:[%s4454_s12 + $0x1b0] sm:$0xff] }
 0x34e   : > { %v1801_v31 = vadd.f32 %v1800_v10, %v1711_v42  ;;  %2469 = vmatpush.msra.mxu1 %v651_v58  ;;  %v646_v9 = vld [vmem:[%s4454_s12 + $0x430] sm:$0xff]  ;;  %2381 = vmatpush.msra.mxu0 %v566_v34  ;;  %v791_v34 = vld [vmem:[%s4454_s12 + $0x8b8] sm:$0xff] }
 0x34f   : > { %2899 = vst [vmem:[#allocation2 + $0x260] sm:$0xff] %v2779_v60  ;;  %v899_v58 = vld [vmem:[#allocation2 + $0x170] sm:$0xff] }
 0x350   : > { %v1889_v41 = vpop.f32.mrf.mxu2  ;;  %2042 = vmatmul.f32.gmra.mxu0 %v5321_v32  ;;  %2131 = vmatmul.f32.gmra.mxu1 %v5325_v13  ;;  %v1978_v61 = vpop.f32.mrf.mxu3 }
 0x351   : > { %v1890_v54 = vadd.f32 %v1889_v41, %v1801_v31  ;;  %2470 = vmatpush.msra.mxu1 %v646_v9  ;;  %2382 = vmatpush.msra.mxu0 %v561_v17  ;;  %v546_v17 = vld [vmem:[%s4454_s12 + $0x110] sm:$0xff] }
 0x353   : > { %v1979_v7 = vadd.f32 %v1978_v61, %v1890_v54 }
 0x355   : > { %v2784_v1 = vadd.f32 %v1979_v7, %v884_v28  ;;  %2223 = vmatmul.f32.gmra.mxu2 %v5331_v18  ;;  %v1714_v51 = vpop.f32.mrf.mxu0  ;;  %v1803_v29 = vpop.f32.mrf.mxu1  ;;  %2312 = vmatmul.f32.gmra.mxu3 %v5335_v23 }
 0x356   : > { %v1804_v32 = vadd.f32 %v1803_v29, %v1714_v51 }
 0x357   : > { %2904 = vst [vmem:[#allocation2 + $0x78] sm:$0xff] %v2784_v1 }
 0x358   : > { %v1892_v13 = vpop.f32.mrf.mxu2  ;;  %2045 = vmatmul.f32.gmra.mxu0 %v5339_v26  ;;  %2134 = vmatmul.f32.gmra.mxu1 %v5343_v49  ;;  %v1981_v2 = vpop.f32.mrf.mxu3  ;;  %v806_v26 = vld [vmem:[%s4454_s12 + $0x930] sm:$0xff] }
 0x359   : > { %v1893_v11 = vadd.f32 %v1892_v13, %v1804_v32  ;;  %2648 = vmatpush.msra.mxu3 %v806_v26  ;;  %v716_v32 = vld [vmem:[%s4454_s12 + $0x660] sm:$0xff]  ;;  %v904_v13 = vld [vmem:[#allocation2 + $0xf8] sm:$0xff] }
 0x35b   : > { %v1982_v18 = vadd.f32 %v1981_v2, %v1893_v11  ;;  %2649 = vmatpush.msra.mxu3 %v801_v48  ;;  %v919_v48 = vld [vmem:[#allocation2 + $0x28] sm:$0xff] }
 0x35d   : > { %v2789_v43 = vadd.f32 %v1982_v18, %v889_v22  ;;  %2226 = vmatmul.f32.gmra.mxu2 %v5348_v50  ;;  %v1717_v23 = vpop.f32.mrf.mxu0  ;;  %v1806_v62 = vpop.f32.mrf.mxu1  ;;  %2315 = vmatmul.f32.gmra.mxu3 %v5352_v38  ;;  %v894_v50 = vld [vmem:[#allocation2 + $0x38] sm:$0xff]  ;;  %v556_v22 = vld [vmem:[%s4454_s12 + $0x160] sm:$0xff] }
 0x35e   : > { %v1807_v24 = vadd.f32 %v1806_v62, %v1717_v23  ;;  %v636_v18 = vld [vmem:[%s4454_s12 + $0x3e0] sm:$0xff]  ;;  %2383 = vmatpush.msra.mxu0 %v556_v22 }
 0x35f   : > { %2909 = vst [vmem:[#allocation2 + $0x20] sm:$0xff] %v2789_v43 }
 0x360   : > { %v1895_v49 = vpop.f32.mrf.mxu2  ;;  %2048 = vmatmul.f32.gmra.mxu0 %v5359_v20  ;;  %2137 = vmatmul.f32.gmra.mxu1 %v5363_v33  ;;  %v1984_v60 = vpop.f32.mrf.mxu3  ;;  %v721_v33 = vld [vmem:[%s4454_s12 + $0x688] sm:$0xff] }
 0x361   : > { %v1896_v42 = vadd.f32 %v1895_v49, %v1807_v24  ;;  %2560 = vmatpush.msra.mxu2 %v721_v33  ;;  %v706_v33 = vld [vmem:[%s4454_s12 + $0x610] sm:$0xff] }
 0x363   : > { %v1985_v10 = vadd.f32 %v1984_v60, %v1896_v42  ;;  %2561 = vmatpush.msra.mxu2 %v716_v32  ;;  %v551_v42 = vld [vmem:[%s4454_s12 + $0x138] sm:$0xff]  ;;  %v541_v32 = vld [vmem:[%s4454_s12 + $0xe8] sm:$0xff] }
 0x364   : > { %2384 = vmatpush.msra.mxu0 %v551_v42 }
 0x365   : > { %v2794_v38 = vadd.f32 %v1985_v10, %v894_v50  ;;  %2229 = vmatmul.f32.gmra.mxu2 %v5367_v35  ;;  %v1720_v31 = vpop.f32.mrf.mxu0  ;;  %v1809_v36 = vpop.f32.mrf.mxu1  ;;  %2318 = vmatmul.f32.gmra.mxu3 %v5371_v15  ;;  %v641_v35 = vld [vmem:[%s4454_s12 + $0x408] sm:$0xff]  ;;  %v914_v50 = vld [vmem:[#allocation2 + $0x230] sm:$0xff] }
 0x366   : > { %v1810_v20 = vadd.f32 %v1809_v36, %v1720_v31  ;;  %2471 = vmatpush.msra.mxu1 %v641_v35  ;;  %v626_v35 = vld [vmem:[%s4454_s12 + $0x390] sm:$0xff]  ;;  %2385 = vmatpush.msra.mxu0 %v546_v17  ;;  %v944_v17 = vld [vmem:[#allocation2 + $0x240] sm:$0xff] }
 0x367   : > { %2914 = vst [vmem:[#allocation2 + $0x38] sm:$0xff] %v2794_v38 }
 0x368   : > { %v1898_v41 = vpop.f32.mrf.mxu2  ;;  %2051 = vmatmul.f32.gmra.mxu0 %v5377_v4  ;;  %2140 = vmatmul.f32.gmra.mxu1 %v5381_v40  ;;  %v1987_v61 = vpop.f32.mrf.mxu3 }
 0x369   : > { %v1899_v54 = vadd.f32 %v1898_v41, %v1810_v20  ;;  %2472 = vmatpush.msra.mxu1 %v636_v18  ;;  %2386 = vmatpush.msra.mxu0 %v541_v32 }
 0x36b   : > { %v1988_v15 = vadd.f32 %v1987_v61, %v1899_v54 }
 0x36d   : > { %v2799_v28 = vadd.f32 %v1988_v15, %v899_v58  ;;  %2232 = vmatmul.f32.gmra.mxu2 %v5387_v12  ;;  %v1723_v7 = vpop.f32.mrf.mxu0  ;;  %v1812_v1 = vpop.f32.mrf.mxu1  ;;  %2321 = vmatmul.f32.gmra.mxu3 %v5391_v57 }
 0x36e   : > { %v1813_v4 = vadd.f32 %v1812_v1, %v1723_v7 }
 0x36f   : > { %2919 = vst [vmem:[#allocation2 + $0x170] sm:$0xff] %v2799_v28 }
 0x370   : > { %v1901_v40 = vpop.f32.mrf.mxu2  ;;  %2054 = vmatmul.f32.gmra.mxu0 %v5395_v46  ;;  %2143 = vmatmul.f32.gmra.mxu1 %v5399_v63  ;;  %v1990_v51 = vpop.f32.mrf.mxu3  ;;  %v796_v46 = vld [vmem:[%s4454_s12 + $0x8e0] sm:$0xff] }
 0x371   : > { %v1902_v29 = vadd.f32 %v1901_v40, %v1813_v4  ;;  %2650 = vmatpush.msra.mxu3 %v796_v46  ;;  %v781_v4 = vld [vmem:[%s4454_s12 + $0x868] sm:$0xff]  ;;  %v6574_v46 = vld [vmem:[#allocation31_spill] sm:$0xff] }
 0x373   : > { %v1991_v12 = vadd.f32 %v1990_v51, %v1902_v29  ;;  %2651 = vmatpush.msra.mxu3 %v791_v34  ;;  %v616_v34 = vld [vmem:[%s4454_s12 + $0x340] sm:$0xff] }
 0x375   : > { %v2804_v2 = vadd.f32 %v1991_v12, %v904_v13  ;;  %2235 = vmatmul.f32.gmra.mxu2 %v5404_v0  ;;  %v1726_v57 = vpop.f32.mrf.mxu0  ;;  %v1815_v11 = vpop.f32.mrf.mxu1  ;;  %2324 = vmatmul.f32.gmra.mxu3 %v5408_v53  ;;  %v909_v0 = vld [vmem:[#allocation2 + $0x128] sm:$0xff]  ;;  %v929_v13 = vld [vmem:[#allocation2 + $0x1a0] sm:$0xff] }
 0x376   : > { %v1816_v55 = vadd.f32 %v1815_v11, %v1726_v57  ;;  %v6572_v11 = vld [vmem:[#allocation29_spill] sm:$0xff] }
 0x377   : > { %2924 = vst [vmem:[#allocation2 + $0xf8] sm:$0xff] %v2804_v2 }
 0x378   : > { %v1904_v63 = vpop.f32.mrf.mxu2  ;;  %2057 = vmatmul.f32.gmra.mxu0 %v5415_v6  ;;  %2146 = vmatmul.f32.gmra.mxu1 %v5419_v59  ;;  %v1993_v43 = vpop.f32.mrf.mxu3  ;;  %v711_v59 = vld [vmem:[%s4454_s12 + $0x638] sm:$0xff] }
 0x379   : > { %v1905_v23 = vadd.f32 %v1904_v63, %v1816_v55  ;;  %2562 = vmatpush.msra.mxu2 %v711_v59  ;;  %v6573_v55 = vld [vmem:[#allocation30_spill] sm:$0xff]  ;;  %v696_v63 = vld [vmem:[%s4454_s12 + $0x5c0] sm:$0xff] }
 0x37a   : > { %v536_v59 = vld [vmem:[%s4454_s12 + $0xc0] sm:$0xff] }
 0x37b   : > { %v1994_v62 = vadd.f32 %v1993_v43, %v1905_v23  ;;  %2563 = vmatpush.msra.mxu2 %v706_v33  ;;  %v934_v43 = vld [vmem:[#allocation2 + $0x10] sm:$0xff]  ;;  %2387 = vmatpush.msra.mxu0 %v536_v59  ;;  %v771_v33 = vld [vmem:[%s4454_s12 + $0x818] sm:$0xff] }
 0x37d   : > { %v2809_v53 = vadd.f32 %v1994_v62, %v909_v0  ;;  %2238 = vmatmul.f32.gmra.mxu2 %v5423_v19  ;;  %v1729_v24 = vpop.f32.mrf.mxu0  ;;  %v1818_v26 = vpop.f32.mrf.mxu1  ;;  %2327 = vmatmul.f32.gmra.mxu3 %v5427_v21  ;;  %v631_v19 = vld [vmem:[%s4454_s12 + $0x3b8] sm:$0xff] }
 0x37e   : > { %v1819_v6 = vadd.f32 %v1818_v26, %v1729_v24  ;;  %2473 = vmatpush.msra.mxu1 %v631_v19  ;;  %v6575_v0 = vld [vmem:[#allocation32_spill] sm:$0xff]  ;;  %v6576_v24 = vld [vmem:[#allocation33_spill] sm:$0xff] }
 0x37f   : > { %2929 = vst [vmem:[#allocation2 + $0x128] sm:$0xff] %v2809_v53 }
 0x380   : > { %v1907_v9 = vpop.f32.mrf.mxu2  ;;  %2060 = vmatmul.f32.gmra.mxu0 %v5433_v52  ;;  %2149 = vmatmul.f32.gmra.mxu1 %v5437_v14  ;;  %v1996_v49 = vpop.f32.mrf.mxu3 }
 0x381   : > { %v1908_v60 = vadd.f32 %v1907_v9, %v1819_v6  ;;  %2474 = vmatpush.msra.mxu1 %v626_v35  ;;  %v776_v6 = vld [vmem:[%s4454_s12 + $0x840] sm:$0xff] }
 0x383   : > { %v1997_v21 = vadd.f32 %v1996_v49, %v1908_v60  ;;  %v6577_v49 = vld [vmem:[#allocation34_spill] sm:$0xff]  ;;  %v6578_v60 = vld [vmem:[#allocation35_spill] sm:$0xff] }
 0x385   : > { %v2814_v10 = vadd.f32 %v1997_v21, %v914_v50  ;;  %2241 = vmatmul.f32.gmra.mxu2 %v5443_v47  ;;  %v1732_v38 = vpop.f32.mrf.mxu0  ;;  %v1821_v31 = vpop.f32.mrf.mxu1  ;;  %2330 = vmatmul.f32.gmra.mxu3 %v5447_v27  ;;  %v939_v50 = vld [vmem:[#allocation2 + $0x218] sm:$0xff] }
 0x386   : > { %v1822_v52 = vadd.f32 %v1821_v31, %v1732_v38  ;;  %v6579_v38 = vld [vmem:[#allocation36_spill] sm:$0xff] }
 0x387   : > { %2934 = vst [vmem:[#allocation2 + $0x230] sm:$0xff] %v2814_v10 }
 0x388   : > { %v1910_v14 = vpop.f32.mrf.mxu2  ;;  %2063 = vmatmul.f32.gmra.mxu0 %v5451_v5  ;;  %2152 = vmatmul.f32.gmra.mxu1 %v5455_v44  ;;  %v1999_v36 = vpop.f32.mrf.mxu3  ;;  %v786_v5 = vld [vmem:[%s4454_s12 + $0x890] sm:$0xff] }
 0x389   : > { %v1911_v20 = vadd.f32 %v1910_v14, %v1822_v52  ;;  %2652 = vmatpush.msra.mxu3 %v786_v5  ;;  %v6580_v14 = vld [vmem:[#allocation37_spill] sm:$0xff]  ;;  %v611_v5 = vld [vmem:[%s4454_s12 + $0x318] sm:$0xff] }
 0x38b   : > { %v2000_v47 = vadd.f32 %v1999_v36, %v1911_v20  ;;  %2653 = vmatpush.msra.mxu3 %v781_v4  ;;  %v691_v20 = vld [vmem:[%s4454_s12 + $0x598] sm:$0xff] }
 0x38d   : > { %v2819_v41 = vadd.f32 %v2000_v47, %v919_v48  ;;  %2244 = vmatmul.f32.gmra.mxu2 %v5460_v16  ;;  %v1735_v27 = vpop.f32.mrf.mxu0  ;;  %v1824_v61 = vpop.f32.mrf.mxu1  ;;  %2333 = vmatmul.f32.gmra.mxu3 %v5464_v8  ;;  %v924_v16 = vld [vmem:[#allocation2 + $0x180] sm:$0xff]  ;;  %v6581_v47 = vld [vmem:[#allocation38_spill] sm:$0xff] }
 0x38e   : > { %v1825_v54 = vadd.f32 %v1824_v61, %v1735_v27  ;;  %2654 = vmatpush.msra.mxu3 %v776_v6  ;;  %v761_v6 = vld [vmem:[%s4454_s12 + $0x7c8] sm:$0xff] }
 0x38f   : > { %2939 = vst [vmem:[#allocation2 + $0x28] sm:$0xff] %v2819_v41  ;;  %v6582_v41 = vld [vmem:[#allocation39_spill] sm:$0xff] }
 0x390   : > { %v1913_v44 = vpop.f32.mrf.mxu2  ;;  %2066 = vmatmul.f32.gmra.mxu0 %v5471_v45  ;;  %2155 = vmatmul.f32.gmra.mxu1 %v5475_v25  ;;  %v2002_v58 = vpop.f32.mrf.mxu3  ;;  %v701_v25 = vld [vmem:[%s4454_s12 + $0x5e8] sm:$0xff] }
 0x391   : > { %v1914_v15 = vadd.f32 %v1913_v44, %v1825_v54  ;;  %2564 = vmatpush.msra.mxu2 %v701_v25  ;;  %2655 = vmatpush.msra.mxu3 %v771_v33  ;;  %v531_v54 = vld [vmem:[%s4454_s12 + $0x98] sm:$0xff]  ;;  %v6597_v33 = vld [vmem:[#allocation54_spill] sm:$0xff] }
 0x392   : > { %2388 = vmatpush.msra.mxu0 %v531_v54 }
 0x393   : > { %v2003_v28 = vadd.f32 %v2002_v58, %v1914_v15  ;;  %2565 = vmatpush.msra.mxu2 %v696_v63  ;;  %v6583_v58 = vld [vmem:[#allocation40_spill] sm:$0xff] }
 0x394   : > { %v835_v63 = vld [vmem:[#allocation2 + $0x18] sm:$0xff] }
 0x395   : > { %v2824_v8 = vadd.f32 %v2003_v28, %v924_v16  ;;  %2247 = vmatmul.f32.gmra.mxu2 %v5479_v37  ;;  %v1738_v7 = vpop.f32.mrf.mxu0  ;;  %v1827_v1 = vpop.f32.mrf.mxu1  ;;  %2336 = vmatmul.f32.gmra.mxu3 %v5483_v56  ;;  %v621_v37 = vld [vmem:[%s4454_s12 + $0x368] sm:$0xff] }
 0x396   : > { %v1828_v45 = vadd.f32 %v1827_v1, %v1738_v7  ;;  %2475 = vmatpush.msra.mxu1 %v621_v37  ;;  %2566 = vmatpush.msra.mxu2 %v691_v20  ;;  %v6584_v28 = vld [vmem:[#allocation41_spill] sm:$0xff]  ;;  %v6585_v1 = vld [vmem:[#allocation42_spill] sm:$0xff]  ;;  %v6587_v37 = vld [vmem:[#allocation44_spill] sm:$0xff] }
 0x397   : > { %2944 = vst [vmem:[#allocation2 + $0x180] sm:$0xff] %v2824_v8 }
 0x398   : > { %v1916_v40 = vpop.f32.mrf.mxu2  ;;  %2069 = vmatmul.f32.gmra.mxu0 %v5489_v3  ;;  %2158 = vmatmul.f32.gmra.mxu1 %v5493_v39  ;;  %v2005_v51 = vpop.f32.mrf.mxu3 }
 0x399   : > { %v1917_v29 = vadd.f32 %v1916_v40, %v1828_v45  ;;  %2476 = vmatpush.msra.mxu1 %v616_v34  ;;  %v6586_v45 = vld [vmem:[#allocation43_spill] sm:$0xff]  ;;  %v6593_v34 = vld [vmem:[#allocation50_spill] sm:$0xff] }
 0x39a   : > { %v686_v40 = vld [vmem:[%s4454_s12 + $0x570] sm:$0xff] }
 0x39b   : > { %v2006_v56 = vadd.f32 %v2005_v51, %v1917_v29  ;;  %2477 = vmatpush.msra.mxu1 %v611_v5  ;;  %v949_v51 = vld [vmem:[#allocation2 + $0x1c8] sm:$0xff]  ;;  %2567 = vmatpush.msra.mxu2 %v686_v40  ;;  %v850_v40 = vld [vmem:[#allocation2 + $0x338] sm:$0xff] }
 0x39d   : > { %v2829_v12 = vadd.f32 %v2006_v56, %v929_v13  ;;  %2250 = vmatmul.f32.gmra.mxu2 %v5499_v30  ;;  %v1741_v2 = vpop.f32.mrf.mxu0  ;;  %v1830_v57 = vpop.f32.mrf.mxu1  ;;  %2339 = vmatmul.f32.gmra.mxu3 %v6572_v11  ;;  %v526_v11 = vld [vmem:[%s4454_s12 + $0x70] sm:$0xff] }
 0x39e   : > { %v1831_v3 = vadd.f32 %v1830_v57, %v1741_v2  ;;  %v766_v57 = vld [vmem:[%s4454_s12 + $0x7f0] sm:$0xff]  ;;  %2389 = vmatpush.msra.mxu0 %v526_v11 }
 0x39f   : > { %2949 = vst [vmem:[#allocation2 + $0x1a0] sm:$0xff] %v2829_v12  ;;  %v6588_v12 = vld [vmem:[#allocation45_spill] sm:$0xff]  ;;  %2656 = vmatpush.msra.mxu3 %v766_v57  ;;  %v6605_v57 = vld [vmem:[#allocation62_spill] sm:$0xff]  ;;  %v6606_v11 = vld [vmem:[#allocation63_spill] sm:$0xff] }
 0x3a0   : > { %v1919_v39 = vpop.f32.mrf.mxu2  ;;  %2072 = vmatmul.f32.gmra.mxu0 %v6573_v55  ;;  %2161 = vmatmul.f32.gmra.mxu1 %v6574_v46  ;;  %v2008_v22 = vpop.f32.mrf.mxu3  ;;  %v6589_v55 = vld [vmem:[#allocation46_spill] sm:$0xff]  ;;  %v6590_v46 = vld [vmem:[#allocation47_spill] sm:$0xff] }
 0x3a1   : > { %v1920_v18 = vadd.f32 %v1919_v39, %v1831_v3  ;;  %v606_v3 = vld [vmem:[%s4454_s12 + $0x2f0] sm:$0xff]  ;;  %2657 = vmatpush.msra.mxu3 %v761_v6 }
 0x3a2   : > { %2478 = vmatpush.msra.mxu1 %v606_v3  ;;  %v860_v6 = vld [vmem:[#allocation2 + $0x1b0] sm:$0xff] }
 0x3a3   : > { %v2009_v30 = vadd.f32 %v2008_v22, %v1920_v18 }
 0x3a5   : > { %v2834_v23 = vadd.f32 %v2009_v30, %v934_v43  ;;  %2253 = vmatmul.f32.gmra.mxu2 %v6575_v0  ;;  %v1744_v62 = vpop.f32.mrf.mxu0  ;;  %v1833_v53 = vpop.f32.mrf.mxu1  ;;  %2342 = vmatmul.f32.gmra.mxu3 %v6576_v24 }
 0x3a6   : > { %v1834_v26 = vadd.f32 %v1833_v53, %v1744_v62  ;;  %v6592_v53 = vld [vmem:[#allocation49_spill] sm:$0xff] }
 0x3a7   : > { %2954 = vst [vmem:[#allocation2 + $0x10] sm:$0xff] %v2834_v23  ;;  %v6591_v23 = vld [vmem:[#allocation48_spill] sm:$0xff] }
 0x3a8   : > { %v1922_v9 = vpop.f32.mrf.mxu2  ;;  %2075 = vmatmul.f32.gmra.mxu0 %v6577_v49  ;;  %2164 = vmatmul.f32.gmra.mxu1 %v6578_v60  ;;  %v2011_v42 = vpop.f32.mrf.mxu3 }
 0x3a9   : > { %v1923_v19 = vadd.f32 %v1922_v9, %v1834_v26  ;;  %v681_v26 = vld [vmem:[%s4454_s12 + $0x548] sm:$0xff]  ;;  %v6594_v9 = vld [vmem:[#allocation51_spill] sm:$0xff] }
 0x3aa   : > { %2568 = vmatpush.msra.mxu2 %v681_v26 }
 0x3ab   : > { %v2012_v21 = vadd.f32 %v2011_v42, %v1923_v19  ;;  %v521_v42 = vld [vmem:[%s4454_s12 + $0x48] sm:$0xff] }
 0x3ac   : > { %v601_v19 = vld [vmem:[%s4454_s12 + $0x2c8] sm:$0xff]  ;;  %2390 = vmatpush.msra.mxu0 %v521_v42 }
 0x3ad   : > { %v2839_v10 = vadd.f32 %v2012_v21, %v939_v50  ;;  %2256 = vmatmul.f32.gmra.mxu2 %v6579_v38  ;;  %v1747_v31 = vpop.f32.mrf.mxu0  ;;  %v1836_v52 = vpop.f32.mrf.mxu1  ;;  %2345 = vmatmul.f32.gmra.mxu3 %v6580_v14  ;;  %v840_v50 = vld [vmem:[#allocation2 + $0x380] sm:$0xff] }
 0x3ae   : > { %v1837_v36 = vadd.f32 %v1836_v52, %v1747_v31  ;;  %2479 = vmatpush.msra.mxu1 %v601_v19  ;;  %v6595_v38 = vld [vmem:[#allocation52_spill] sm:$0xff]  ;;  %v6596_v14 = vld [vmem:[#allocation53_spill] sm:$0xff] }
 0x3af   : > { %2959 = vst [vmem:[#allocation2 + $0x218] sm:$0xff] %v2839_v10  ;;  %v6612_v42 = vld [vmem:[#allocation69_spill] sm:$0xff] }
 0x3b0   : > { %v1925_v48 = vpop.f32.mrf.mxu2  ;;  %2078 = vmatmul.f32.gmra.mxu0 %v6581_v47  ;;  %2167 = vmatmul.f32.gmra.mxu1 %v6582_v41  ;;  %v2014_v27 = vpop.f32.mrf.mxu3 }
 0x3b1   : > { %v1926_v61 = vadd.f32 %v1925_v48, %v1837_v36  ;;  %v6598_v48 = vld [vmem:[#allocation55_spill] sm:$0xff] }
 0x3b3   : > { %v2015_v35 = vadd.f32 %v2014_v27, %v1926_v61  ;;  %v676_v27 = vld [vmem:[%s4454_s12 + $0x520] sm:$0xff]  ;;  %v845_v61 = vld [vmem:[#allocation2 + $0x150] sm:$0xff] }
 0x3b4   : > { %2569 = vmatpush.msra.mxu2 %v676_v27 }
 0x3b5   : > { %v2844_v44 = vadd.f32 %v2015_v35, %v944_v17  ;;  %2259 = vmatmul.f32.gmra.mxu2 %v6583_v58  ;;  %v1750_v15 = vpop.f32.mrf.mxu0  ;;  %v1839_v16 = vpop.f32.mrf.mxu1  ;;  %2348 = vmatmul.f32.gmra.mxu3 %v6584_v28  ;;  %v6599_v17 = vld [vmem:[#allocation56_spill] sm:$0xff]  ;;  %v6600_v58 = vld [vmem:[#allocation57_spill] sm:$0xff] }
 0x3b6   : > { %v1840_v8 = vadd.f32 %v1839_v16, %v1750_v15  ;;  %v756_v16 = vld [vmem:[%s4454_s12 + $0x7a0] sm:$0xff] }
 0x3b7   : > { %2964 = vst [vmem:[#allocation2 + $0x240] sm:$0xff] %v2844_v44  ;;  %v516_v28 = vld [vmem:[%s4454_s12 + $0x20] sm:$0xff]  ;;  %2658 = vmatpush.msra.mxu3 %v756_v16 }
 0x3b8   : > { %v1928_v7 = vpop.f32.mrf.mxu2  ;;  %2081 = vmatmul.f32.gmra.mxu0 %v6585_v1  ;;  %2170 = vmatmul.f32.gmra.mxu1 %v6586_v45  ;;  %v2017_v25 = vpop.f32.mrf.mxu3  ;;  %v6601_v1 = vld [vmem:[#allocation58_spill] sm:$0xff]  ;;  %v6602_v45 = vld [vmem:[#allocation59_spill] sm:$0xff] }
 0x3b9   : > { %v1929_v4 = vadd.f32 %v1928_v7, %v1840_v8  ;;  %v596_v8 = vld [vmem:[%s4454_s12 + $0x2a0] sm:$0xff]  ;;  %2391 = vmatpush.msra.mxu0 %v516_v28 }
 0x3ba   : > { %2480 = vmatpush.msra.mxu1 %v596_v8  ;;  %v3891_v8 = vld [vmem:[%s4446_s14 + $0x18] sm:$0xff] }
 0x3bb   : > { %v2018_v29 = vadd.f32 %v2017_v25, %v1929_v4 }
 0x3bd   : > { %v2849_v32 = vadd.f32 %v2018_v29, %v949_v51  ;;  %2262 = vmatmul.f32.gmra.mxu2 %v6587_v37  ;;  %v2037_v13 = vpop.f32.mrf.mxu0  ;;  %v2126_v56 = vpop.f32.mrf.mxu1  ;;  %2351 = vmatmul.f32.gmra.mxu3 %v6588_v12 }
 0x3be   : > { %v2127_v2 = vadd.f32 %v2126_v56, %v2037_v13  ;;  %v6604_v56 = vld [vmem:[#allocation61_spill] sm:$0xff] }
 0x3bf   : > { %2969 = vst [vmem:[#allocation2 + $0x1c8] sm:$0xff] %v2849_v32  ;;  %v6603_v32 = vld [vmem:[#allocation60_spill] sm:$0xff] }
 0x3c0   : > { %v2215_v39 = vpop.f32.mrf.mxu2  ;;  %2084 = vmatmul.f32.gmra.mxu0 %v6589_v55  ;;  %2173 = vmatmul.f32.gmra.mxu1 %v6590_v46  ;;  %v2304_v22 = vpop.f32.mrf.mxu3  ;;  %v855_v55 = vld [vmem:[#allocation2 + $0x168] sm:$0xff] }
 0x3c1   : > { %v2216_v18 = vadd.f32 %v2215_v39, %v2127_v2 }
 0x3c3   : > { %v2305_v43 = vadd.f32 %v2304_v22, %v2216_v18  ;;  %v6607_v18 = vld [vmem:[#allocation64_spill] sm:$0xff] }
 0x3c5   : > { %v2735_v30 = vadd.f32 %v2305_v43, %v835_v63  ;;  %2265 = vmatmul.f32.gmra.mxu2 %v6591_v23  ;;  %v2040_v0 = vpop.f32.mrf.mxu0  ;;  %v2129_v62 = vpop.f32.mrf.mxu1  ;;  %2354 = vmatmul.f32.gmra.mxu3 %v6592_v53  ;;  %v6610_v53 = vld [vmem:[#allocation67_spill] sm:$0xff] }
 0x3c6   : > { %v2130_v24 = vadd.f32 %v2129_v62, %v2040_v0  ;;  %v6609_v62 = vld [vmem:[#allocation66_spill] sm:$0xff] }
 0x3c7   : > { %2855 = vst [vmem:[#allocation2 + $0x18] sm:$0xff] %v2735_v30  ;;  %v6608_v30 = vld [vmem:[#allocation65_spill] sm:$0xff] }
 0x3c8   : > { %v2218_v59 = vpop.f32.mrf.mxu2  ;;  %2087 = vmatmul.f32.gmra.mxu0 %v6593_v34  ;;  %2176 = vmatmul.f32.gmra.mxu1 %v6594_v9  ;;  %v2307_v49 = vpop.f32.mrf.mxu3  ;;  %v6611_v9 = vld [vmem:[#allocation68_spill] sm:$0xff] }
 0x3c9   : > { %v2219_v60 = vadd.f32 %v2218_v59, %v2130_v24 }
 0x3cb   : > { %v2308_v21 = vadd.f32 %v2307_v49, %v2219_v60 }
 0x3cd   : > { %v2740_v10 = vadd.f32 %v2308_v21, %v840_v50  ;;  %2268 = vmatmul.f32.gmra.mxu2 %v6595_v38  ;;  %v2043_v31 = vpop.f32.mrf.mxu0  ;;  %v2132_v52 = vpop.f32.mrf.mxu1  ;;  %2357 = vmatmul.f32.gmra.mxu3 %v6596_v14  ;;  %v6613_v21 = vld [vmem:[#allocation70_spill] sm:$0xff] }
 0x3ce   : > { %v2133_v36 = vadd.f32 %v2132_v52, %v2043_v31  ;;  %v865_v52 = vld [vmem:[#allocation2 + $0x200] sm:$0xff] }
 0x3cf   : > { %2860 = vst [vmem:[#allocation2 + $0x380] sm:$0xff] %v2740_v10  ;;  %v6614_v10 = vld [vmem:[#allocation71_spill] sm:$0xff] }
 0x3d0   : > { %v2221_v20 = vpop.f32.mrf.mxu2  ;;  %2090 = vmatmul.f32.gmra.mxu0 %v6597_v33  ;;  %2179 = vmatmul.f32.gmra.mxu1 %v6598_v48  ;;  %v2310_v47 = vpop.f32.mrf.mxu3 }
 0x3d1   : > { %v2222_v41 = vadd.f32 %v2221_v20, %v2133_v36  ;;  %v6615_v20 = vld [vmem:[#allocation72_spill] sm:$0xff] }
 0x3d3   : > { %v2311_v54 = vadd.f32 %v2310_v47, %v2222_v41  ;;  %v6616_v47 = vld [vmem:[#allocation73_spill] sm:$0xff] }
 0x3d5   : > { %v2745_v5 = vadd.f32 %v2311_v54, %v845_v61  ;;  %2271 = vmatmul.f32.gmra.mxu2 %v6599_v17  ;;  %v2046_v35 = vpop.f32.mrf.mxu0  ;;  %v2135_v44 = vpop.f32.mrf.mxu1  ;;  %2360 = vmatmul.f32.gmra.mxu3 %v6600_v58  ;;  %v6617_v61 = vld [vmem:[#allocation74_spill] sm:$0xff]  ;;  %v6618_v54 = vld [vmem:[#allocation75_spill] sm:$0xff] }
 0x3d6   : > { %v2136_v15 = vadd.f32 %v2135_v44, %v2046_v35  ;;  %v870_v35 = vld [vmem:[#allocation2 + $0x188] sm:$0xff] }
 0x3d7   : > { %2865 = vst [vmem:[#allocation2 + $0x150] sm:$0xff] %v2745_v5 }
 0x3d8   : > { %v2224_v7 = vpop.f32.mrf.mxu2  ;;  %2093 = vmatmul.f32.gmra.mxu0 %v6601_v1  ;;  %2182 = vmatmul.f32.gmra.mxu1 %v6602_v45  ;;  %v2313_v25 = vpop.f32.mrf.mxu3  ;;  %v3892_v45 = vld [vmem:[%s4446_s14] sm:$0xff] }
 0x3d9   : > { %v2225_v4 = vadd.f32 %v2224_v7, %v2136_v15  ;;  %v3890_v15 = vld [vmem:[%s4446_s14 + $0x10] sm:$0xff] }
 0x3db   : > { %v2314_v51 = vadd.f32 %v2313_v25, %v2225_v4  ;;  %v3893_v25 = vld [vmem:[%s4446_s14 + $0x8] sm:$0xff] }
 0x3dd   : > { %v2750_v29 = vadd.f32 %v2314_v51, %v850_v40  ;;  %2274 = vmatmul.f32.gmra.mxu2 %v6603_v32  ;;  %v2049_v37 = vpop.f32.mrf.mxu0  ;;  %v2138_v13 = vpop.f32.mrf.mxu1  ;;  %2363 = vmatmul.f32.gmra.mxu3 %v6604_v56  ;;  %v875_v51 = vld [vmem:[#allocation2 + $0x210] sm:$0xff] }
 0x3de   : > { %v2139_v12 = vadd.f32 %v2138_v13, %v2049_v37  ;;  %v3894_v37 = vld [vmem:[%s4446_s14 + $0x30] sm:$0xff] }
 0x3df   : > { %2870 = vst [vmem:[#allocation2 + $0x338] sm:$0xff] %v2750_v29 }
 0x3e0   : > { %v2227_v2 = vpop.f32.mrf.mxu2  ;;  %2096 = vmatmul.f32.gmra.mxu0 %v6605_v57  ;;  %2185 = vmatmul.f32.gmra.mxu1 %v6606_v11  ;;  %v2316_v3 = vpop.f32.mrf.mxu3  ;;  %v3896_v11 = vld [vmem:[%s4446_s14 + $0x20] sm:$0xff] }
 0x3e1   : > { %v2228_v39 = vadd.f32 %v2227_v2, %v2139_v12  ;;  %v3895_v12 = vld [vmem:[%s4446_s14 + $0x38] sm:$0xff] }
 0x3e3   : > { %v2317_v46 = vadd.f32 %v2316_v3, %v2228_v39  ;;  %v3897_v3 = vld [vmem:[%s4446_s14 + $0x28] sm:$0xff] }
 0x3e5   : > { %v2755_v22 = vadd.f32 %v2317_v46, %v855_v55  ;;  %2277 = vmatmul.f32.gmra.mxu2 %v6607_v18  ;;  %v2052_v63 = vpop.f32.mrf.mxu0  ;;  %v2141_v43 = vpop.f32.mrf.mxu1  ;;  %2366 = vmatmul.f32.gmra.mxu3 %v6608_v30  ;;  %v880_v46 = vld [vmem:[#allocation2 + $0x358] sm:$0xff] }
 0x3e6   : > { %v2142_v23 = vadd.f32 %v2141_v43, %v2052_v63  ;;  %v3898_v63 = vld [vmem:[%s4446_s14 + $0x50] sm:$0xff] }
 0x3e7   : > { %2875 = vst [vmem:[#allocation2 + $0x168] sm:$0xff] %v2755_v22 }
 0x3e8   : > { %v2230_v0 = vpop.f32.mrf.mxu2  ;;  %2099 = vmatmul.f32.gmra.mxu0 %v6609_v62  ;;  %2188 = vmatmul.f32.gmra.mxu1 %v6610_v53  ;;  %v2319_v24 = vpop.f32.mrf.mxu3  ;;  %v3900_v53 = vld [vmem:[%s4446_s14 + $0x40] sm:$0xff] }
 0x3e9   : > { %v2231_v26 = vadd.f32 %v2230_v0, %v2142_v23  ;;  %v3899_v23 = vld [vmem:[%s4446_s14 + $0x58] sm:$0xff] }
 0x3eb   : > { %v2320_v59 = vadd.f32 %v2319_v24, %v2231_v26  ;;  %v3901_v24 = vld [vmem:[%s4446_s14 + $0x48] sm:$0xff] }
 0x3ed   : > { %v2760_v34 = vadd.f32 %v2320_v59, %v860_v6  ;;  %2280 = vmatmul.f32.gmra.mxu2 %v6611_v9  ;;  %v2055_v49 = vpop.f32.mrf.mxu0  ;;  %v2144_v60 = vpop.f32.mrf.mxu1  ;;  %2369 = vmatmul.f32.gmra.mxu3 %v6612_v42  ;;  %v885_v59 = vld [vmem:[#allocation2 + $0x158] sm:$0xff] }
 0x3ee   : > { %v2145_v19 = vadd.f32 %v2144_v60, %v2055_v49  ;;  %v3902_v49 = vld [vmem:[%s4446_s14 + $0x70] sm:$0xff] }
 0x3ef   : > { %2880 = vst [vmem:[#allocation2 + $0x1b0] sm:$0xff] %v2760_v34 }
 0x3f0   : > { %v2233_v50 = vpop.f32.mrf.mxu2  ;;  %2102 = vmatmul.f32.gmra.mxu0 %v6613_v21  ;;  %2191 = vmatmul.f32.gmra.mxu1 %v6614_v10  ;;  %v2322_v38 = vpop.f32.mrf.mxu3  ;;  %v3904_v10 = vld [vmem:[%s4446_s14 + $0x60] sm:$0xff] }
 0x3f1   : > { %v2234_v31 = vadd.f32 %v2233_v50, %v2145_v19  ;;  %v3903_v19 = vld [vmem:[%s4446_s14 + $0x78] sm:$0xff] }
 0x3f3   : > { %v2323_v14 = vadd.f32 %v2322_v38, %v2234_v31  ;;  %v3905_v38 = vld [vmem:[%s4446_s14 + $0x68] sm:$0xff] }
 0x3f5   : > { %v2765_v36 = vadd.f32 %v2323_v14, %v865_v52  ;;  %2283 = vmatmul.f32.gmra.mxu2 %v6615_v20  ;;  %v2058_v33 = vpop.f32.mrf.mxu0  ;;  %v2147_v48 = vpop.f32.mrf.mxu1  ;;  %2372 = vmatmul.f32.gmra.mxu3 %v6616_v47  ;;  %v890_v14 = vld [vmem:[#allocation2 + $0x40] sm:$0xff] }
 0x3f6   : > { %v2148_v41 = vadd.f32 %v2147_v48, %v2058_v33  ;;  %v3906_v33 = vld [vmem:[%s4446_s14 + $0x90] sm:$0xff] }
 0x3f7   : > { %2885 = vst [vmem:[#allocation2 + $0x200] sm:$0xff] %v2765_v36 }
 0x3f8   : > { %v2236_v27 = vpop.f32.mrf.mxu2  ;;  %2105 = vmatmul.f32.gmra.mxu0 %v6617_v61  ;;  %2194 = vmatmul.f32.gmra.mxu1 %v6618_v54  ;;  %v2325_v5 = vpop.f32.mrf.mxu3  ;;  %v3908_v54 = vld [vmem:[%s4446_s14 + $0x80] sm:$0xff] }
 0x3f9   : > { %v2237_v17 = vadd.f32 %v2236_v27, %v2148_v41  ;;  %v3907_v41 = vld [vmem:[%s4446_s14 + $0x98] sm:$0xff] }
 0x3fb   : > { %v2326_v44 = vadd.f32 %v2325_v5, %v2237_v17  ;;  %v3909_v5 = vld [vmem:[%s4446_s14 + $0x88] sm:$0xff] }
 0x3fd   : > { %v2770_v58 = vadd.f32 %v2326_v44, %v870_v35  ;;  %2570 = vmatmul.f32.vlgmr.msra.gmra.mxu2 %v3890_v15  ;;  %v2061_v16 = vpop.f32.mrf.mxu0  ;;  %v2150_v28 = vpop.f32.mrf.mxu1  ;;  %2659 = vmatmul.f32.vlgmr.msra.gmra.mxu3 %v3891_v8  ;;  %v895_v44 = vld [vmem:[#allocation2 + $0x2d0] sm:$0xff] }
 0x3fe   : > { %v2151_v7 = vadd.f32 %v2150_v28, %v2061_v16  ;;  %v3910_v16 = vld [vmem:[%s4446_s14 + $0xb0] sm:$0xff] }
 0x3ff   : > { %2890 = vst [vmem:[#allocation2 + $0x188] sm:$0xff] %v2770_v58 }
 0x400   : > { %v2239_v1 = vpop.f32.mrf.mxu2  ;;  %2392 = vmatmul.f32.vlgmr.msra.gmra.mxu0 %v3892_v45  ;;  %2481 = vmatmul.f32.vlgmr.msra.gmra.mxu1 %v3893_v25  ;;  %v2328_v4 = vpop.f32.mrf.mxu3  ;;  %v3912_v25 = vld [vmem:[%s4446_s14 + $0xa0] sm:$0xff] }
 0x401   : > { %v2240_v40 = vadd.f32 %v2239_v1, %v2151_v7  ;;  %v3911_v7 = vld [vmem:[%s4446_s14 + $0xb8] sm:$0xff] }
 0x403   : > { %v2329_v29 = vadd.f32 %v2328_v4, %v2240_v40  ;;  %v3913_v4 = vld [vmem:[%s4446_s14 + $0xa8] sm:$0xff] }
 0x405   : > { %v2775_v32 = vadd.f32 %v2329_v29, %v875_v51  ;;  %2573 = vmatmul.f32.gmra.mxu2 %v3894_v37  ;;  %v2064_v13 = vpop.f32.mrf.mxu0  ;;  %v2153_v56 = vpop.f32.mrf.mxu1  ;;  %2662 = vmatmul.f32.gmra.mxu3 %v3895_v12  ;;  %v900_v29 = vld [vmem:[#allocation2 + $0x280] sm:$0xff] }
 0x406   : > { %v2154_v2 = vadd.f32 %v2153_v56, %v2064_v13  ;;  %v3914_v13 = vld [vmem:[%s4446_s14 + $0xd0] sm:$0xff] }
 0x407   : > { %2895 = vst [vmem:[#allocation2 + $0x210] sm:$0xff] %v2775_v32 }
 0x408   : > { %v2242_v57 = vpop.f32.mrf.mxu2  ;;  %2395 = vmatmul.f32.gmra.mxu0 %v3896_v11  ;;  %2484 = vmatmul.f32.gmra.mxu1 %v3897_v3  ;;  %v2331_v39 = vpop.f32.mrf.mxu3  ;;  %v3916_v3 = vld [vmem:[%s4446_s14 + $0xc0] sm:$0xff] }
 0x409   : > { %v2243_v55 = vadd.f32 %v2242_v57, %v2154_v2  ;;  %v3915_v2 = vld [vmem:[%s4446_s14 + $0xd8] sm:$0xff] }
 0x40b   : > { %v2332_v22 = vadd.f32 %v2331_v39, %v2243_v55  ;;  %v3917_v39 = vld [vmem:[%s4446_s14 + $0xc8] sm:$0xff] }
 0x40d   : > { %v2780_v18 = vadd.f32 %v2332_v22, %v880_v46  ;;  %2576 = vmatmul.f32.gmra.mxu2 %v3898_v63  ;;  %v2067_v43 = vpop.f32.mrf.mxu0  ;;  %v2156_v30 = vpop.f32.mrf.mxu1  ;;  %2665 = vmatmul.f32.gmra.mxu3 %v3899_v23  ;;  %v905_v22 = vld [vmem:[#allocation2 + $0x250] sm:$0xff] }
 0x40e   : > { %v2157_v0 = vadd.f32 %v2156_v30, %v2067_v43  ;;  %v3918_v43 = vld [vmem:[%s4446_s14 + $0xf0] sm:$0xff] }
 0x40f   : > { %2900 = vst [vmem:[#allocation2 + $0x358] sm:$0xff] %v2780_v18 }
 0x410   : > { %v2245_v62 = vpop.f32.mrf.mxu2  ;;  %2398 = vmatmul.f32.gmra.mxu0 %v3900_v53  ;;  %2487 = vmatmul.f32.gmra.mxu1 %v3901_v24  ;;  %v2334_v26 = vpop.f32.mrf.mxu3  ;;  %v3920_v24 = vld [vmem:[%s4446_s14 + $0xe0] sm:$0xff] }
 0x411   : > { %v2246_v6 = vadd.f32 %v2245_v62, %v2157_v0  ;;  %v3919_v0 = vld [vmem:[%s4446_s14 + $0xf8] sm:$0xff] }
 0x413   : > { %v2335_v34 = vadd.f32 %v2334_v26, %v2246_v6  ;;  %v3921_v26 = vld [vmem:[%s4446_s14 + $0xe8] sm:$0xff] }
 0x415   : > { %v2785_v9 = vadd.f32 %v2335_v34, %v885_v59  ;;  %2579 = vmatmul.f32.gmra.mxu2 %v3902_v49  ;;  %v2070_v60 = vpop.f32.mrf.mxu0  ;;  %v2159_v42 = vpop.f32.mrf.mxu1  ;;  %2668 = vmatmul.f32.gmra.mxu3 %v3903_v19  ;;  %v910_v34 = vld [vmem:[#allocation2 + $0xa0] sm:$0xff] }
 0x416   : > { %v2160_v50 = vadd.f32 %v2159_v42, %v2070_v60  ;;  %v3922_v60 = vld [vmem:[%s4446_s14 + $0x110] sm:$0xff] }
 0x417   : > { %2905 = vst [vmem:[#allocation2 + $0x158] sm:$0xff] %v2785_v9 }
 0x418   : > { %v2248_v21 = vpop.f32.mrf.mxu2  ;;  %2401 = vmatmul.f32.gmra.mxu0 %v3904_v10  ;;  %2490 = vmatmul.f32.gmra.mxu1 %v3905_v38  ;;  %v2337_v31 = vpop.f32.mrf.mxu3  ;;  %v3924_v38 = vld [vmem:[%s4446_s14 + $0x100] sm:$0xff] }
 0x419   : > { %v2249_v52 = vadd.f32 %v2248_v21, %v2160_v50  ;;  %v3923_v50 = vld [vmem:[%s4446_s14 + $0x118] sm:$0xff] }
 0x41b   : > { %v2338_v36 = vadd.f32 %v2337_v31, %v2249_v52  ;;  %v3925_v31 = vld [vmem:[%s4446_s14 + $0x108] sm:$0xff] }
 0x41d   : > { %v2790_v20 = vadd.f32 %v2338_v36, %v890_v14  ;;  %2582 = vmatmul.f32.gmra.mxu2 %v3906_v33  ;;  %v2073_v48 = vpop.f32.mrf.mxu0  ;;  %v2162_v47 = vpop.f32.mrf.mxu1  ;;  %2671 = vmatmul.f32.gmra.mxu3 %v3907_v41  ;;  %v915_v36 = vld [vmem:[#allocation2 + $0x298] sm:$0xff] }
 0x41e   : > { %v2163_v27 = vadd.f32 %v2162_v47, %v2073_v48  ;;  %v3926_v48 = vld [vmem:[%s4446_s14 + $0x130] sm:$0xff] }
 0x41f   : > { %2910 = vst [vmem:[#allocation2 + $0x40] sm:$0xff] %v2790_v20 }
 0x420   : > { %v2251_v61 = vpop.f32.mrf.mxu2  ;;  %2404 = vmatmul.f32.gmra.mxu0 %v3908_v54  ;;  %2493 = vmatmul.f32.gmra.mxu1 %v3909_v5  ;;  %v2340_v17 = vpop.f32.mrf.mxu3  ;;  %v3928_v5 = vld [vmem:[%s4446_s14 + $0x120] sm:$0xff] }
 0x421   : > { %v2252_v35 = vadd.f32 %v2251_v61, %v2163_v27  ;;  %v3927_v27 = vld [vmem:[%s4446_s14 + $0x138] sm:$0xff] }
 0x423   : > { %v2341_v58 = vadd.f32 %v2340_v17, %v2252_v35  ;;  %v3929_v17 = vld [vmem:[%s4446_s14 + $0x128] sm:$0xff] }
 0x425   : > { %v2795_v15 = vadd.f32 %v2341_v58, %v895_v44  ;;  %2585 = vmatmul.f32.gmra.mxu2 %v3910_v16  ;;  %v2076_v28 = vpop.f32.mrf.mxu0  ;;  %v2165_v8 = vpop.f32.mrf.mxu1  ;;  %2674 = vmatmul.f32.gmra.mxu3 %v3911_v7  ;;  %v920_v58 = vld [vmem:[#allocation2 + $0x120] sm:$0xff] }
 0x426   : > { %v2166_v1 = vadd.f32 %v2165_v8, %v2076_v28  ;;  %v3930_v28 = vld [vmem:[%s4446_s14 + $0x150] sm:$0xff] }
 0x427   : > { %2915 = vst [vmem:[#allocation2 + $0x2d0] sm:$0xff] %v2795_v15 }
 0x428   : > { %v2254_v45 = vpop.f32.mrf.mxu2  ;;  %2407 = vmatmul.f32.gmra.mxu0 %v3912_v25  ;;  %2496 = vmatmul.f32.gmra.mxu1 %v3913_v4  ;;  %v2343_v40 = vpop.f32.mrf.mxu3  ;;  %v3932_v4 = vld [vmem:[%s4446_s14 + $0x140] sm:$0xff] }
 0x429   : > { %v2255_v51 = vadd.f32 %v2254_v45, %v2166_v1  ;;  %v3931_v1 = vld [vmem:[%s4446_s14 + $0x158] sm:$0xff] }
 0x42b   : > { %v2344_v32 = vadd.f32 %v2343_v40, %v2255_v51  ;;  %v3933_v40 = vld [vmem:[%s4446_s14 + $0x148] sm:$0xff] }
 0x42d   : > { %v2800_v37 = vadd.f32 %v2344_v32, %v900_v29  ;;  %2588 = vmatmul.f32.gmra.mxu2 %v3914_v13  ;;  %v2079_v56 = vpop.f32.mrf.mxu0  ;;  %v2168_v12 = vpop.f32.mrf.mxu1  ;;  %2677 = vmatmul.f32.gmra.mxu3 %v3915_v2  ;;  %v925_v32 = vld [vmem:[#allocation2 + $0x378] sm:$0xff] }
 0x42e   : > { %v2169_v57 = vadd.f32 %v2168_v12, %v2079_v56  ;;  %v3934_v56 = vld [vmem:[%s4446_s14 + $0x170] sm:$0xff] }
 0x42f   : > { %2920 = vst [vmem:[#allocation2 + $0x280] sm:$0xff] %v2800_v37 }
 0x430   : > { %v2257_v11 = vpop.f32.mrf.mxu2  ;;  %2410 = vmatmul.f32.gmra.mxu0 %v3916_v3  ;;  %2499 = vmatmul.f32.gmra.mxu1 %v3917_v39  ;;  %v2346_v55 = vpop.f32.mrf.mxu3  ;;  %v3936_v39 = vld [vmem:[%s4446_s14 + $0x160] sm:$0xff] }
 0x431   : > { %v2258_v46 = vadd.f32 %v2257_v11, %v2169_v57  ;;  %v3935_v57 = vld [vmem:[%s4446_s14 + $0x178] sm:$0xff] }
 0x433   : > { %v2347_v18 = vadd.f32 %v2346_v55, %v2258_v46  ;;  %v3937_v55 = vld [vmem:[%s4446_s14 + $0x168] sm:$0xff] }
 0x435   : > { %v2805_v63 = vadd.f32 %v2347_v18, %v905_v22  ;;  %2591 = vmatmul.f32.gmra.mxu2 %v3918_v43  ;;  %v2082_v30 = vpop.f32.mrf.mxu0  ;;  %v2171_v23 = vpop.f32.mrf.mxu1  ;;  %2680 = vmatmul.f32.gmra.mxu3 %v3919_v0  ;;  %v930_v18 = vld [vmem:[#allocation2 + $0x58] sm:$0xff] }
 0x436   : > { %v2172_v62 = vadd.f32 %v2171_v23, %v2082_v30  ;;  %v3938_v30 = vld [vmem:[%s4446_s14 + $0x190] sm:$0xff] }
 0x437   : > { %2925 = vst [vmem:[#allocation2 + $0x250] sm:$0xff] %v2805_v63 }
 0x438   : > { %v2260_v53 = vpop.f32.mrf.mxu2  ;;  %2413 = vmatmul.f32.gmra.mxu0 %v3920_v24  ;;  %2502 = vmatmul.f32.gmra.mxu1 %v3921_v26  ;;  %v2349_v6 = vpop.f32.mrf.mxu3  ;;  %v3940_v26 = vld [vmem:[%s4446_s14 + $0x180] sm:$0xff] }
 0x439   : > { %v2261_v59 = vadd.f32 %v2260_v53, %v2172_v62  ;;  %v3939_v62 = vld [vmem:[%s4446_s14 + $0x198] sm:$0xff] }
 0x43b   : > { %v2350_v9 = vadd.f32 %v2349_v6, %v2261_v59  ;;  %v3941_v6 = vld [vmem:[%s4446_s14 + $0x188] sm:$0xff] }
 0x43d   : > { %v2810_v49 = vadd.f32 %v2350_v9, %v910_v34  ;;  %2594 = vmatmul.f32.gmra.mxu2 %v3922_v60  ;;  %v2085_v42 = vpop.f32.mrf.mxu0  ;;  %v2174_v19 = vpop.f32.mrf.mxu1  ;;  %2683 = vmatmul.f32.gmra.mxu3 %v3923_v50  ;;  %v935_v9 = vld [vmem:[#allocation2 + $0x268] sm:$0xff] }
 0x43e   : > { %v2175_v21 = vadd.f32 %v2174_v19, %v2085_v42  ;;  %v3942_v42 = vld [vmem:[%s4446_s14 + $0x1b0] sm:$0xff] }
 0x43f   : > { %2930 = vst [vmem:[#allocation2 + $0xa0] sm:$0xff] %v2810_v49 }
 0x440   : > { %v2263_v10 = vpop.f32.mrf.mxu2  ;;  %2416 = vmatmul.f32.gmra.mxu0 %v3924_v38  ;;  %2505 = vmatmul.f32.gmra.mxu1 %v3925_v31  ;;  %v2352_v52 = vpop.f32.mrf.mxu3  ;;  %v3944_v31 = vld [vmem:[%s4446_s14 + $0x1a0] sm:$0xff] }
 0x441   : > { %v2264_v14 = vadd.f32 %v2263_v10, %v2175_v21  ;;  %v3943_v21 = vld [vmem:[%s4446_s14 + $0x1b8] sm:$0xff] }
 0x443   : > { %v2353_v20 = vadd.f32 %v2352_v52, %v2264_v14  ;;  %v3945_v52 = vld [vmem:[%s4446_s14 + $0x1a8] sm:$0xff] }
 0x445   : > { %v2815_v33 = vadd.f32 %v2353_v20, %v915_v36  ;;  %2597 = vmatmul.f32.gmra.mxu2 %v3926_v48  ;;  %v2088_v47 = vpop.f32.mrf.mxu0  ;;  %v2177_v41 = vpop.f32.mrf.mxu1  ;;  %2686 = vmatmul.f32.gmra.mxu3 %v3927_v27  ;;  %v940_v20 = vld [vmem:[#allocation2 + $0x198] sm:$0xff] }
 0x446   : > { %v2178_v61 = vadd.f32 %v2177_v41, %v2088_v47  ;;  %v3946_v47 = vld [vmem:[%s4446_s14 + $0x1d0] sm:$0xff] }
 0x447   : > { %2935 = vst [vmem:[#allocation2 + $0x298] sm:$0xff] %v2815_v33 }
 0x448   : > { %v2266_v54 = vpop.f32.mrf.mxu2  ;;  %2419 = vmatmul.f32.gmra.mxu0 %v3928_v5  ;;  %2508 = vmatmul.f32.gmra.mxu1 %v3929_v17  ;;  %v2355_v35 = vpop.f32.mrf.mxu3  ;;  %v3948_v17 = vld [vmem:[%s4446_s14 + $0x1c0] sm:$0xff] }
 0x449   : > { %v2267_v44 = vadd.f32 %v2266_v54, %v2178_v61  ;;  %v3947_v61 = vld [vmem:[%s4446_s14 + $0x1d8] sm:$0xff] }
 0x44b   : > { %v2356_v15 = vadd.f32 %v2355_v35, %v2267_v44  ;;  %v3949_v35 = vld [vmem:[%s4446_s14 + $0x1c8] sm:$0xff] }
 0x44d   : > { %v2820_v16 = vadd.f32 %v2356_v15, %v920_v58  ;;  %2600 = vmatmul.f32.gmra.mxu2 %v3930_v28  ;;  %v2091_v8 = vpop.f32.mrf.mxu0  ;;  %v2180_v7 = vpop.f32.mrf.mxu1  ;;  %2689 = vmatmul.f32.gmra.mxu3 %v3931_v1  ;;  %v945_v15 = vld [vmem:[#allocation2 + $0x178] sm:$0xff] }
 0x44e   : > { %v2181_v45 = vadd.f32 %v2180_v7, %v2091_v8  ;;  %v3950_v8 = vld [vmem:[%s4446_s14 + $0x1f0] sm:$0xff] }
 0x44f   : > { %2940 = vst [vmem:[#allocation2 + $0x120] sm:$0xff] %v2820_v16 }
 0x450   : > { %v2269_v25 = vpop.f32.mrf.mxu2  ;;  %2422 = vmatmul.f32.gmra.mxu0 %v3932_v4  ;;  %2511 = vmatmul.f32.gmra.mxu1 %v3933_v40  ;;  %v2358_v51 = vpop.f32.mrf.mxu3  ;;  %v3952_v40 = vld [vmem:[%s4446_s14 + $0x1e0] sm:$0xff] }
 0x451   : > { %v2270_v29 = vadd.f32 %v2269_v25, %v2181_v45  ;;  %v3951_v45 = vld [vmem:[%s4446_s14 + $0x1f8] sm:$0xff] }
 0x453   : > { %v2359_v37 = vadd.f32 %v2358_v51, %v2270_v29  ;;  %v3953_v51 = vld [vmem:[%s4446_s14 + $0x1e8] sm:$0xff] }
 0x455   : > { %v2825_v13 = vadd.f32 %v2359_v37, %v925_v32  ;;  %2603 = vmatmul.f32.gmra.mxu2 %v3934_v56  ;;  %v2094_v12 = vpop.f32.mrf.mxu0  ;;  %v2183_v2 = vpop.f32.mrf.mxu1  ;;  %2692 = vmatmul.f32.gmra.mxu3 %v3935_v57  ;;  %v950_v37 = vld [vmem:[#allocation2 + $0x2c8] sm:$0xff] }
 0x456   : > { %v2184_v11 = vadd.f32 %v2183_v2, %v2094_v12  ;;  %v3954_v12 = vld [vmem:[%s4446_s14 + $0x210] sm:$0xff] }
 0x457   : > { %2945 = vst [vmem:[#allocation2 + $0x378] sm:$0xff] %v2825_v13 }
 0x458   : > { %v2272_v3 = vpop.f32.mrf.mxu2  ;;  %2425 = vmatmul.f32.gmra.mxu0 %v3936_v39  ;;  %2514 = vmatmul.f32.gmra.mxu1 %v3937_v55  ;;  %v2361_v46 = vpop.f32.mrf.mxu3  ;;  %v3956_v55 = vld [vmem:[%s4446_s14 + $0x200] sm:$0xff] }
 0x459   : > { %v2273_v22 = vadd.f32 %v2272_v3, %v2184_v11  ;;  %v3955_v11 = vld [vmem:[%s4446_s14 + $0x218] sm:$0xff] }
 0x45b   : > { %v2362_v63 = vadd.f32 %v2361_v46, %v2273_v22  ;;  %v3957_v46 = vld [vmem:[%s4446_s14 + $0x208] sm:$0xff] }
 0x45d   : > { %v2830_v43 = vadd.f32 %v2362_v63, %v930_v18  ;;  %2606 = vmatmul.f32.gmra.mxu2 %v3938_v30  ;;  %v2097_v23 = vpop.f32.mrf.mxu0  ;;  %v2186_v0 = vpop.f32.mrf.mxu1  ;;  %2695 = vmatmul.f32.gmra.mxu3 %v3939_v62  ;;  %v836_v63 = vld [vmem:[#allocation2 + $0x50] sm:$0xff] }
 0x45e   : > { %v2187_v53 = vadd.f32 %v2186_v0, %v2097_v23  ;;  %v3958_v23 = vld [vmem:[%s4446_s14 + $0x230] sm:$0xff] }
 0x45f   : > { %2950 = vst [vmem:[#allocation2 + $0x58] sm:$0xff] %v2830_v43 }
 0x460   : > { %v2275_v24 = vpop.f32.mrf.mxu2  ;;  %2428 = vmatmul.f32.gmra.mxu0 %v3940_v26  ;;  %2517 = vmatmul.f32.gmra.mxu1 %v3941_v6  ;;  %v2364_v59 = vpop.f32.mrf.mxu3  ;;  %v3960_v6 = vld [vmem:[%s4446_s14 + $0x220] sm:$0xff] }
 0x461   : > { %v2276_v34 = vadd.f32 %v2275_v24, %v2187_v53  ;;  %v3959_v53 = vld [vmem:[%s4446_s14 + $0x238] sm:$0xff] }
 0x463   : > { %v2365_v49 = vadd.f32 %v2364_v59, %v2276_v34  ;;  %v3961_v59 = vld [vmem:[%s4446_s14 + $0x228] sm:$0xff] }
 0x465   : > { %v2835_v60 = vadd.f32 %v2365_v49, %v935_v9  ;;  %2609 = vmatmul.f32.gmra.mxu2 %v3942_v42  ;;  %v2100_v19 = vpop.f32.mrf.mxu0  ;;  %v2189_v50 = vpop.f32.mrf.mxu1  ;;  %2698 = vmatmul.f32.gmra.mxu3 %v3943_v21  ;;  %v841_v49 = vld [vmem:[#allocation2 + $0x110] sm:$0xff] }
 0x466   : > { %v2190_v10 = vadd.f32 %v2189_v50, %v2100_v19  ;;  %v3962_v19 = vld [vmem:[%s4446_s14 + $0x250] sm:$0xff] }
 0x467   : > { %2955 = vst [vmem:[#allocation2 + $0x268] sm:$0xff] %v2835_v60 }
 0x468   : > { %v2278_v38 = vpop.f32.mrf.mxu2  ;;  %2431 = vmatmul.f32.gmra.mxu0 %v3944_v31  ;;  %2520 = vmatmul.f32.gmra.mxu1 %v3945_v52  ;;  %v2367_v14 = vpop.f32.mrf.mxu3  ;;  %v3964_v52 = vld [vmem:[%s4446_s14 + $0x240] sm:$0xff] }
 0x469   : > { %v2279_v36 = vadd.f32 %v2278_v38, %v2190_v10  ;;  %v3963_v10 = vld [vmem:[%s4446_s14 + $0x258] sm:$0xff] }
 0x46b   : > { %v2368_v33 = vadd.f32 %v2367_v14, %v2279_v36  ;;  %v3965_v14 = vld [vmem:[%s4446_s14 + $0x248] sm:$0xff] }
 0x46d   : > { %v2840_v48 = vadd.f32 %v2368_v33, %v940_v20  ;;  %2612 = vmatmul.f32.gmra.mxu2 %v3946_v47  ;;  %v2103_v41 = vpop.f32.mrf.mxu0  ;;  %v2192_v27 = vpop.f32.mrf.mxu1  ;;  %2701 = vmatmul.f32.gmra.mxu3 %v3947_v61  ;;  %v846_v33 = vld [vmem:[#allocation2 + $0x108] sm:$0xff] }
 0x46e   : > { %v2193_v54 = vadd.f32 %v2192_v27, %v2103_v41  ;;  %v3966_v41 = vld [vmem:[%s4446_s14 + $0x270] sm:$0xff] }
 0x46f   : > { %2960 = vst [vmem:[#allocation2 + $0x198] sm:$0xff] %v2840_v48 }
 0x470   : > { %v2281_v5 = vpop.f32.mrf.mxu2  ;;  %2434 = vmatmul.f32.gmra.mxu0 %v3948_v17  ;;  %2523 = vmatmul.f32.gmra.mxu1 %v3949_v35  ;;  %v2370_v44 = vpop.f32.mrf.mxu3  ;;  %v3968_v35 = vld [vmem:[%s4446_s14 + $0x260] sm:$0xff] }
 0x471   : > { %v2282_v58 = vadd.f32 %v2281_v5, %v2193_v54  ;;  %v3967_v54 = vld [vmem:[%s4446_s14 + $0x278] sm:$0xff] }
 0x473   : > { %v2371_v16 = vadd.f32 %v2370_v44, %v2282_v58  ;;  %v3969_v44 = vld [vmem:[%s4446_s14 + $0x268] sm:$0xff] }
 0x475   : > { %v2845_v28 = vadd.f32 %v2371_v16, %v945_v15  ;;  %2615 = vmatmul.f32.gmra.mxu2 %v3950_v8  ;;  %v2106_v7 = vpop.f32.mrf.mxu0  ;;  %v2195_v1 = vpop.f32.mrf.mxu1  ;;  %2704 = vmatmul.f32.gmra.mxu3 %v3951_v45  ;;  %v851_v16 = vld [vmem:[#allocation2 + $0x340] sm:$0xff] }
 0x476   : > { %v2196_v25 = vadd.f32 %v2195_v1, %v2106_v7  ;;  %v3970_v7 = vld [vmem:[%s4446_s14 + $0x290] sm:$0xff] }
 0x477   : > { %2965 = vst [vmem:[#allocation2 + $0x178] sm:$0xff] %v2845_v28 }
 0x478   : > { %v2284_v4 = vpop.f32.mrf.mxu2  ;;  %2437 = vmatmul.f32.gmra.mxu0 %v3952_v40  ;;  %2526 = vmatmul.f32.gmra.mxu1 %v3953_v51  ;;  %v2373_v29 = vpop.f32.mrf.mxu3  ;;  %v3972_v51 = vld [vmem:[%s4446_s14 + $0x280] sm:$0xff] }
 0x479   : > { %v2285_v32 = vadd.f32 %v2284_v4, %v2196_v25  ;;  %v3971_v25 = vld [vmem:[%s4446_s14 + $0x298] sm:$0xff] }
 0x47b   : > { %v2374_v13 = vadd.f32 %v2373_v29, %v2285_v32  ;;  %v3973_v29 = vld [vmem:[%s4446_s14 + $0x288] sm:$0xff] }
 0x47d   : > { %v2850_v56 = vadd.f32 %v2374_v13, %v950_v37  ;;  %2618 = vmatmul.f32.gmra.mxu2 %v3954_v12  ;;  %v2393_v2 = vpop.f32.mrf.mxu0  ;;  %v2482_v57 = vpop.f32.mrf.mxu1  ;;  %2707 = vmatmul.f32.gmra.mxu3 %v3955_v11  ;;  %v856_v13 = vld [vmem:[#allocation2 + $0x2f0] sm:$0xff] }
 0x47e   : > { %v2483_v3 = vadd.f32 %v2482_v57, %v2393_v2  ;;  %v3974_v2 = vld [vmem:[%s4446_s14 + $0x2b0] sm:$0xff] }
 0x47f   : > { %2970 = vst [vmem:[#allocation2 + $0x2c8] sm:$0xff] %v2850_v56 }
 0x480   : > { %v2571_v39 = vpop.f32.mrf.mxu2  ;;  %2440 = vmatmul.f32.gmra.mxu0 %v3956_v55  ;;  %2529 = vmatmul.f32.gmra.mxu1 %v3957_v46  ;;  %v2660_v22 = vpop.f32.mrf.mxu3  ;;  %v3976_v46 = vld [vmem:[%s4446_s14 + $0x2a0] sm:$0xff] }
 0x481   : > { %v2572_v18 = vadd.f32 %v2571_v39, %v2483_v3  ;;  %v3975_v3 = vld [vmem:[%s4446_s14 + $0x2b8] sm:$0xff] }
 0x483   : > { %v2661_v43 = vadd.f32 %v2660_v22, %v2572_v18  ;;  %v3977_v22 = vld [vmem:[%s4446_s14 + $0x2a8] sm:$0xff] }
 0x485   : > { %v2736_v30 = vadd.f32 %v2661_v43, %v836_v63  ;;  %2621 = vmatmul.f32.gmra.mxu2 %v3958_v23  ;;  %v2396_v0 = vpop.f32.mrf.mxu0  ;;  %v2485_v62 = vpop.f32.mrf.mxu1  ;;  %2710 = vmatmul.f32.gmra.mxu3 %v3959_v53  ;;  %v861_v43 = vld [vmem:[#allocation2 + $0x270] sm:$0xff] }
 0x486   : > { %v2486_v24 = vadd.f32 %v2485_v62, %v2396_v0  ;;  %v3978_v0 = vld [vmem:[%s4446_s14 + $0x2d0] sm:$0xff] }
 0x487   : > { %2856 = vst [vmem:[#allocation2 + $0x50] sm:$0xff] %v2736_v30 }
 0x488   : > { %v2574_v26 = vpop.f32.mrf.mxu2  ;;  %2443 = vmatmul.f32.gmra.mxu0 %v3960_v6  ;;  %2532 = vmatmul.f32.gmra.mxu1 %v3961_v59  ;;  %v2663_v34 = vpop.f32.mrf.mxu3  ;;  %v3980_v59 = vld [vmem:[%s4446_s14 + $0x2c0] sm:$0xff] }
 0x489   : > { %v2575_v9 = vadd.f32 %v2574_v26, %v2486_v24  ;;  %v3979_v24 = vld [vmem:[%s4446_s14 + $0x2d8] sm:$0xff] }
 0x48b   : > { %v2664_v60 = vadd.f32 %v2663_v34, %v2575_v9  ;;  %v3981_v34 = vld [vmem:[%s4446_s14 + $0x2c8] sm:$0xff] }
 0x48d   : > { %v2741_v42 = vadd.f32 %v2664_v60, %v841_v49  ;;  %2624 = vmatmul.f32.gmra.mxu2 %v3962_v19  ;;  %v2399_v50 = vpop.f32.mrf.mxu0  ;;  %v2488_v21 = vpop.f32.mrf.mxu1  ;;  %2713 = vmatmul.f32.gmra.mxu3 %v3963_v10  ;;  %v866_v60 = vld [vmem:[#allocation2 + $0x390] sm:$0xff] }
 0x48e   : > { %v2489_v38 = vadd.f32 %v2488_v21, %v2399_v50  ;;  %v3982_v50 = vld [vmem:[%s4446_s14 + $0x2f0] sm:$0xff] }
 0x48f   : > { %2861 = vst [vmem:[#allocation2 + $0x110] sm:$0xff] %v2741_v42 }
 0x490   : > { %v2577_v31 = vpop.f32.mrf.mxu2  ;;  %2446 = vmatmul.f32.gmra.mxu0 %v3964_v52  ;;  %2535 = vmatmul.f32.gmra.mxu1 %v3965_v14  ;;  %v2666_v36 = vpop.f32.mrf.mxu3  ;;  %v3984_v14 = vld [vmem:[%s4446_s14 + $0x2e0] sm:$0xff] }
 0x491   : > { %v2578_v20 = vadd.f32 %v2577_v31, %v2489_v38  ;;  %v3983_v38 = vld [vmem:[%s4446_s14 + $0x2f8] sm:$0xff] }
 0x493   : > { %v2667_v48 = vadd.f32 %v2666_v36, %v2578_v20  ;;  %v3985_v36 = vld [vmem:[%s4446_s14 + $0x2e8] sm:$0xff] }
 0x495   : > { %v2746_v47 = vadd.f32 %v2667_v48, %v846_v33  ;;  %2627 = vmatmul.f32.gmra.mxu2 %v3966_v41  ;;  %v2402_v27 = vpop.f32.mrf.mxu0  ;;  %v2491_v61 = vpop.f32.mrf.mxu1  ;;  %2716 = vmatmul.f32.gmra.mxu3 %v3967_v54  ;;  %v871_v48 = vld [vmem:[#allocation2 + $0xe0] sm:$0xff] }
 0x496   : > { %v2492_v5 = vadd.f32 %v2491_v61, %v2402_v27 }
 0x497   : > { %2866 = vst [vmem:[#allocation2 + $0x108] sm:$0xff] %v2746_v47 }
 0x498   : > { %v2580_v17 = vpop.f32.mrf.mxu2  ;;  %2449 = vmatmul.f32.gmra.mxu0 %v3968_v35  ;;  %2538 = vmatmul.f32.gmra.mxu1 %v3969_v44  ;;  %v2669_v58 = vpop.f32.mrf.mxu3  ;;  %v876_v44 = vld [vmem:[#allocation2 + $0x308] sm:$0xff] }
 0x499   : > { %v2581_v15 = vadd.f32 %v2580_v17, %v2492_v5 }
 0x49b   : > { %v2670_v28 = vadd.f32 %v2669_v58, %v2581_v15 }
 0x49d   : > { %v2751_v8 = vadd.f32 %v2670_v28, %v851_v16  ;;  %2630 = vmatmul.f32.gmra.mxu2 %v3970_v7  ;;  %v2405_v1 = vpop.f32.mrf.mxu0  ;;  %v2494_v45 = vpop.f32.mrf.mxu1  ;;  %2719 = vmatmul.f32.gmra.mxu3 %v3971_v25  ;;  %v881_v25 = vld [vmem:[#allocation2 + $0x2c0] sm:$0xff] }
 0x49e   : > { %v2495_v4 = vadd.f32 %v2494_v45, %v2405_v1 }
 0x49f   : > { %2871 = vst [vmem:[#allocation2 + $0x340] sm:$0xff] %v2751_v8 }
 0x4a0   : > { %v2583_v40 = vpop.f32.mrf.mxu2  ;;  %2452 = vmatmul.f32.gmra.mxu0 %v3972_v51  ;;  %2541 = vmatmul.f32.gmra.mxu1 %v3973_v29  ;;  %v2672_v32 = vpop.f32.mrf.mxu3 }
 0x4a1   : > { %v2584_v37 = vadd.f32 %v2583_v40, %v2495_v4 }
 0x4a3   : > { %v2673_v56 = vadd.f32 %v2672_v32, %v2584_v37 }
 0x4a5   : > { %v2756_v12 = vadd.f32 %v2673_v56, %v856_v13  ;;  %2633 = vmatmul.f32.gmra.mxu2 %v3974_v2  ;;  %v2408_v57 = vpop.f32.mrf.mxu0  ;;  %v2497_v11 = vpop.f32.mrf.mxu1  ;;  %2722 = vmatmul.f32.gmra.mxu3 %v3975_v3 }
 0x4a6   : > { %v2498_v39 = vadd.f32 %v2497_v11, %v2408_v57 }
 0x4a7   : > { %2876 = vst [vmem:[#allocation2 + $0x2f0] sm:$0xff] %v2756_v12  ;;  %v886_v12 = vld [vmem:[#allocation2 + $0xa8] sm:$0xff] }
 0x4a8   : > { %v2586_v55 = vpop.f32.mrf.mxu2  ;;  %2455 = vmatmul.f32.gmra.mxu0 %v3976_v46  ;;  %2544 = vmatmul.f32.gmra.mxu1 %v3977_v22  ;;  %v2675_v18 = vpop.f32.mrf.mxu3 }
 0x4a9   : > { %v2587_v63 = vadd.f32 %v2586_v55, %v2498_v39 }
 0x4ab   : > { %v2676_v30 = vadd.f32 %v2675_v18, %v2587_v63  ;;  %v891_v18 = vld [vmem:[#allocation2 + $0x1d0] sm:$0xff] }
 0x4ad   : > { %v2761_v23 = vadd.f32 %v2676_v30, %v861_v43  ;;  %2636 = vmatmul.f32.gmra.mxu2 %v3978_v0  ;;  %v2411_v62 = vpop.f32.mrf.mxu0  ;;  %v2500_v53 = vpop.f32.mrf.mxu1  ;;  %2725 = vmatmul.f32.gmra.mxu3 %v3979_v24 }
 0x4ae   : > { %v2501_v26 = vadd.f32 %v2500_v53, %v2411_v62 }
 0x4af   : > { %2881 = vst [vmem:[#allocation2 + $0x270] sm:$0xff] %v2761_v23 }
 0x4b0   : > { %v2589_v6 = vpop.f32.mrf.mxu2  ;;  %2458 = vmatmul.f32.gmra.mxu0 %v3980_v59  ;;  %2547 = vmatmul.f32.gmra.mxu1 %v3981_v34  ;;  %v2678_v9 = vpop.f32.mrf.mxu3 }
 0x4b1   : > { %v2590_v49 = vadd.f32 %v2589_v6, %v2501_v26  ;;  %v896_v26 = vld [vmem:[#allocation2 + $0x30] sm:$0xff] }
 0x4b3   : > { %v2679_v42 = vadd.f32 %v2678_v9, %v2590_v49 }
 0x4b5   : > { %v2766_v19 = vadd.f32 %v2679_v42, %v866_v60  ;;  %2639 = vmatmul.f32.gmra.mxu2 %v3982_v50  ;;  %v2414_v21 = vpop.f32.mrf.mxu0  ;;  %v2503_v10 = vpop.f32.mrf.mxu1  ;;  %2728 = vmatmul.f32.gmra.mxu3 %v3983_v38  ;;  %v901_v50 = vld [vmem:[#allocation2 + $0x138] sm:$0xff] }
 0x4b6   : > { %v2504_v31 = vadd.f32 %v2503_v10, %v2414_v21 }
 0x4b7   : > { %2886 = vst [vmem:[#allocation2 + $0x390] sm:$0xff] %v2766_v19 }
 0x4b8   : > { %v2592_v52 = vpop.f32.mrf.mxu2  ;;  %2461 = vmatmul.f32.gmra.mxu0 %v3984_v14  ;;  %2550 = vmatmul.f32.gmra.mxu1 %v3985_v36  ;;  %v2681_v20 = vpop.f32.mrf.mxu3 }
 0x4b9   : > { %v2593_v33 = vadd.f32 %v2592_v52, %v2504_v31 }
 0x4bb   : > { %v2682_v47 = vadd.f32 %v2681_v20, %v2593_v33  ;;  %v906_v33 = vld [vmem:[#allocation2 + $0xb8] sm:$0xff] }
 0x4bd   : > { %v2771_v41 = vadd.f32 %v2682_v47, %v871_v48  ;;  %v2417_v27 = vpop.f32.mrf.mxu0  ;;  %v2506_v61 = vpop.f32.mrf.mxu1 }
 0x4be   : > { %v2507_v54 = vadd.f32 %v2506_v61, %v2417_v27 }
 0x4bf   : > { %2891 = vst [vmem:[#allocation2 + $0xe0] sm:$0xff] %v2771_v41 }
 0x4c0   : > { %v2595_v5 = vpop.f32.mrf.mxu2  ;;  %v2684_v17 = vpop.f32.mrf.mxu3 }
 0x4c1   : > { %v2596_v35 = vadd.f32 %v2595_v5, %v2507_v54 }
 0x4c3   : > { %v2685_v58 = vadd.f32 %v2684_v17, %v2596_v35  ;;  %v911_v35 = vld [vmem:[#allocation2 + $0x3a0] sm:$0xff] }
 0x4c5   : > { %v2776_v15 = vadd.f32 %v2685_v58, %v876_v44  ;;  %v2420_v16 = vpop.f32.mrf.mxu0  ;;  %v2509_v28 = vpop.f32.mrf.mxu1 }
 0x4c6   : > { %v2510_v8 = vadd.f32 %v2509_v28, %v2420_v16 }
 0x4c7   : > { %2896 = vst [vmem:[#allocation2 + $0x308] sm:$0xff] %v2776_v15 }
 0x4c8   : > { %v2598_v7 = vpop.f32.mrf.mxu2  ;;  %v2687_v1 = vpop.f32.mrf.mxu3 }
 0x4c9   : > { %v2599_v45 = vadd.f32 %v2598_v7, %v2510_v8 }
 0x4cb   : > { %v2688_v4 = vadd.f32 %v2687_v1, %v2599_v45  ;;  %v916_v45 = vld [vmem:[#allocation2 + $0x318] sm:$0xff] }
 0x4cd   : > { %v2781_v40 = vadd.f32 %v2688_v4, %v881_v25  ;;  %v2423_v51 = vpop.f32.mrf.mxu0  ;;  %v2512_v29 = vpop.f32.mrf.mxu1 }
 0x4ce   : > { %v2513_v32 = vadd.f32 %v2512_v29, %v2423_v51 }
 0x4cf   : > { %2901 = vst [vmem:[#allocation2 + $0x2c0] sm:$0xff] %v2781_v40 }
 0x4d0   : > { %v2601_v37 = vpop.f32.mrf.mxu2  ;;  %v2690_v13 = vpop.f32.mrf.mxu3 }
 0x4d1   : > { %v2602_v56 = vadd.f32 %v2601_v37, %v2513_v32 }
 0x4d3   : > { %v2691_v2 = vadd.f32 %v2690_v13, %v2602_v56  ;;  %v921_v56 = vld [vmem:[#allocation2 + $0x140] sm:$0xff] }
 0x4d5   : > { %v2786_v57 = vadd.f32 %v2691_v2, %v886_v12  ;;  %v2426_v11 = vpop.f32.mrf.mxu0  ;;  %v2515_v3 = vpop.f32.mrf.mxu1 }
 0x4d6   : > { %v2516_v39 = vadd.f32 %v2515_v3, %v2426_v11 }
 0x4d7   : > { %2906 = vst [vmem:[#allocation2 + $0xa8] sm:$0xff] %v2786_v57 }
 0x4d8   : > { %v2604_v55 = vpop.f32.mrf.mxu2  ;;  %v2693_v46 = vpop.f32.mrf.mxu3 }
 0x4d9   : > { %v2605_v22 = vadd.f32 %v2604_v55, %v2516_v39 }
 0x4db   : > { %v2694_v63 = vadd.f32 %v2693_v46, %v2605_v22  ;;  %v926_v22 = vld [vmem:[#allocation2 + $0x258] sm:$0xff] }
 0x4dd   : > { %v2791_v43 = vadd.f32 %v2694_v63, %v891_v18  ;;  %v2429_v30 = vpop.f32.mrf.mxu0  ;;  %v2518_v23 = vpop.f32.mrf.mxu1 }
 0x4de   : > { %v2519_v0 = vadd.f32 %v2518_v23, %v2429_v30 }
 0x4df   : > { %2911 = vst [vmem:[#allocation2 + $0x1d0] sm:$0xff] %v2791_v43 }
 0x4e0   : > { %v2607_v62 = vpop.f32.mrf.mxu2  ;;  %v2696_v53 = vpop.f32.mrf.mxu3 }
 0x4e1   : > { %v2608_v24 = vadd.f32 %v2607_v62, %v2519_v0 }
 0x4e3   : > { %v2697_v6 = vadd.f32 %v2696_v53, %v2608_v24  ;;  %v931_v24 = vld [vmem:[#allocation2 + $0x208] sm:$0xff] }
 0x4e5   : > { %v2796_v59 = vadd.f32 %v2697_v6, %v896_v26  ;;  %v2432_v34 = vpop.f32.mrf.mxu0  ;;  %v2521_v9 = vpop.f32.mrf.mxu1 }
 0x4e6   : > { %v2522_v49 = vadd.f32 %v2521_v9, %v2432_v34 }
 0x4e7   : > { %2916 = vst [vmem:[#allocation2 + $0x30] sm:$0xff] %v2796_v59 }
 0x4e8   : > { %v2610_v60 = vpop.f32.mrf.mxu2  ;;  %v2699_v42 = vpop.f32.mrf.mxu3 }
 0x4e9   : > { %v2611_v19 = vadd.f32 %v2610_v60, %v2522_v49 }
 0x4eb   : > { %v2700_v21 = vadd.f32 %v2699_v42, %v2611_v19  ;;  %v936_v19 = vld [vmem:[#allocation2 + $0x248] sm:$0xff] }
 0x4ed   : > { %v2801_v10 = vadd.f32 %v2700_v21, %v901_v50  ;;  %v2435_v38 = vpop.f32.mrf.mxu0  ;;  %v2524_v31 = vpop.f32.mrf.mxu1 }
 0x4ee   : > { %v2525_v52 = vadd.f32 %v2524_v31, %v2435_v38 }
 0x4ef   : > { %2921 = vst [vmem:[#allocation2 + $0x138] sm:$0xff] %v2801_v10 }
 0x4f0   : > { %v2613_v14 = vpop.f32.mrf.mxu2  ;;  %v2702_v36 = vpop.f32.mrf.mxu3 }
 0x4f1   : > { %v2614_v20 = vadd.f32 %v2613_v14, %v2525_v52 }
 0x4f3   : > { %v2703_v48 = vadd.f32 %v2702_v36, %v2614_v20  ;;  %v941_v20 = vld [vmem:[#allocation2 + $0x2a8] sm:$0xff] }
 0x4f5   : > { %v2806_v47 = vadd.f32 %v2703_v48, %v906_v33  ;;  %v2438_v41 = vpop.f32.mrf.mxu0  ;;  %v2527_v27 = vpop.f32.mrf.mxu1 }
 0x4f6   : > { %v2528_v61 = vadd.f32 %v2527_v27, %v2438_v41 }
 0x4f7   : > { %2926 = vst [vmem:[#allocation2 + $0xb8] sm:$0xff] %v2806_v47 }
 0x4f8   : > { %v2616_v54 = vpop.f32.mrf.mxu2  ;;  %v2705_v5 = vpop.f32.mrf.mxu3 }
 0x4f9   : > { %v2617_v17 = vadd.f32 %v2616_v54, %v2528_v61 }
 0x4fb   : > { %v2706_v44 = vadd.f32 %v2705_v5, %v2617_v17  ;;  %v946_v17 = vld [vmem:[#allocation2 + $0xb0] sm:$0xff] }
 0x4fd   : > { %v2811_v58 = vadd.f32 %v2706_v44, %v911_v35  ;;  %v2441_v15 = vpop.f32.mrf.mxu0  ;;  %v2530_v16 = vpop.f32.mrf.mxu1 }
 0x4fe   : > { %v2531_v28 = vadd.f32 %v2530_v16, %v2441_v15 }
 0x4ff   : > { %2931 = vst [vmem:[#allocation2 + $0x3a0] sm:$0xff] %v2811_v58 }
 0x500   : > { %v2619_v8 = vpop.f32.mrf.mxu2  ;;  %v2708_v7 = vpop.f32.mrf.mxu3 }
 0x501   : > { %v2620_v1 = vadd.f32 %v2619_v8, %v2531_v28 }
 0x503   : > { %v2709_v25 = vadd.f32 %v2708_v7, %v2620_v1  ;;  %v951_v1 = vld [vmem:[#allocation2 + $0x310] sm:$0xff] }
 0x505   : > { %v2816_v4 = vadd.f32 %v2709_v25, %v916_v45  ;;  %v2444_v40 = vpop.f32.mrf.mxu0  ;;  %v2533_v51 = vpop.f32.mrf.mxu1 }
 0x506   : > { %v2534_v29 = vadd.f32 %v2533_v51, %v2444_v40 }
 0x507   : > { %2936 = vst [vmem:[#allocation2 + $0x318] sm:$0xff] %v2816_v4 }
 0x508   : > { %v2622_v32 = vpop.f32.mrf.mxu2  ;;  %v2711_v37 = vpop.f32.mrf.mxu3 }
 0x509   : > { %v2623_v13 = vadd.f32 %v2622_v32, %v2534_v29 }
 0x50b   : > { %v2712_v12 = vadd.f32 %v2711_v37, %v2623_v13 }
 0x50d   : > { %v2821_v2 = vadd.f32 %v2712_v12, %v921_v56  ;;  %v2447_v57 = vpop.f32.mrf.mxu0  ;;  %v2536_v11 = vpop.f32.mrf.mxu1 }
 0x50e   : > { %v2537_v3 = vadd.f32 %v2536_v11, %v2447_v57 }
 0x50f   : > { %2941 = vst [vmem:[#allocation2 + $0x140] sm:$0xff] %v2821_v2 }
 0x510   : > { %v2625_v39 = vpop.f32.mrf.mxu2  ;;  %v2714_v55 = vpop.f32.mrf.mxu3 }
 0x511   : > { %v2626_v46 = vadd.f32 %v2625_v39, %v2537_v3 }
 0x513   : > { %v2715_v18 = vadd.f32 %v2714_v55, %v2626_v46 }
 0x515   : > { %v2826_v63 = vadd.f32 %v2715_v18, %v926_v22  ;;  %v2450_v43 = vpop.f32.mrf.mxu0  ;;  %v2539_v30 = vpop.f32.mrf.mxu1 }
 0x516   : > { %v2540_v23 = vadd.f32 %v2539_v30, %v2450_v43 }
 0x517   : > { %2946 = vst [vmem:[#allocation2 + $0x258] sm:$0xff] %v2826_v63 }
 0x518   : > { %v2628_v0 = vpop.f32.mrf.mxu2  ;;  %v2717_v62 = vpop.f32.mrf.mxu3 }
 0x519   : > { %v2629_v53 = vadd.f32 %v2628_v0, %v2540_v23 }
 0x51b   : > { %v2718_v26 = vadd.f32 %v2717_v62, %v2629_v53 }
 0x51d   : > { %v2831_v6 = vadd.f32 %v2718_v26, %v931_v24  ;;  %v2453_v59 = vpop.f32.mrf.mxu0  ;;  %v2542_v34 = vpop.f32.mrf.mxu1 }
 0x51e   : > { %v2543_v9 = vadd.f32 %v2542_v34, %v2453_v59 }
 0x51f   : > { %2951 = vst [vmem:[#allocation2 + $0x208] sm:$0xff] %v2831_v6 }
 0x520   : > { %v2631_v49 = vpop.f32.mrf.mxu2  ;;  %v2720_v60 = vpop.f32.mrf.mxu3 }
 0x521   : > { %v2632_v42 = vadd.f32 %v2631_v49, %v2543_v9 }
 0x523   : > { %v2721_v50 = vadd.f32 %v2720_v60, %v2632_v42 }
 0x525   : > { %v2836_v21 = vadd.f32 %v2721_v50, %v936_v19  ;;  %v2456_v10 = vpop.f32.mrf.mxu0  ;;  %v2545_v38 = vpop.f32.mrf.mxu1 }
 0x526   : > { %v2546_v31 = vadd.f32 %v2545_v38, %v2456_v10 }
 0x527   : > { %2956 = vst [vmem:[#allocation2 + $0x248] sm:$0xff] %v2836_v21 }
 0x528   : > { %v2634_v52 = vpop.f32.mrf.mxu2  ;;  %v2723_v14 = vpop.f32.mrf.mxu3 }
 0x529   : > { %v2635_v36 = vadd.f32 %v2634_v52, %v2546_v31 }
 0x52b   : > { %v2724_v33 = vadd.f32 %v2723_v14, %v2635_v36 }
 0x52d   : > { %v2841_v48 = vadd.f32 %v2724_v33, %v941_v20  ;;  %v2459_v47 = vpop.f32.mrf.mxu0  ;;  %v2548_v41 = vpop.f32.mrf.mxu1 }
 0x52e   : > { %v2549_v27 = vadd.f32 %v2548_v41, %v2459_v47 }
 0x52f   : > { %2961 = vst [vmem:[#allocation2 + $0x2a8] sm:$0xff] %v2841_v48 }
 0x530   : > { %v2637_v61 = vpop.f32.mrf.mxu2  ;;  %v2726_v54 = vpop.f32.mrf.mxu3 }
 0x531   : > { %v2638_v5 = vadd.f32 %v2637_v61, %v2549_v27 }
 0x533   : > { %v2727_v35 = vadd.f32 %v2726_v54, %v2638_v5 }
 0x535   : > { %v2846_v44 = vadd.f32 %v2727_v35, %v946_v17  ;;  %v2462_v58 = vpop.f32.mrf.mxu0  ;;  %v2551_v15 = vpop.f32.mrf.mxu1 }
 0x536   : > { %v2552_v16 = vadd.f32 %v2551_v15, %v2462_v58 }
 0x537   : > { %2966 = vst [vmem:[#allocation2 + $0xb0] sm:$0xff] %v2846_v44 }
 0x538   : > { %v2640_v28 = vpop.f32.mrf.mxu2  ;;  %v2729_v8 = vpop.f32.mrf.mxu3 }
 0x539   : > { %v2641_v7 = vadd.f32 %v2640_v28, %v2552_v16 }
 0x53b   : > { %v2730_v45 = vadd.f32 %v2729_v8, %v2641_v7  ;;  %2975 = sbr.rel (%p3631_p7) target bundleno = 1471 (0x5bf), region = 52 }
 0x53d   : > { %v2851_v25 = vadd.f32 %v2730_v45, %v951_v1 }
 0x53f   : > { %2971 = vst [vmem:[#allocation2 + $0x310] sm:$0xff] %v2851_v25 }
 0x540   : > { %v2976_v4 = vld [vmem:[#allocation2 + $0x2b0] sm:$0xff]  ;;  %v3096_v40 = vld [vmem:[#allocation8] sm:$0x1f]  ;;  %v2978_v37 = vld [vmem:[#allocation2 + $0xd8] sm:$0xff] }
 0x541   : > { %v2977_v51 = vld [vmem:[#allocation2 + $0x3b0] sm:$0xff]  ;;  %v5967_v29 = vperm.slane %v3096_v40, 0  ;;  %v5969_v32 = vperm.slane %v3096_v40, 1  ;;  %v5971_v13 = vperm.slane %v3096_v40, 2  ;;  %v2979_v56 = vld [vmem:[#allocation2 + $0x18] sm:$0xff]  ;;  %v5973_v12 = vperm.slane %v3096_v40, 3 }
 0x542   : > { %v2980_v2 = vld [vmem:[#allocation2 + $0x50] sm:$0xff]  ;;  %v5975_v57 = vperm.slane %v3096_v40, 4  ;;  %v2981_v11 = vld [vmem:[#allocation2 + $0x368] sm:$0xff]  ;;  %v2984_v30 = vld [vmem:[#allocation2 + $0x380] sm:$0xff] }
 0x543   : > { %v2982_v3 = vld [vmem:[#allocation2 + $0x330] sm:$0xff]  ;;  %v3108_v39 = vadd.f32 %v5967_v29, %v2976_v4  ;;  %v3109_v55 = vadd.f32 %v5969_v32, %v2977_v51  ;;  %v3110_v46 = vadd.f32 %v5971_v13, %v2978_v37  ;;  %v3111_v22 = vadd.f32 %v5973_v12, %v2979_v56  ;;  %v2983_v18 = vld [vmem:[#allocation2 + $0x48] sm:$0xff]  ;;  %v2986_v59 = vld [vmem:[#allocation2 + $0x118] sm:$0xff] }
 0x544   : > { %v3112_v63 = vadd.f32 %v5975_v57, %v2980_v2  ;;  %v3113_v43 = vadd.f32 %v5967_v29, %v2981_v11  ;;  %v3114_v53 = vadd.f32 %v5969_v32, %v2982_v3  ;;  %v2985_v24 = vld [vmem:[#allocation2 + $0x110] sm:$0xff]  ;;  %v3115_v6 = vadd.f32 %v5971_v13, %v2983_v18  ;;  %v2987_v49 = vld [vmem:[#allocation2 + $0x98] sm:$0xff]  ;;  %v2988_v19 = vld [vmem:[#allocation2 + $0x320] sm:$0xff] }
 0x545   : > { %v3228_v23 = vmax.f32 %v3108_v39, 0.0  ;;  %v3229_v0 = vmax.f32 %v3109_v55, 0.0  ;;  %v3230_v62 = vmax.f32 %v3110_v46, 0.0  ;;  %v3231_v26 = vmax.f32 %v3111_v22, 0.0  ;;  %v2989_v10 = vld [vmem:[#allocation2 + $0x150] sm:$0xff]  ;;  %v2990_v52 = vld [vmem:[#allocation2 + $0x108] sm:$0xff] }
 0x546   : > { %v3232_v34 = vmax.f32 %v3112_v63, 0.0  ;;  %v3116_v9 = vadd.f32 %v5973_v12, %v2984_v30  ;;  %v3233_v60 = vmax.f32 %v3113_v43, 0.0  ;;  %v3117_v42 = vadd.f32 %v5975_v57, %v2985_v24  ;;  %v2991_v20 = vld [vmem:[#allocation2 + $0x60] sm:$0xff]  ;;  %v2993_v61 = vld [vmem:[#allocation2 + $0x388] sm:$0xff]  ;;  %v2994_v17 = vld [vmem:[#allocation2 + $0x338] sm:$0xff] }
 0x547   : > { %3348 = vst [vmem:[%s4467_s18] sm:$0xff] %v3228_v23  ;;  %v3234_v50 = vmax.f32 %v3114_v53, 0.0  ;;  %v3118_v21 = vadd.f32 %v5967_v29, %v2986_v59  ;;  %v3235_v38 = vmax.f32 %v3115_v6, 0.0  ;;  %v3119_v31 = vadd.f32 %v5969_v32, %v2987_v49  ;;  %v2992_v47 = vld [vmem:[#allocation2 + $0x2e0] sm:$0xff]  ;;  %v2997_v1 = vld [vmem:[#allocation2 + $0x1a8] sm:$0xff]  ;;  %v2998_v4 = vld [vmem:[#allocation2 + $0x1b8] sm:$0xff] }
 0x548   : > { %3349 = vst [vmem:[%s4467_s18 + $0x8] sm:$0xff] %v3229_v0  ;;  %v3236_v14 = vmax.f32 %v3116_v9, 0.0  ;;  %v3120_v36 = vadd.f32 %v5971_v13, %v2988_v19  ;;  %v3237_v33 = vmax.f32 %v3117_v42, 0.0  ;;  %v3121_v48 = vadd.f32 %v5973_v12, %v2989_v10  ;;  %v2995_v58 = vld [vmem:[#allocation2 + $0x340] sm:$0xff]  ;;  %v2999_v37 = vld [vmem:[#allocation2 + $0x168] sm:$0xff]  ;;  %v3000_v11 = vld [vmem:[#allocation2 + $0x2f0] sm:$0xff] }
 0x549   : > { %3350 = vst [vmem:[%s4467_s18 + $0x10] sm:$0xff] %v3230_v62  ;;  %v3238_v41 = vmax.f32 %v3118_v21, 0.0  ;;  %v3122_v27 = vadd.f32 %v5975_v57, %v2990_v52  ;;  %v3239_v54 = vmax.f32 %v3119_v31, 0.0  ;;  %v3123_v5 = vadd.f32 %v5967_v29, %v2991_v20  ;;  %v2996_v28 = vld [vmem:[#allocation2 + $0x80] sm:$0xff]  ;;  %v3001_v55 = vld [vmem:[#allocation2 + $0x288] sm:$0xff]  ;;  %v3003_v30 = vld [vmem:[#allocation2 + $0x130] sm:$0xff] }
 0x54a   : > { %3351 = vst [vmem:[%s4467_s18 + $0x18] sm:$0xff] %v3231_v26  ;;  %v3240_v35 = vmax.f32 %v3120_v36, 0.0  ;;  %v3124_v44 = vadd.f32 %v5969_v32, %v2992_v47  ;;  %v3241_v15 = vmax.f32 %v3121_v48, 0.0  ;;  %v3125_v16 = vadd.f32 %v5971_v13, %v2993_v61  ;;  %v3002_v18 = vld [vmem:[#allocation2 + $0x360] sm:$0xff]  ;;  %v3004_v62 = vld [vmem:[#allocation2 + $0x1b0] sm:$0xff] }
 0x54b   : > { %3352 = vst [vmem:[%s4467_s18 + $0x20] sm:$0xff] %v3232_v34  ;;  %v3242_v8 = vmax.f32 %v3122_v27, 0.0  ;;  %v3126_v7 = vadd.f32 %v5973_v12, %v2994_v17  ;;  %v3243_v45 = vmax.f32 %v3123_v5, 0.0  ;;  %v3127_v25 = vadd.f32 %v5975_v57, %v2995_v58  ;;  %v3005_v26 = vld [vmem:[#allocation2 + $0x270] sm:$0xff] }
 0x54c   : > { %3353 = vst [vmem:[%s4467_s18 + $0x28] sm:$0xff] %v3233_v60  ;;  %v3244_v40 = vmax.f32 %v3124_v44, 0.0  ;;  %v3128_v51 = vadd.f32 %v5967_v29, %v2996_v28  ;;  %v3245_v56 = vmax.f32 %v3125_v16, 0.0  ;;  %v3129_v2 = vadd.f32 %v5969_v32, %v2997_v1  ;;  %v3006_v34 = vld [vmem:[#allocation2 + $0xf0] sm:$0xff]  ;;  %v3007_v60 = vld [vmem:[#allocation2 + $0x8] sm:$0xff] }
 0x54d   : > { %3354 = vst [vmem:[%s4467_s18 + $0x30] sm:$0xff] %v3234_v50  ;;  %v3246_v3 = vmax.f32 %v3126_v7, 0.0  ;;  %v3130_v39 = vadd.f32 %v5971_v13, %v2998_v4  ;;  %v3247_v46 = vmax.f32 %v3127_v25, 0.0  ;;  %v3131_v22 = vadd.f32 %v5973_v12, %v2999_v37  ;;  %v3008_v50 = vld [vmem:[#allocation2 + $0x148] sm:$0xff] }
 0x54e   : > { %3355 = vst [vmem:[%s4467_s18 + $0x38] sm:$0xff] %v3235_v38  ;;  %v3248_v63 = vmax.f32 %v3128_v51, 0.0  ;;  %v3132_v43 = vadd.f32 %v5975_v57, %v3000_v11  ;;  %v3249_v23 = vmax.f32 %v3129_v2, 0.0  ;;  %v3133_v0 = vadd.f32 %v5967_v29, %v3001_v55  ;;  %v3009_v38 = vld [vmem:[#allocation2 + $0x200] sm:$0xff] }
 0x54f   : > { %3356 = vst [vmem:[%s4467_s18 + $0x40] sm:$0xff] %v3236_v14  ;;  %v3250_v53 = vmax.f32 %v3130_v39, 0.0  ;;  %v3134_v24 = vadd.f32 %v5969_v32, %v3002_v18  ;;  %v3251_v6 = vmax.f32 %v3131_v22, 0.0  ;;  %v3135_v59 = vadd.f32 %v5971_v13, %v3003_v30  ;;  %v3010_v14 = vld [vmem:[#allocation2 + $0x390] sm:$0xff] }
 0x550   : > { %3357 = vst [vmem:[%s4467_s18 + $0x48] sm:$0xff] %v3237_v33  ;;  %v3252_v9 = vmax.f32 %v3132_v43, 0.0  ;;  %v3136_v49 = vadd.f32 %v5973_v12, %v3004_v62  ;;  %v3253_v42 = vmax.f32 %v3133_v0, 0.0  ;;  %v3137_v19 = vadd.f32 %v5975_v57, %v3005_v26  ;;  %v3011_v33 = vld [vmem:[#allocation2 + $0x278] sm:$0xff] }
 0x551   : > { %3358 = vst [vmem:[%s4467_s18 + $0x50] sm:$0xff] %v3238_v41  ;;  %v3254_v21 = vmax.f32 %v3134_v24, 0.0  ;;  %v3138_v10 = vadd.f32 %v5967_v29, %v3006_v34  ;;  %v3255_v31 = vmax.f32 %v3135_v59, 0.0  ;;  %v3139_v52 = vadd.f32 %v5969_v32, %v3007_v60  ;;  %v3012_v41 = vld [vmem:[#allocation2] sm:$0xff] }
 0x552   : > { %3359 = vst [vmem:[%s4467_s18 + $0x58] sm:$0xff] %v3239_v54  ;;  %v3256_v36 = vmax.f32 %v3136_v49, 0.0  ;;  %v3140_v20 = vadd.f32 %v5971_v13, %v3008_v50  ;;  %v3257_v48 = vmax.f32 %v3137_v19, 0.0  ;;  %v3141_v47 = vadd.f32 %v5973_v12, %v3009_v38  ;;  %v3013_v54 = vld [vmem:[#allocation2 + $0x290] sm:$0xff] }
 0x553   : > { %3360 = vst [vmem:[%s4467_s18 + $0x60] sm:$0xff] %v3240_v35  ;;  %v3258_v27 = vmax.f32 %v3138_v10, 0.0  ;;  %v3142_v61 = vadd.f32 %v5975_v57, %v3010_v14  ;;  %v3259_v5 = vmax.f32 %v3139_v52, 0.0  ;;  %v3143_v17 = vadd.f32 %v5967_v29, %v3011_v33  ;;  %v3014_v35 = vld [vmem:[#allocation2 + $0x188] sm:$0xff] }
 0x554   : > { %3361 = vst [vmem:[%s4467_s18 + $0x68] sm:$0xff] %v3241_v15  ;;  %v3260_v44 = vmax.f32 %v3140_v20, 0.0  ;;  %v3144_v58 = vadd.f32 %v5969_v32, %v3012_v41  ;;  %v3015_v15 = vld [vmem:[#allocation2 + $0xe0] sm:$0xff]  ;;  %v3261_v16 = vmax.f32 %v3141_v47, 0.0  ;;  %v3145_v28 = vadd.f32 %v5971_v13, %v3013_v54 }
 0x555   : > { %3362 = vst [vmem:[%s4467_s18 + $0x70] sm:$0xff] %v3242_v8  ;;  %v3016_v8 = vld [vmem:[#allocation2 + $0x1c0] sm:$0xff]  ;;  %v3262_v7 = vmax.f32 %v3142_v61, 0.0  ;;  %v3146_v1 = vadd.f32 %v5973_v12, %v3014_v35  ;;  %v3263_v25 = vmax.f32 %v3143_v17, 0.0  ;;  %v3147_v4 = vadd.f32 %v5975_v57, %v3015_v15 }
 0x556   : > { %3363 = vst [vmem:[%s4467_s18 + $0x78] sm:$0xff] %v3243_v45  ;;  %v3017_v45 = vld [vmem:[#allocation2 + $0x90] sm:$0xff]  ;;  %v3264_v51 = vmax.f32 %v3144_v58, 0.0  ;;  %v3148_v37 = vadd.f32 %v5967_v29, %v3016_v8  ;;  %v3265_v2 = vmax.f32 %v3145_v28, 0.0 }
 0x557   : > { %3364 = vst [vmem:[%s4467_s18 + $0x80] sm:$0xff] %v3244_v40  ;;  %v3018_v40 = vld [vmem:[#allocation2 + $0x70] sm:$0xff]  ;;  %v3149_v11 = vadd.f32 %v5969_v32, %v3017_v45  ;;  %v3266_v39 = vmax.f32 %v3146_v1, 0.0  ;;  %v3267_v22 = vmax.f32 %v3147_v4, 0.0 }
 0x558   : > { %3365 = vst [vmem:[%s4467_s18 + $0x88] sm:$0xff] %v3245_v56  ;;  %v3019_v56 = vld [vmem:[#allocation2 + $0x210] sm:$0xff]  ;;  %v3150_v55 = vadd.f32 %v5971_v13, %v3018_v40  ;;  %v3268_v43 = vmax.f32 %v3148_v37, 0.0 }
 0x559   : > { %3366 = vst [vmem:[%s4467_s18 + $0x90] sm:$0xff] %v3246_v3  ;;  %v3020_v3 = vld [vmem:[#allocation2 + $0x308] sm:$0xff]  ;;  %v3151_v18 = vadd.f32 %v5973_v12, %v3019_v56  ;;  %v3269_v0 = vmax.f32 %v3149_v11, 0.0 }
 0x55a   : > { %3367 = vst [vmem:[%s4467_s18 + $0x98] sm:$0xff] %v3247_v46  ;;  %v3021_v46 = vld [vmem:[#allocation2 + $0x370] sm:$0xff]  ;;  %v3152_v30 = vadd.f32 %v5975_v57, %v3020_v3  ;;  %v3270_v24 = vmax.f32 %v3150_v55, 0.0 }
 0x55b   : > { %3368 = vst [vmem:[%s4467_s18 + $0xa0] sm:$0xff] %v3248_v63  ;;  %v3022_v63 = vld [vmem:[#allocation2 + $0x1d8] sm:$0xff]  ;;  %v3153_v62 = vadd.f32 %v5967_v29, %v3021_v46  ;;  %v3271_v59 = vmax.f32 %v3151_v18, 0.0 }
 0x55c   : > { %3369 = vst [vmem:[%s4467_s18 + $0xa8] sm:$0xff] %v3249_v23  ;;  %v3023_v23 = vld [vmem:[#allocation2 + $0x260] sm:$0xff]  ;;  %v3154_v26 = vadd.f32 %v5969_v32, %v3022_v63  ;;  %v3272_v49 = vmax.f32 %v3152_v30, 0.0 }
 0x55d   : > { %3370 = vst [vmem:[%s4467_s18 + $0xb0] sm:$0xff] %v3250_v53  ;;  %v3024_v53 = vld [vmem:[#allocation2 + $0x358] sm:$0xff]  ;;  %v3155_v34 = vadd.f32 %v5971_v13, %v3023_v23  ;;  %v3273_v19 = vmax.f32 %v3153_v62, 0.0 }
 0x55e   : > { %3371 = vst [vmem:[%s4467_s18 + $0xb8] sm:$0xff] %v3251_v6  ;;  %v3025_v6 = vld [vmem:[#allocation2 + $0x2c0] sm:$0xff]  ;;  %v3156_v60 = vadd.f32 %v5973_v12, %v3024_v53  ;;  %v3274_v10 = vmax.f32 %v3154_v26, 0.0 }
 0x55f   : > { %3372 = vst [vmem:[%s4467_s18 + $0xc0] sm:$0xff] %v3252_v9  ;;  %v3026_v9 = vld [vmem:[#allocation2 + $0x328] sm:$0xff]  ;;  %v3157_v50 = vadd.f32 %v5975_v57, %v3025_v6  ;;  %v3275_v52 = vmax.f32 %v3155_v34, 0.0 }
 0x560   : > { %3373 = vst [vmem:[%s4467_s18 + $0xc8] sm:$0xff] %v3253_v42  ;;  %v3027_v42 = vld [vmem:[#allocation2 + $0x238] sm:$0xff]  ;;  %v3158_v38 = vadd.f32 %v5967_v29, %v3026_v9  ;;  %v3276_v20 = vmax.f32 %v3156_v60, 0.0 }
 0x561   : > { %3374 = vst [vmem:[%s4467_s18 + $0xd0] sm:$0xff] %v3254_v21  ;;  %v3028_v21 = vld [vmem:[#allocation2 + $0x78] sm:$0xff]  ;;  %v3159_v14 = vadd.f32 %v5969_v32, %v3027_v42  ;;  %v3277_v47 = vmax.f32 %v3157_v50, 0.0 }
 0x562   : > { %3375 = vst [vmem:[%s4467_s18 + $0xd8] sm:$0xff] %v3255_v31  ;;  %v3029_v31 = vld [vmem:[#allocation2 + $0x158] sm:$0xff]  ;;  %v3160_v33 = vadd.f32 %v5971_v13, %v3028_v21  ;;  %v3278_v61 = vmax.f32 %v3158_v38, 0.0 }
 0x563   : > { %3376 = vst [vmem:[%s4467_s18 + $0xe0] sm:$0xff] %v3256_v36  ;;  %v3030_v36 = vld [vmem:[#allocation2 + $0xa8] sm:$0xff]  ;;  %v3161_v41 = vadd.f32 %v5973_v12, %v3029_v31  ;;  %v3279_v17 = vmax.f32 %v3159_v14, 0.0 }
 0x564   : > { %3377 = vst [vmem:[%s4467_s18 + $0xe8] sm:$0xff] %v3257_v48  ;;  %v3031_v48 = vld [vmem:[#allocation2 + $0x300] sm:$0xff]  ;;  %v3162_v54 = vadd.f32 %v5975_v57, %v3030_v36  ;;  %v3280_v58 = vmax.f32 %v3160_v33, 0.0 }
 0x565   : > { %3378 = vst [vmem:[%s4467_s18 + $0xf0] sm:$0xff] %v3258_v27  ;;  %v3032_v27 = vld [vmem:[#allocation2 + $0xe8] sm:$0xff]  ;;  %v3163_v35 = vadd.f32 %v5967_v29, %v3031_v48  ;;  %v3281_v28 = vmax.f32 %v3161_v41, 0.0 }
 0x566   : > { %3379 = vst [vmem:[%s4467_s18 + $0xf8] sm:$0xff] %v3259_v5  ;;  %v3033_v5 = vld [vmem:[#allocation2 + $0x20] sm:$0xff]  ;;  %v3164_v15 = vadd.f32 %v5969_v32, %v3032_v27  ;;  %v3282_v1 = vmax.f32 %v3162_v54, 0.0 }
 0x567   : > { %3380 = vst [vmem:[%s4467_s18 + $0x100] sm:$0xff] %v3260_v44  ;;  %v3034_v44 = vld [vmem:[#allocation2 + $0x40] sm:$0xff]  ;;  %v3165_v8 = vadd.f32 %v5971_v13, %v3033_v5  ;;  %v3283_v4 = vmax.f32 %v3163_v35, 0.0 }
 0x568   : > { %3381 = vst [vmem:[%s4467_s18 + $0x108] sm:$0xff] %v3261_v16  ;;  %v3035_v16 = vld [vmem:[#allocation2 + $0x1d0] sm:$0xff]  ;;  %v3166_v45 = vadd.f32 %v5973_v12, %v3034_v44  ;;  %v3284_v37 = vmax.f32 %v3164_v15, 0.0 }
 0x569   : > { %3382 = vst [vmem:[%s4467_s18 + $0x110] sm:$0xff] %v3262_v7  ;;  %v3036_v7 = vld [vmem:[#allocation2 + $0x2e8] sm:$0xff]  ;;  %v3167_v40 = vadd.f32 %v5975_v57, %v3035_v16  ;;  %v3285_v11 = vmax.f32 %v3165_v8, 0.0 }
 0x56a   : > { %3383 = vst [vmem:[%s4467_s18 + $0x118] sm:$0xff] %v3263_v25  ;;  %v3037_v25 = vld [vmem:[#allocation2 + $0x1f0] sm:$0xff]  ;;  %v3168_v56 = vadd.f32 %v5967_v29, %v3036_v7  ;;  %v3286_v55 = vmax.f32 %v3166_v45, 0.0 }
 0x56b   : > { %3384 = vst [vmem:[%s4467_s18 + $0x120] sm:$0xff] %v3264_v51  ;;  %v3038_v51 = vld [vmem:[#allocation2 + $0x38] sm:$0xff]  ;;  %v3169_v3 = vadd.f32 %v5969_v32, %v3037_v25  ;;  %v3287_v18 = vmax.f32 %v3167_v40, 0.0 }
 0x56c   : > { %3385 = vst [vmem:[%s4467_s18 + $0x128] sm:$0xff] %v3265_v2  ;;  %v3039_v2 = vld [vmem:[#allocation2 + $0x2d0] sm:$0xff]  ;;  %v3170_v46 = vadd.f32 %v5971_v13, %v3038_v51  ;;  %v3288_v30 = vmax.f32 %v3168_v56, 0.0 }
 0x56d   : > { %3386 = vst [vmem:[%s4467_s18 + $0x130] sm:$0xff] %v3266_v39  ;;  %v3040_v39 = vld [vmem:[#allocation2 + $0x30] sm:$0xff]  ;;  %v3171_v63 = vadd.f32 %v5973_v12, %v3039_v2  ;;  %v3289_v62 = vmax.f32 %v3169_v3, 0.0 }
 0x56e   : > { %3387 = vst [vmem:[%s4467_s18 + $0x138] sm:$0xff] %v3267_v22  ;;  %v3041_v22 = vld [vmem:[#allocation2 + $0xc0] sm:$0xff]  ;;  %v3172_v23 = vadd.f32 %v5975_v57, %v3040_v39  ;;  %v3290_v26 = vmax.f32 %v3170_v46, 0.0 }
 0x56f   : > { %3388 = vst [vmem:[%s4467_s18 + $0x140] sm:$0xff] %v3268_v43  ;;  %v3042_v43 = vld [vmem:[#allocation2 + $0x228] sm:$0xff]  ;;  %v3173_v53 = vadd.f32 %v5967_v29, %v3041_v22  ;;  %v3291_v34 = vmax.f32 %v3171_v63, 0.0 }
 0x570   : > { %3389 = vst [vmem:[%s4467_s18 + $0x148] sm:$0xff] %v3269_v0  ;;  %v3043_v0 = vld [vmem:[#allocation2 + $0x170] sm:$0xff]  ;;  %v3174_v6 = vadd.f32 %v5969_v32, %v3042_v43  ;;  %v3292_v60 = vmax.f32 %v3172_v23, 0.0 }
 0x571   : > { %3390 = vst [vmem:[%s4467_s18 + $0x150] sm:$0xff] %v3270_v24  ;;  %v3044_v24 = vld [vmem:[#allocation2 + $0x280] sm:$0xff]  ;;  %v3175_v9 = vadd.f32 %v5971_v13, %v3043_v0  ;;  %v3293_v50 = vmax.f32 %v3173_v53, 0.0 }
 0x572   : > { %3391 = vst [vmem:[%s4467_s18 + $0x158] sm:$0xff] %v3271_v59  ;;  %v3045_v59 = vld [vmem:[#allocation2 + $0x138] sm:$0xff]  ;;  %v3176_v42 = vadd.f32 %v5973_v12, %v3044_v24  ;;  %v3294_v38 = vmax.f32 %v3174_v6, 0.0 }
 0x573   : > { %3392 = vst [vmem:[%s4467_s18 + $0x160] sm:$0xff] %v3272_v49  ;;  %v3046_v49 = vld [vmem:[#allocation2 + $0x348] sm:$0xff]  ;;  %v3177_v21 = vadd.f32 %v5975_v57, %v3045_v59  ;;  %v3295_v14 = vmax.f32 %v3175_v9, 0.0 }
 0x574   : > { %3393 = vst [vmem:[%s4467_s18 + $0x168] sm:$0xff] %v3273_v19  ;;  %v3047_v19 = vld [vmem:[#allocation2 + $0x3a8] sm:$0xff]  ;;  %v3178_v31 = vadd.f32 %v5967_v29, %v3046_v49  ;;  %v3296_v33 = vmax.f32 %v3176_v42, 0.0 }
 0x575   : > { %3394 = vst [vmem:[%s4467_s18 + $0x170] sm:$0xff] %v3274_v10  ;;  %v3048_v10 = vld [vmem:[#allocation2 + $0xf8] sm:$0xff]  ;;  %v3179_v36 = vadd.f32 %v5969_v32, %v3047_v19  ;;  %v3297_v41 = vmax.f32 %v3177_v21, 0.0 }
 0x576   : > { %3395 = vst [vmem:[%s4467_s18 + $0x178] sm:$0xff] %v3275_v52  ;;  %v3049_v52 = vld [vmem:[#allocation2 + $0x250] sm:$0xff]  ;;  %v3180_v48 = vadd.f32 %v5971_v13, %v3048_v10  ;;  %v3298_v54 = vmax.f32 %v3178_v31, 0.0 }
 0x577   : > { %3396 = vst [vmem:[%s4467_s18 + $0x180] sm:$0xff] %v3276_v20  ;;  %v3050_v20 = vld [vmem:[#allocation2 + $0xb8] sm:$0xff]  ;;  %v3181_v27 = vadd.f32 %v5973_v12, %v3049_v52  ;;  %v3299_v35 = vmax.f32 %v3179_v36, 0.0 }
 0x578   : > { %3397 = vst [vmem:[%s4467_s18 + $0x188] sm:$0xff] %v3277_v47  ;;  %v3051_v47 = vld [vmem:[#allocation2 + $0x1e8] sm:$0xff]  ;;  %v3182_v5 = vadd.f32 %v5975_v57, %v3050_v20  ;;  %v3300_v15 = vmax.f32 %v3180_v48, 0.0 }
 0x579   : > { %3398 = vst [vmem:[%s4467_s18 + $0x190] sm:$0xff] %v3278_v61  ;;  %v3052_v61 = vld [vmem:[#allocation2 + $0x2b8] sm:$0xff]  ;;  %v3183_v44 = vadd.f32 %v5967_v29, %v3051_v47  ;;  %v3301_v8 = vmax.f32 %v3181_v27, 0.0 }
 0x57a   : > { %3399 = vst [vmem:[%s4467_s18 + $0x198] sm:$0xff] %v3279_v17  ;;  %v3053_v17 = vld [vmem:[#allocation2 + $0x128] sm:$0xff]  ;;  %v3184_v16 = vadd.f32 %v5969_v32, %v3052_v61  ;;  %v3302_v45 = vmax.f32 %v3182_v5, 0.0 }
 0x57b   : > { %3400 = vst [vmem:[%s4467_s18 + $0x1a0] sm:$0xff] %v3280_v58  ;;  %v3054_v58 = vld [vmem:[#allocation2 + $0xa0] sm:$0xff]  ;;  %v3185_v7 = vadd.f32 %v5971_v13, %v3053_v17  ;;  %v3303_v40 = vmax.f32 %v3183_v44, 0.0 }
 0x57c   : > { %3401 = vst [vmem:[%s4467_s18 + $0x1a8] sm:$0xff] %v3281_v28  ;;  %v3055_v28 = vld [vmem:[#allocation2 + $0x3a0] sm:$0xff]  ;;  %v3186_v25 = vadd.f32 %v5973_v12, %v3054_v58  ;;  %v3304_v56 = vmax.f32 %v3184_v16, 0.0 }
 0x57d   : > { %3402 = vst [vmem:[%s4467_s18 + $0x1b0] sm:$0xff] %v3282_v1  ;;  %v3056_v1 = vld [vmem:[#allocation2 + $0x2f8] sm:$0xff]  ;;  %v3187_v51 = vadd.f32 %v5975_v57, %v3055_v28  ;;  %v3305_v3 = vmax.f32 %v3185_v7, 0.0 }
 0x57e   : > { %3403 = vst [vmem:[%s4467_s18 + $0x1b8] sm:$0xff] %v3283_v4  ;;  %v3057_v4 = vld [vmem:[#allocation2 + $0x350] sm:$0xff]  ;;  %v3188_v2 = vadd.f32 %v5967_v29, %v3056_v1  ;;  %v3306_v46 = vmax.f32 %v3186_v25, 0.0 }
 0x57f   : > { %3404 = vst [vmem:[%s4467_s18 + $0x1c0] sm:$0xff] %v3284_v37  ;;  %v3058_v37 = vld [vmem:[#allocation2 + $0x230] sm:$0xff]  ;;  %v3189_v39 = vadd.f32 %v5969_v32, %v3057_v4  ;;  %v3307_v63 = vmax.f32 %v3187_v51, 0.0 }
 0x580   : > { %3405 = vst [vmem:[%s4467_s18 + $0x1c8] sm:$0xff] %v3285_v11  ;;  %v3059_v11 = vld [vmem:[#allocation2 + $0x298] sm:$0xff]  ;;  %v3190_v22 = vadd.f32 %v5971_v13, %v3058_v37  ;;  %v3308_v23 = vmax.f32 %v3188_v2, 0.0 }
 0x581   : > { %3406 = vst [vmem:[%s4467_s18 + $0x1d0] sm:$0xff] %v3286_v55  ;;  %v3060_v55 = vld [vmem:[#allocation2 + $0x318] sm:$0xff]  ;;  %v3191_v43 = vadd.f32 %v5973_v12, %v3059_v11  ;;  %v3309_v53 = vmax.f32 %v3189_v39, 0.0 }
 0x582   : > { %3407 = vst [vmem:[%s4467_s18 + $0x1d8] sm:$0xff] %v3287_v18  ;;  %v3061_v18 = vld [vmem:[#allocation2 + $0x160] sm:$0xff]  ;;  %v3192_v0 = vadd.f32 %v5975_v57, %v3060_v55  ;;  %v3310_v6 = vmax.f32 %v3190_v22, 0.0 }
 0x583   : > { %3408 = vst [vmem:[%s4467_s18 + $0x1e0] sm:$0xff] %v3288_v30  ;;  %v3062_v30 = vld [vmem:[#allocation2 + $0x88] sm:$0xff]  ;;  %v3193_v24 = vadd.f32 %v5967_v29, %v3061_v18  ;;  %v3311_v9 = vmax.f32 %v3191_v43, 0.0 }
 0x584   : > { %3409 = vst [vmem:[%s4467_s18 + $0x1e8] sm:$0xff] %v3289_v62  ;;  %v3063_v62 = vld [vmem:[#allocation2 + $0x28] sm:$0xff]  ;;  %v3194_v59 = vadd.f32 %v5969_v32, %v3062_v30  ;;  %v3312_v42 = vmax.f32 %v3192_v0, 0.0 }
 0x585   : > { %3410 = vst [vmem:[%s4467_s18 + $0x1f0] sm:$0xff] %v3290_v26  ;;  %v3064_v26 = vld [vmem:[#allocation2 + $0x120] sm:$0xff]  ;;  %v3195_v49 = vadd.f32 %v5971_v13, %v3063_v62  ;;  %v3313_v21 = vmax.f32 %v3193_v24, 0.0 }
 0x586   : > { %3411 = vst [vmem:[%s4467_s18 + $0x1f8] sm:$0xff] %v3291_v34  ;;  %v3065_v34 = vld [vmem:[#allocation2 + $0x140] sm:$0xff]  ;;  %v3196_v19 = vadd.f32 %v5973_v12, %v3064_v26  ;;  %v3314_v31 = vmax.f32 %v3194_v59, 0.0 }
 0x587   : > { %3412 = vst [vmem:[%s4467_s18 + $0x200] sm:$0xff] %v3292_v60  ;;  %v3066_v60 = vld [vmem:[#allocation2 + $0x68] sm:$0xff]  ;;  %v3197_v10 = vadd.f32 %v5975_v57, %v3065_v34  ;;  %v3315_v36 = vmax.f32 %v3195_v49, 0.0 }
 0x588   : > { %3413 = vst [vmem:[%s4467_s18 + $0x208] sm:$0xff] %v3293_v50  ;;  %v3067_v50 = vld [vmem:[#allocation2 + $0xd0] sm:$0xff]  ;;  %v3198_v52 = vadd.f32 %v5967_v29, %v3066_v60  ;;  %v3316_v48 = vmax.f32 %v3196_v19, 0.0 }
 0x589   : > { %3414 = vst [vmem:[%s4467_s18 + $0x210] sm:$0xff] %v3294_v38  ;;  %v3068_v38 = vld [vmem:[#allocation2 + $0x180] sm:$0xff]  ;;  %v3199_v20 = vadd.f32 %v5969_v32, %v3067_v50  ;;  %v3317_v27 = vmax.f32 %v3197_v10, 0.0 }
 0x58a   : > { %3415 = vst [vmem:[%s4467_s18 + $0x218] sm:$0xff] %v3295_v14  ;;  %v3069_v14 = vld [vmem:[#allocation2 + $0x378] sm:$0xff]  ;;  %v3200_v47 = vadd.f32 %v5971_v13, %v3068_v38  ;;  %v3318_v5 = vmax.f32 %v3198_v52, 0.0 }
 0x58b   : > { %3416 = vst [vmem:[%s4467_s18 + $0x220] sm:$0xff] %v3296_v33  ;;  %v3070_v33 = vld [vmem:[#allocation2 + $0x258] sm:$0xff]  ;;  %v3201_v61 = vadd.f32 %v5973_v12, %v3069_v14  ;;  %v3319_v44 = vmax.f32 %v3199_v20, 0.0 }
 0x58c   : > { %3417 = vst [vmem:[%s4467_s18 + $0x228] sm:$0xff] %v3297_v41  ;;  %v3071_v41 = vld [vmem:[#allocation2 + $0x220] sm:$0xff]  ;;  %v3202_v17 = vadd.f32 %v5975_v57, %v3070_v33  ;;  %v3320_v16 = vmax.f32 %v3200_v47, 0.0 }
 0x58d   : > { %3418 = vst [vmem:[%s4467_s18 + $0x230] sm:$0xff] %v3298_v54  ;;  %v3072_v54 = vld [vmem:[#allocation2 + $0x2a0] sm:$0xff]  ;;  %v3203_v58 = vadd.f32 %v5967_v29, %v3071_v41  ;;  %v3321_v7 = vmax.f32 %v3201_v61, 0.0 }
 0x58e   : > { %3419 = vst [vmem:[%s4467_s18 + $0x238] sm:$0xff] %v3299_v35  ;;  %v3073_v35 = vld [vmem:[#allocation2 + $0x1a0] sm:$0xff]  ;;  %v3204_v28 = vadd.f32 %v5969_v32, %v3072_v54  ;;  %v3322_v25 = vmax.f32 %v3202_v17, 0.0 }
 0x58f   : > { %3420 = vst [vmem:[%s4467_s18 + $0x240] sm:$0xff] %v3300_v15  ;;  %v3074_v15 = vld [vmem:[#allocation2 + $0x58] sm:$0xff]  ;;  %v3205_v1 = vadd.f32 %v5971_v13, %v3073_v35  ;;  %v3323_v51 = vmax.f32 %v3203_v58, 0.0 }
 0x590   : > { %3421 = vst [vmem:[%s4467_s18 + $0x248] sm:$0xff] %v3301_v8  ;;  %v3075_v8 = vld [vmem:[#allocation2 + $0x208] sm:$0xff]  ;;  %v3206_v4 = vadd.f32 %v5973_v12, %v3074_v15  ;;  %v3324_v2 = vmax.f32 %v3204_v28, 0.0 }
 0x591   : > { %3422 = vst [vmem:[%s4467_s18 + $0x250] sm:$0xff] %v3302_v45  ;;  %v3076_v45 = vld [vmem:[#allocation2 + $0x1e0] sm:$0xff]  ;;  %v3207_v37 = vadd.f32 %v5975_v57, %v3075_v8  ;;  %v3325_v39 = vmax.f32 %v3205_v1, 0.0 }
 0x592   : > { %3423 = vst [vmem:[%s4467_s18 + $0x258] sm:$0xff] %v3303_v40  ;;  %v3077_v40 = vld [vmem:[#allocation2 + $0x100] sm:$0xff]  ;;  %v3208_v11 = vadd.f32 %v5967_v29, %v3076_v45  ;;  %v3326_v22 = vmax.f32 %v3206_v4, 0.0 }
 0x593   : > { %3424 = vst [vmem:[%s4467_s18 + $0x260] sm:$0xff] %v3304_v56  ;;  %v3078_v56 = vld [vmem:[#allocation2 + $0x10] sm:$0xff]  ;;  %v3209_v55 = vadd.f32 %v5969_v32, %v3077_v40  ;;  %v3327_v43 = vmax.f32 %v3207_v37, 0.0 }
 0x594   : > { %3425 = vst [vmem:[%s4467_s18 + $0x268] sm:$0xff] %v3305_v3  ;;  %v3079_v3 = vld [vmem:[#allocation2 + $0x268] sm:$0xff]  ;;  %v3210_v18 = vadd.f32 %v5971_v13, %v3078_v56  ;;  %v3328_v0 = vmax.f32 %v3208_v11, 0.0 }
 0x595   : > { %3426 = vst [vmem:[%s4467_s18 + $0x270] sm:$0xff] %v3306_v46  ;;  %v3080_v46 = vld [vmem:[#allocation2 + $0x248] sm:$0xff]  ;;  %v3211_v30 = vadd.f32 %v5973_v12, %v3079_v3  ;;  %v3329_v24 = vmax.f32 %v3209_v55, 0.0 }
 0x596   : > { %3427 = vst [vmem:[%s4467_s18 + $0x278] sm:$0xff] %v3307_v63  ;;  %v3081_v63 = vld [vmem:[#allocation2 + $0x190] sm:$0xff]  ;;  %v3212_v62 = vadd.f32 %v5975_v57, %v3080_v46  ;;  %v3330_v59 = vmax.f32 %v3210_v18, 0.0 }
 0x597   : > { %3428 = vst [vmem:[%s4467_s18 + $0x280] sm:$0xff] %v3308_v23  ;;  %v3082_v23 = vld [vmem:[#allocation2 + $0x1f8] sm:$0xff]  ;;  %v3213_v26 = vadd.f32 %v5967_v29, %v3081_v63  ;;  %v3331_v49 = vmax.f32 %v3211_v30, 0.0 }
 0x598   : > { %3429 = vst [vmem:[%s4467_s18 + $0x288] sm:$0xff] %v3309_v53  ;;  %v3083_v53 = vld [vmem:[#allocation2 + $0x218] sm:$0xff]  ;;  %v3214_v34 = vadd.f32 %v5969_v32, %v3082_v23  ;;  %v3332_v19 = vmax.f32 %v3212_v62, 0.0 }
 0x599   : > { %3430 = vst [vmem:[%s4467_s18 + $0x290] sm:$0xff] %v3310_v6  ;;  %v3084_v6 = vld [vmem:[#allocation2 + $0x198] sm:$0xff]  ;;  %v3215_v60 = vadd.f32 %v5971_v13, %v3083_v53  ;;  %v3333_v10 = vmax.f32 %v3213_v26, 0.0 }
 0x59a   : > { %3431 = vst [vmem:[%s4467_s18 + $0x298] sm:$0xff] %v3311_v9  ;;  %v3085_v9 = vld [vmem:[#allocation2 + $0x2a8] sm:$0xff]  ;;  %v3216_v50 = vadd.f32 %v5973_v12, %v3084_v6  ;;  %v3334_v52 = vmax.f32 %v3214_v34, 0.0 }
 0x59b   : > { %3432 = vst [vmem:[%s4467_s18 + $0x2a0] sm:$0xff] %v3312_v42  ;;  %v3086_v42 = vld [vmem:[#allocation2 + $0xc8] sm:$0xff]  ;;  %v3217_v38 = vadd.f32 %v5975_v57, %v3085_v9  ;;  %v3335_v20 = vmax.f32 %v3215_v60, 0.0 }
 0x59c   : > { %3433 = vst [vmem:[%s4467_s18 + $0x2a8] sm:$0xff] %v3313_v21  ;;  %v3087_v21 = vld [vmem:[#allocation2 + $0x3b8] sm:$0xff]  ;;  %v3218_v14 = vadd.f32 %v5967_v29, %v3086_v42  ;;  %v3336_v47 = vmax.f32 %v3216_v50, 0.0 }
 0x59d   : > { %3434 = vst [vmem:[%s4467_s18 + $0x2b0] sm:$0xff] %v3314_v31  ;;  %v3088_v31 = vld [vmem:[#allocation2 + $0x240] sm:$0xff]  ;;  %v3219_v33 = vadd.f32 %v5969_v32, %v3087_v21  ;;  %v3337_v61 = vmax.f32 %v3217_v38, 0.0 }
 0x59e   : > { %3435 = vst [vmem:[%s4467_s18 + $0x2b8] sm:$0xff] %v3315_v36  ;;  %v3089_v36 = vld [vmem:[#allocation2 + $0x178] sm:$0xff]  ;;  %v3220_v41 = vadd.f32 %v5971_v13, %v3088_v31  ;;  %v3338_v17 = vmax.f32 %v3218_v14, 0.0 }
 0x59f   : > { %3436 = vst [vmem:[%s4467_s18 + $0x2c0] sm:$0xff] %v3316_v48  ;;  %v3090_v48 = vld [vmem:[#allocation2 + $0xb0] sm:$0xff]  ;;  %v3221_v54 = vadd.f32 %v5973_v12, %v3089_v36  ;;  %v3339_v58 = vmax.f32 %v3219_v33, 0.0 }
 0x5a0   : > { %3437 = vst [vmem:[%s4467_s18 + $0x2c8] sm:$0xff] %v3317_v27  ;;  %v3091_v27 = vld [vmem:[#allocation2 + $0x398] sm:$0xff]  ;;  %v3222_v35 = vadd.f32 %v5975_v57, %v3090_v48  ;;  %v3340_v28 = vmax.f32 %v3220_v41, 0.0 }
 0x5a1   : > { %3438 = vst [vmem:[%s4467_s18 + $0x2d0] sm:$0xff] %v3318_v5  ;;  %v3092_v5 = vld [vmem:[#allocation2 + $0x2d8] sm:$0xff]  ;;  %v3223_v15 = vadd.f32 %v5967_v29, %v3091_v27  ;;  %v3341_v1 = vmax.f32 %v3221_v54, 0.0 }
 0x5a2   : > { %3439 = vst [vmem:[%s4467_s18 + $0x2d8] sm:$0xff] %v3319_v44  ;;  %v3093_v44 = vld [vmem:[#allocation2 + $0x1c8] sm:$0xff]  ;;  %v3224_v8 = vadd.f32 %v5969_v32, %v3092_v5 }
 0x5a3   : > { %3440 = vst [vmem:[%s4467_s18 + $0x2e0] sm:$0xff] %v3320_v16  ;;  %v3094_v16 = vld [vmem:[#allocation2 + $0x2c8] sm:$0xff]  ;;  %v3225_v45 = vadd.f32 %v5971_v13, %v3093_v44  ;;  %v3343_v4 = vmax.f32 %v3223_v15, 0.0 }
 0x5a4   : > { %3441 = vst [vmem:[%s4467_s18 + $0x2e8] sm:$0xff] %v3321_v7  ;;  %v3095_v7 = vld [vmem:[#allocation2 + $0x310] sm:$0xff]  ;;  %v3226_v29 = vadd.f32 %v5973_v12, %v3094_v16  ;;  %v3344_v32 = vmax.f32 %v3224_v8, 0.0 }
 0x5a5   : > { %3442 = vst [vmem:[%s4467_s18 + $0x2f0] sm:$0xff] %v3322_v25  ;;  %v3342_v25 = vmax.f32 %v3222_v35, 0.0  ;;  %v3227_v40 = vadd.f32 %v5975_v57, %v3095_v7 }
 0x5a6   : > { %3443 = vst [vmem:[%s4467_s18 + $0x2f8] sm:$0xff] %v3323_v51  ;;  %v3345_v51 = vmax.f32 %v3225_v45, 0.0  ;;  %v3346_v37 = vmax.f32 %v3226_v29, 0.0 }
 0x5a7   : > { %3444 = vst [vmem:[%s4467_s18 + $0x300] sm:$0xff] %v3324_v2  ;;  %v3347_v56 = vmax.f32 %v3227_v40, 0.0 }
 0x5a8   : > { %3445 = vst [vmem:[%s4467_s18 + $0x308] sm:$0xff] %v3325_v39 }
 0x5a9   : > { %3446 = vst [vmem:[%s4467_s18 + $0x310] sm:$0xff] %v3326_v22 }
 0x5aa   : > { %3447 = vst [vmem:[%s4467_s18 + $0x318] sm:$0xff] %v3327_v43 }
 0x5ab   : > { %3448 = vst [vmem:[%s4467_s18 + $0x320] sm:$0xff] %v3328_v0 }
 0x5ac   : > { %3449 = vst [vmem:[%s4467_s18 + $0x328] sm:$0xff] %v3329_v24 }
 0x5ad   : > { %3450 = vst [vmem:[%s4467_s18 + $0x330] sm:$0xff] %v3330_v59 }
 0x5ae   : > { %3451 = vst [vmem:[%s4467_s18 + $0x338] sm:$0xff] %v3331_v49 }
 0x5af   : > { %3452 = vst [vmem:[%s4467_s18 + $0x340] sm:$0xff] %v3332_v19 }
 0x5b0   : > { %3453 = vst [vmem:[%s4467_s18 + $0x348] sm:$0xff] %v3333_v10 }
 0x5b1   : > { %3454 = vst [vmem:[%s4467_s18 + $0x350] sm:$0xff] %v3334_v52 }
 0x5b2   : > { %3455 = vst [vmem:[%s4467_s18 + $0x358] sm:$0xff] %v3335_v20 }
 0x5b3   : > { %3456 = vst [vmem:[%s4467_s18 + $0x360] sm:$0xff] %v3336_v47 }
 0x5b4   : > { %3457 = vst [vmem:[%s4467_s18 + $0x368] sm:$0xff] %v3337_v61 }
 0x5b5   : > { %3458 = vst [vmem:[%s4467_s18 + $0x370] sm:$0xff] %v3338_v17 }
 0x5b6   : > { %3459 = vst [vmem:[%s4467_s18 + $0x378] sm:$0xff] %v3339_v58 }
 0x5b7   : > { %3460 = vst [vmem:[%s4467_s18 + $0x380] sm:$0xff] %v3340_v28 }
 0x5b8   : > { %3461 = vst [vmem:[%s4467_s18 + $0x388] sm:$0xff] %v3341_v1 }
 0x5b9   : > { %3462 = vst [vmem:[%s4467_s18 + $0x390] sm:$0xff] %v3342_v25 }
 0x5ba   : > { %3463 = vst [vmem:[%s4467_s18 + $0x398] sm:$0xff] %v3343_v4 }
 0x5bb   : > { %3464 = vst [vmem:[%s4467_s18 + $0x3a0] sm:$0xff] %v3344_v32 }
 0x5bc   : > { %3465 = vst [vmem:[%s4467_s18 + $0x3a8] sm:$0xff] %v3345_v51 }
 0x5bd   : > { %3466 = vst [vmem:[%s4467_s18 + $0x3b0] sm:$0xff] %v3346_v37 }
 0x5be   : > { %3467 = vst [vmem:[%s4467_s18 + $0x3b8] sm:$0xff] %v3347_v56 }
 0x5bf PF: > { %s6620_s10 = sld [smem:[#allocation19_spill]]  ;;  %s3484_s9 = sshll.u32 %s4467_s18, 4  ;;  %s3485_s9 = int_to_ptr.vmem [resolvable:$true] %s3484_s9 }
 0x5c0   : > { %s6623_s15 = sld [smem:[#allocation77_spill]]  ;;  %s3469_s14 = scalar_lea.sflag [#allocation5], %s282_s3 }
 0x5c5   : > { %s3671_s28 = smul.u32 960, %s6620_s10 }
 0x5c6   : > { %s6624_s2 = smov %s6623_s15 }
 0x5c7   : > { %s3483_s22 = scalar_lea.hbm %s6623_s15, %s3671_s28  ;;  %s4096_s11 = scalar_lea.hbm %s6624_s2, 1920 }
 0x5c8   : > { %s3486_s24 = sshll.u32 %s3483_s22, 4  ;;  %s3487_s24 = int_to_ptr.hbm [resolvable:$true] %s3486_s24 }
 0x5c9   : > { %s4090_s20 = sshra.s32 %s3487_s24, 4  ;;  %s4091_s20 = int_to_ptr.hbm [resolvable:$true] %s4090_s20 }
 0x5ca   : > { %s4092_s5 = scalar_lea.hbm %s4091_s20, 960  ;;  %p4097_p6 = scmp.lt.s32.totalorder %s4091_s20, %s6624_s2 }
 0x5cb   : > { %p4093_p9 = scmp.ne.s32.totalorder %s4091_s20, %s4092_s5  ;;  %p4098_p8 = scmp.lt.s32.totalorder %s4096_s11, %s4092_s5 }
 0x5cd   : > { %p4094_p11 = pnand %p4093_p9, %p4362_p12  ;;  %p4099_p10 = por %p4098_p8, %p4097_p6 }
 0x5cf   : > { %p4095_p3 = pneg %p4094_p11 }
 0x5d1   : > { %p4100_p13 = pnand %p4099_p10, %p4095_p3 }
 0x5d3   : > { %4103 = shalt.err (!%p4100_p13)
}
 0x5d4   : > { %s4239_s3 = smov 640   ;;  %s4240_s30 = smov 40  }
 0x5d5   : > { %3651 = dma.vmem_to_hbm [thread:$0]  (%p4362_p12), %s3485_s9, 15360, %s3487_s24, %s3469_s14, %s4239_s3, %s4239_s3, %s4240_s30  }
 0x5d6 PF: > { %s6625_s18 = sld [smem:[#allocation14_spill]]  ;;  %p3672_p0 = scmp.ge.s32.totalorder %s4230_s25, 2 }
 0x5d8   : > { %p3665_p2 = pnand %p3672_p0, %p4367_p1 }
 0x5da   : > { %p3666_p4 = pneg %p3665_p2 }
 0x5dc   : > { %s3501_s26 = sand.u32 1, %s6625_s18  }
 0x5dd   : > { %s3502_s10 = scalar_lea.sflag [#allocation5], %s3501_s26 }
 0x5de   : > { %4173 = dma.done.wait (%p3666_p4), %s3502_s10, 15360  }
 0x5df   : > { %4175 = vsyncadd (%p3666_p4), %s3502_s10, 4294951936  ;;  %s22_s25 = sadd.s32 1, %s4230_s25   ;;  %s6628_s12 = sld [smem:[#allocation15_spill]] }
 0x5e0   : > { %p6239_p5 = scmp.ge.s32.totalorder %s22_s25, 6   ;;  %s6629_s13 = sld [smem:[#allocation16_spill]] }
 0x5e1   : > { %s6630_s14 = sld [smem:[#allocation27_spill]]  ;;  %s6638_s15 = smov %s4194_s16 }
 0x5e2   : > { %s6631_s8 = sld [smem:[#allocation26_spill]]  ;;  %s6639_s16 = smov %s4198_s17 }
 0x5e3   : > { %s6632_s28 = sld [smem:[#allocation17_spill]]  ;;  %s6641_s18 = smov %s4206_s19 }
 0x5e4   : > { %s6633_s20 = sld [smem:[#allocation28_spill]]  ;;  %s6643_s21 = smov %s4222_s23 }
 0x5e5   : > { %s6634_s22 = sld [smem:[#allocation20_spill]] }
 0x5e6   : > { %s6635_s9 = sld [smem:[#allocation24_spill]] }
 0x5e7   : > { %s6636_s24 = sld [smem:[#allocation25_spill]] }
 0x5e8   : > { %s6640_s17 = smov %s6631_s8  ;;  %21 = sbr.rel (!%p6239_p5) target bundleno = 15 (0xf), region = 103 }
 0x5e9   : > { %s6642_s19 = smov %s6632_s28 }
 0x5ec   : > { %s6644_s23 = smov %s6635_s9 }
 0x5ed   :  { %3508 = vsyncpa [#allocation4], 1 }
 0x5ee   :  { %3510 = vsyncpa [#allocation4 + $0x1], 1 }
 0x5ef   :  { %3511 = vsyncpa [#allocation7], 1 }
 0x5f0   :  { %3513 = vsyncpa [#allocation7 + $0x1], 1 }
 0x5f1   :  { %3514 = vsyncpa [#allocation5], 1 }
 0x5f2   :  { %3516 = vsyncpa [#allocation5 + $0x1], 1 }

</bundles_post_ra>
